<compile_context>
chip_gen: v5e
topology: v5e:2x2
jax: 0.10.0
libtpu: 0.0.40
codegen_flags: <defaults>
</compile_context>

<pallas_src>
import functools

import numpy as np
import jax
import jax.numpy as jnp
from jax import lax
from jax.experimental import pallas as pl
from jax.experimental.pallas import tpu as pltpu

_PI = float(np.pi)
_TWO_PI = float(2.0 * np.pi)
_INV_TWO_PI = float(1.0 / (2.0 * np.pi))

# Column-mask row index (inside the mask input) for each horizontal tap offset.
_MASK_ROW = {-2: 1, -1: 2, 1: 3, 2: 4}


def _same_offsets(k, dil):
    """Tap offsets of torch.nn.Conv2d(..., padding='same') along one axis."""
    total = dil * (k - 1)
    lo = total // 2                      # PyTorch pads `lo` before, rest after
    return [dil * i - lo for i in range(k)]


def _encoder_p_kernel(x_ref, m_ref, w1_ref, b1_ref, w2_ref, b2_ref,
                      w3_ref, b3_ref, w4_ref, b4_ref, o_ref, act_ref,
                      *, H, W, PAD):
    L = H * W
    C0 = PAD                                       # first data column in act_ref

    # Scratch row layout == `out3` channel layout (+ row 20 to stage raw x):
    #   0:8  c3 | 8:12 c2 | 12:14 c1 | 14 sq | 15 sq | 16:18 c1 | 18 sq | 19 sq
    act_ref[...] = jnp.zeros(act_ref.shape, jnp.float32)     # zero data + halos

    masks = m_ref[...]                             # (5, L) of {0, 1} float32

    # ---- UnwrapPhase -> diff along frequency -> pad first row -> square ----
    # diff(unwrap(x))[f] == wrap_to_pi(x[f] - x[f-1]); the cumulative unwrap
    # correction cancels in the first difference and squaring removes the
    # +/-pi boundary ambiguity, so no cumsum is needed.
    x = x_ref[0]                                   # (1, L)
    act_ref[20:21, C0:C0 + L] = x
    x_up = act_ref[20:21, C0 - W:C0 - W + L]       # x shifted down one freq row
    dd = x - x_up
    wrapped = dd - _TWO_PI * jnp.floor((dd + _PI) * _INV_TWO_PI)
    sq = (wrapped * wrapped) * masks[0:1, :]       # zero the padded first row
    for r in (14, 15, 18, 19):                     # every copy of squared_tensor
        act_ref[r:r + 1, C0:C0 + L] = sq

    def conv_same_fma(in_lo, in_hi, w_ref, b_ref, k, dil):
        """Dilated 'same' conv as unrolled VPU outer-product FMAs (no MXU)."""
        cin = in_hi - in_lo
        w = w_ref[...]                             # (cout, k*k*cin), tap-major
        offs = _same_offsets(k, dil)
        acc = None
        t = 0
        for dh in offs:
            for dw in offs:
                s = dh * W + dw
                win = act_ref[in_lo:in_hi, C0 + s:C0 + s + L]     # (cin, L)
                if dw != 0:                        # kill column wrap-around
                    r = _MASK_ROW[dw]
                    win = win * masks[r:r + 1, :]
                for ci in range(cin):
                    j = t * cin + ci
                    term = w[:, j:j + 1] * win[ci:ci + 1, :]      # (cout, L)
                    acc = term if acc is None else acc + term
                t += 1
        return acc + b_ref[...]                    # (cout, L)

    # conv_1 on squared_tensor (row 19) -> c1 (feeds out1 and the out2 copy).
    c1 = conv_same_fma(19, 20, w1_ref, b1_ref, 4, 1)              # (2, L)
    act_ref[16:18, C0:C0 + L] = c1
    act_ref[12:14, C0:C0 + L] = c1
    # conv_2 on out1 = rows 16:19 -> c2.
    c2 = conv_same_fma(16, 19, w2_ref, b2_ref, 3, 2)              # (4, L)
    act_ref[8:12, C0:C0 + L] = c2
    # conv_3 on out2 = rows 8:16 -> c3.
    c3 = conv_same_fma(8, 16, w3_ref, b3_ref, 2, 3)               # (8, L)
    act_ref[0:8, C0:C0 + L] = c3
    # conv_4 (1x1) on out3 = rows 0:20 -> c4.
    c4 = conv_same_fma(0, 20, w4_ref, b4_ref, 1, 4)               # (16, L)

    # out4 = cat(c4, out3, out2, out1, sq): all lane-dense row writes.
    out3 = act_ref[0:20, C0:C0 + L]                               # (20, L)
    o_ref[0, 0:16, :] = c4
    o_ref[0, 16:36, :] = out3
    o_ref[0, 36:44, :] = out3[8:16, :]
    o_ref[0, 44:47, :] = out3[16:19, :]
    o_ref[0, 47:48, :] = out3[19:20, :]


def _flatten_conv_weight(w):
    """(Cout, Cin, kh, kw) -> (Cout, kh*kw*Cin), tap-major / in-channel-minor."""
    cout, cin, kh, kw = w.shape
    return jnp.transpose(w, (0, 2, 3, 1)).reshape(cout, kh * kw * cin)


def encoder_p_forward(x, params):
    """x: (N, 1, F, T) float32 phase.  Returns (N, 48, F, T) float32."""
    N, cin, H, W = x.shape
    assert cin == 1, "Encoder_P's channel concatenation requires in_channels == 1"
    L = H * W
    PAD = ((2 * W + 2 + 127) // 128) * 128         # lane-aligned halo >= max shift

    (w1, b1), (w2, b2), (w3, b3), (w4, b4) = params
    w1f, w2f, w3f, w4f = (_flatten_conv_weight(w) for w in (w1, w2, w3, w4))
    b1c, b2c, b3c, b4c = (jnp.asarray(b, jnp.float32).reshape(-1, 1)
                          for b in (b1, b2, b3, b4))

    # Host-side {0,1} masks: row 0 = "not the zero-padded first frequency row",
    # rows 1..4 = column validity for horizontal tap offsets -2, -1, +1, +2.
    lane = np.arange(L)
    col = lane % W
    masks_np = np.zeros((5, L), np.float32)
    masks_np[0] = (lane >= W)
    for dw, r in _MASK_ROW.items():
        masks_np[r] = (col + dw >= 0) & (col + dw < W)
    masks = jnp.asarray(masks_np)

    x_flat = jnp.asarray(x, jnp.float32).reshape(N, 1, L)
    n_out = 48                                     # 16 + 20 + 8 + 3 + 1

    kernel = functools.partial(_encoder_p_kernel, H=H, W=W, PAD=PAD)

    def _full(a):
        zeros = (0,) * a.ndim
        return pl.BlockSpec(a.shape, lambda n, _z=zeros: _z)

    out_flat = pl.pallas_call(
        kernel,
        out_shape=jax.ShapeDtypeStruct((N, n_out, L), jnp.float32),
        grid_spec=pltpu.PrefetchScalarGridSpec(
            num_scalar_prefetch=0,
            grid=(N,),
            in_specs=[
                pl.BlockSpec((1, 1, L), lambda n: (n, 0, 0)),
                _full(masks),
                _full(w1f), _full(b1c), _full(w2f), _full(b2c),
                _full(w3f), _full(b3c), _full(w4f), _full(b4c),
            ],
            out_specs=pl.BlockSpec((1, n_out, L), lambda n: (n, 0, 0)),
            scratch_shapes=[pltpu.VMEM((21, L + 2 * PAD), jnp.float32)],
        ),
        compiler_params=pltpu.CompilerParams(
            dimension_semantics=("parallel",)),
    )(x_flat, masks, w1f, b1c, w2f, b2c, w3f, b3c, w4f, b4c)

    return out_flat.reshape(N, n_out, H, W)


# ----------------------------- pure-JAX reference -----------------------------

def _np_unwrap(p, axis=-2):
    """Faithful jnp replica of numpy.unwrap (discont=pi, period=2*pi)."""
    dd = jnp.diff(p, axis=axis)
    ddmod = jnp.mod(dd + jnp.pi, 2.0 * jnp.pi) - jnp.pi
    ddmod = jnp.where((ddmod == -jnp.pi) & (dd > 0), jnp.pi, ddmod)
    ph_correct = jnp.where(jnp.abs(dd) < jnp.pi, 0.0, ddmod - dd)
    pad_cfg = [(0, 0)] * p.ndim
    pad_cfg[axis] = (1, 0)
    correction = jnp.pad(jnp.cumsum(ph_correct, axis=axis), pad_cfg)
    return p + correction


def encoder_p_reference(x, params):
    (w1, b1), (w2, b2), (w3, b3), (w4, b4) = params
    unw = _np_unwrap(x, axis=-2)
    diff = unw[:, :, 1:, :] - unw[:, :, :-1, :]
    sq = jnp.pad(diff, ((0, 0), (0, 0), (1, 0), (0, 0))) ** 2

    def conv_same(a, w, b, dil):
        k = w.shape[2]
        tot = dil * (k - 1)
        lo = tot - (tot // 2)  # placeholder, fixed below
        lo = tot // 2
        y = lax.conv_general_dilated(
            a, w, window_strides=(1, 1),
            padding=((lo, tot - lo), (lo, tot - lo)),
            rhs_dilation=(dil, dil),
            dimension_numbers=('NCHW', 'OIHW', 'NCHW'),
            precision=lax.Precision.HIGHEST)
        return y + b.reshape(1, -1, 1, 1)

    c1 = conv_same(sq, w1, b1, 1)
    out1 = jnp.concatenate([c1, sq], axis=1)
    c2 = conv_same(out1, w2, b2, 2)
    out2 = jnp.concatenate([c2, out1, sq], axis=1)
    c3 = conv_same(out2, w3, b3, 3)
    out3 = jnp.concatenate([c3, out2, out1, sq], axis=1)
    c4 = conv_same(out3, w4, b4, 4)
    return jnp.concatenate([c4, out3, out2, out1, sq], axis=1)


def init_params(key):
    """Deterministic synthetic weights with the Encoder_P conv shapes."""
    shapes = [(2, 1, 4), (4, 3, 3), (8, 8, 2), (16, 20, 1)]   # (cout, cin, k)
    params = []
    for i, (cout, cin, k) in enumerate(shapes):
        kw, kb = jax.random.split(jax.random.fold_in(key, i))
        w = 0.1 * jax.random.normal(kw, (cout, cin, k, k), jnp.float32)
        b = 0.1 * jax.random.normal(kb, (cout,), jnp.float32)
        params.append((w, b))
    return tuple(params)


if __name__ == "__main__":
    N, C, H, W = 2, 1, 16, 16            # batch, in_channels(=1), freq, time
    key = jax.random.PRNGKey(0)
    kx, kp = jax.random.split(key)
    x = jax.random.normal(kx, (N, C, H, W), jnp.float32)
    params = init_params(kp)

    out = jax.block_until_ready(encoder_p_forward(x, params))
    ref = encoder_p_reference(x, params)

    assert out.shape == (N, 48, H, W) and out.dtype == jnp.float32
    np.testing.assert_allclose(np.asarray(out), np.asarray(ref),
                               rtol=3e-4, atol=3e-4)
    print("KERNEL_OK")
</pallas_src>

<mosaic_0001>
module attributes {stable_mosaic.version = 11 : i64} {
  func.func @_encoder_p_kernel(%arg0: i32, %arg1: memref<1x1x256xf32, #tpu.memory_space<vmem>>, %arg2: memref<5x256xf32, #tpu.memory_space<vmem>>, %arg3: memref<2x16xf32, #tpu.memory_space<vmem>>, %arg4: memref<2x1xf32, #tpu.memory_space<vmem>>, %arg5: memref<4x27xf32, #tpu.memory_space<vmem>>, %arg6: memref<4x1xf32, #tpu.memory_space<vmem>>, %arg7: memref<8x32xf32, #tpu.memory_space<vmem>>, %arg8: memref<8x1xf32, #tpu.memory_space<vmem>>, %arg9: memref<16x20xf32, #tpu.memory_space<vmem>>, %arg10: memref<16x1xf32, #tpu.memory_space<vmem>>, %arg11: memref<1x48x256xf32, #tpu.memory_space<vmem>>, %arg12: memref<21x512xf32, #tpu.memory_space<vmem>>) attributes {dimension_semantics = [#tpu.dimension_semantics<parallel>], iteration_bounds = array<i64: 2>, scalar_prefetch = 0 : i64, scratch_operands = 1 : i64, tpu.core_type = #tpu.core_type<tc>, window_params = [{transform_indices = @transform_0, window_bounds = array<i64: 1, 1, 256>}, {pipeline_mode = #tpu.pipeline_mode<synchronous>, transform_indices = @transform_1, window_bounds = array<i64: 5, 256>}, {pipeline_mode = #tpu.pipeline_mode<synchronous>, transform_indices = @transform_2, window_bounds = array<i64: 2, 16>}, {pipeline_mode = #tpu.pipeline_mode<synchronous>, transform_indices = @transform_3, window_bounds = array<i64: 2, 1>}, {pipeline_mode = #tpu.pipeline_mode<synchronous>, transform_indices = @transform_4, window_bounds = array<i64: 4, 27>}, {pipeline_mode = #tpu.pipeline_mode<synchronous>, transform_indices = @transform_5, window_bounds = array<i64: 4, 1>}, {pipeline_mode = #tpu.pipeline_mode<synchronous>, transform_indices = @transform_6, window_bounds = array<i64: 8, 32>}, {pipeline_mode = #tpu.pipeline_mode<synchronous>, transform_indices = @transform_7, window_bounds = array<i64: 8, 1>}, {pipeline_mode = #tpu.pipeline_mode<synchronous>, transform_indices = @transform_8, window_bounds = array<i64: 16, 20>}, {pipeline_mode = #tpu.pipeline_mode<synchronous>, transform_indices = @transform_9, window_bounds = array<i64: 16, 1>}, {transform_indices = @transform_10, window_bounds = array<i64: 1, 48, 256>}]} {
    %cst = arith.constant 0.000000e+00 : f32
    %0 = vector.broadcast %cst : f32 to vector<21x512xf32>
    %c0 = arith.constant 0 : index
    %c0_0 = arith.constant 0 : index
    %1 = vector.load %arg12[%c0, %c0_0] : memref<21x512xf32, #tpu.memory_space<vmem>>, vector<21x512xf32>
    tpu.vector_store %arg12[%c0, %c0_0], %0 {strides = array<i32>} : memref<21x512xf32, #tpu.memory_space<vmem>>, vector<21x512xf32>,
    %c0_1 = arith.constant 0 : index
    %c0_2 = arith.constant 0 : index
    %2 = vector.load %arg2[%c0_1, %c0_2] : memref<5x256xf32, #tpu.memory_space<vmem>>, vector<5x256xf32>
    %c0_3 = arith.constant 0 : index
    %c0_4 = arith.constant 0 : index
    %c0_5 = arith.constant 0 : index
    %3 = vector.load %arg1[%c0_3, %c0_4, %c0_5] : memref<1x1x256xf32, #tpu.memory_space<vmem>>, vector<1x1x256xf32>
    %4 = vector.shape_cast %3 : vector<1x1x256xf32> to vector<1x256xf32>
    %c20 = arith.constant 20 : index
    %c128 = arith.constant 128 : index
    %5 = vector.load %arg12[%c20, %c128] : memref<21x512xf32, #tpu.memory_space<vmem>>, vector<1x256xf32>
    tpu.vector_store %arg12[%c20, %c128], %4 {strides = array<i32>} : memref<21x512xf32, #tpu.memory_space<vmem>>, vector<1x256xf32>,
    %c20_6 = arith.constant 20 : index
    %c112 = arith.constant 112 : index
    %6 = vector.load %arg12[%c20_6, %c112] : memref<21x512xf32, #tpu.memory_space<vmem>>, vector<1x256xf32>
    %7 = arith.subf %4, %6 : vector<1x256xf32>
    %cst_7 = arith.constant 3.14159274 : f32
    %8 = vector.broadcast %cst_7 : f32 to vector<1x256xf32>
    %9 = arith.addf %7, %8 : vector<1x256xf32>
    %cst_8 = arith.constant 0.159154937 : f32
    %10 = vector.broadcast %cst_8 : f32 to vector<1x256xf32>
    %11 = arith.mulf %9, %10 : vector<1x256xf32>
    %12 = math.floor %11 : vector<1x256xf32>
    %cst_9 = arith.constant 6.28318548 : f32
    %13 = vector.broadcast %cst_9 : f32 to vector<1x256xf32>
    %14 = arith.mulf %13, %12 : vector<1x256xf32>
    %15 = arith.subf %7, %14 : vector<1x256xf32>
    %16 = arith.mulf %15, %15 : vector<1x256xf32>
    %17 = vector.extract_strided_slice %2 {offsets = [0, 0], sizes = [1, 256], strides = [1, 1]} : vector<5x256xf32> to vector<1x256xf32>
    %18 = arith.mulf %16, %17 : vector<1x256xf32>
    %c14 = arith.constant 14 : index
    %c128_10 = arith.constant 128 : index
    %19 = vector.load %arg12[%c14, %c128_10] : memref<21x512xf32, #tpu.memory_space<vmem>>, vector<1x256xf32>
    tpu.vector_store %arg12[%c14, %c128_10], %18 {strides = array<i32>} : memref<21x512xf32, #tpu.memory_space<vmem>>, vector<1x256xf32>,
    %c15 = arith.constant 15 : index
    %c128_11 = arith.constant 128 : index
    %20 = vector.load %arg12[%c15, %c128_11] : memref<21x512xf32, #tpu.memory_space<vmem>>, vector<1x256xf32>
    tpu.vector_store %arg12[%c15, %c128_11], %18 {strides = array<i32>} : memref<21x512xf32, #tpu.memory_space<vmem>>, vector<1x256xf32>,
    %c18 = arith.constant 18 : index
    %c128_12 = arith.constant 128 : index
    %21 = vector.load %arg12[%c18, %c128_12] : memref<21x512xf32, #tpu.memory_space<vmem>>, vector<1x256xf32>
    tpu.vector_store %arg12[%c18, %c128_12], %18 {strides = array<i32>} : memref<21x512xf32, #tpu.memory_space<vmem>>, vector<1x256xf32>,
    %c19 = arith.constant 19 : index
    %c128_13 = arith.constant 128 : index
    %22 = vector.load %arg12[%c19, %c128_13] : memref<21x512xf32, #tpu.memory_space<vmem>>, vector<1x256xf32>
    tpu.vector_store %arg12[%c19, %c128_13], %18 {strides = array<i32>} : memref<21x512xf32, #tpu.memory_space<vmem>>, vector<1x256xf32>,
    %c0_14 = arith.constant 0 : index
    %c0_15 = arith.constant 0 : index
    %23 = vector.load %arg3[%c0_14, %c0_15] : memref<2x16xf32, #tpu.memory_space<vmem>>, vector<2x16xf32>
    %c19_16 = arith.constant 19 : index
    %c111 = arith.constant 111 : index
    %24 = vector.load %arg12[%c19_16, %c111] : memref<21x512xf32, #tpu.memory_space<vmem>>, vector<1x256xf32>
    %25 = vector.extract_strided_slice %2 {offsets = [2, 0], sizes = [1, 256], strides = [1, 1]} : vector<5x256xf32> to vector<1x256xf32>
    %26 = arith.mulf %24, %25 : vector<1x256xf32>
    %27 = vector.extract_strided_slice %23 {offsets = [0, 0], sizes = [2, 1], strides = [1, 1]} : vector<2x16xf32> to vector<2x1xf32>
    %28 = vector.broadcast %27 : vector<2x1xf32> to vector<2x256xf32>
    %29 = vector.broadcast %26 : vector<1x256xf32> to vector<2x256xf32>
    %30 = arith.mulf %28, %29 : vector<2x256xf32>
    %c19_17 = arith.constant 19 : index
    %c112_18 = arith.constant 112 : index
    %31 = vector.load %arg12[%c19_17, %c112_18] : memref<21x512xf32, #tpu.memory_space<vmem>>, vector<1x256xf32>
    %32 = vector.extract_strided_slice %23 {offsets = [0, 1], sizes = [2, 1], strides = [1, 1]} : vector<2x16xf32> to vector<2x1xf32>
    %33 = vector.broadcast %32 : vector<2x1xf32> to vector<2x256xf32>
    %34 = vector.broadcast %31 : vector<1x256xf32> to vector<2x256xf32>
    %35 = arith.mulf %33, %34 : vector<2x256xf32>
    %36 = arith.addf %30, %35 : vector<2x256xf32>
    %c19_19 = arith.constant 19 : index
    %c113 = arith.constant 113 : index
    %37 = vector.load %arg12[%c19_19, %c113] : memref<21x512xf32, #tpu.memory_space<vmem>>, vector<1x256xf32>
    %38 = vector.extract_strided_slice %2 {offsets = [3, 0], sizes = [1, 256], strides = [1, 1]} : vector<5x256xf32> to vector<1x256xf32>
    %39 = arith.mulf %37, %38 : vector<1x256xf32>
    %40 = vector.extract_strided_slice %23 {offsets = [0, 2], sizes = [2, 1], strides = [1, 1]} : vector<2x16xf32> to vector<2x1xf32>
    %41 = vector.broadcast %40 : vector<2x1xf32> to vector<2x256xf32>
    %42 = vector.broadcast %39 : vector<1x256xf32> to vector<2x256xf32>
    %43 = arith.mulf %41, %42 : vector<2x256xf32>
    %44 = arith.addf %36, %43 : vector<2x256xf32>
    %c19_20 = arith.constant 19 : index
    %c114 = arith.constant 114 : index
    %45 = vector.load %arg12[%c19_20, %c114] : memref<21x512xf32, #tpu.memory_space<vmem>>, vector<1x256xf32>
    %46 = vector.extract_strided_slice %2 {offsets = [4, 0], sizes = [1, 256], strides = [1, 1]} : vector<5x256xf32> to vector<1x256xf32>
    %47 = arith.mulf %45, %46 : vector<1x256xf32>
    %48 = vector.extract_strided_slice %23 {offsets = [0, 3], sizes = [2, 1], strides = [1, 1]} : vector<2x16xf32> to vector<2x1xf32>
    %49 = vector.broadcast %48 : vector<2x1xf32> to vector<2x256xf32>
    %50 = vector.broadcast %47 : vector<1x256xf32> to vector<2x256xf32>
    %51 = arith.mulf %49, %50 : vector<2x256xf32>
    %52 = arith.addf %44, %51 : vector<2x256xf32>
    %c19_21 = arith.constant 19 : index
    %c127 = arith.constant 127 : index
    %53 = vector.load %arg12[%c19_21, %c127] : memref<21x512xf32, #tpu.memory_space<vmem>>, vector<1x256xf32>
    %54 = vector.extract_strided_slice %2 {offsets = [2, 0], sizes = [1, 256], strides = [1, 1]} : vector<5x256xf32> to vector<1x256xf32>
    %55 = arith.mulf %53, %54 : vector<1x256xf32>
    %56 = vector.extract_strided_slice %23 {offsets = [0, 4], sizes = [2, 1], strides = [1, 1]} : vector<2x16xf32> to vector<2x1xf32>
    %57 = vector.broadcast %56 : vector<2x1xf32> to vector<2x256xf32>
    %58 = vector.broadcast %55 : vector<1x256xf32> to vector<2x256xf32>
    %59 = arith.mulf %57, %58 : vector<2x256xf32>
    %60 = arith.addf %52, %59 : vector<2x256xf32>
    %c19_22 = arith.constant 19 : index
    %c128_23 = arith.constant 128 : index
    %61 = vector.load %arg12[%c19_22, %c128_23] : memref<21x512xf32, #tpu.memory_space<vmem>>, vector<1x256xf32>
    %62 = vector.extract_strided_slice %23 {offsets = [0, 5], sizes = [2, 1], strides = [1, 1]} : vector<2x16xf32> to vector<2x1xf32>
    %63 = vector.broadcast %62 : vector<2x1xf32> to vector<2x256xf32>
    %64 = vector.broadcast %61 : vector<1x256xf32> to vector<2x256xf32>
    %65 = arith.mulf %63, %64 : vector<2x256xf32>
    %66 = arith.addf %60, %65 : vector<2x256xf32>
    %c19_24 = arith.constant 19 : index
    %c129 = arith.constant 129 : index
    %67 = vector.load %arg12[%c19_24, %c129] : memref<21x512xf32, #tpu.memory_space<vmem>>, vector<1x256xf32>
    %68 = vector.extract_strided_slice %2 {offsets = [3, 0], sizes = [1, 256], strides = [1, 1]} : vector<5x256xf32> to vector<1x256xf32>
    %69 = arith.mulf %67, %68 : vector<1x256xf32>
    %70 = vector.extract_strided_slice %23 {offsets = [0, 6], sizes = [2, 1], strides = [1, 1]} : vector<2x16xf32> to vector<2x1xf32>
    %71 = vector.broadcast %70 : vector<2x1xf32> to vector<2x256xf32>
    %72 = vector.broadcast %69 : vector<1x256xf32> to vector<2x256xf32>
    %73 = arith.mulf %71, %72 : vector<2x256xf32>
    %74 = arith.addf %66, %73 : vector<2x256xf32>
    %c19_25 = arith.constant 19 : index
    %c130 = arith.constant 130 : index
    %75 = vector.load %arg12[%c19_25, %c130] : memref<21x512xf32, #tpu.memory_space<vmem>>, vector<1x256xf32>
    %76 = vector.extract_strided_slice %2 {offsets = [4, 0], sizes = [1, 256], strides = [1, 1]} : vector<5x256xf32> to vector<1x256xf32>
    %77 = arith.mulf %75, %76 : vector<1x256xf32>
    %78 = vector.extract_strided_slice %23 {offsets = [0, 7], sizes = [2, 1], strides = [1, 1]} : vector<2x16xf32> to vector<2x1xf32>
    %79 = vector.broadcast %78 : vector<2x1xf32> to vector<2x256xf32>
    %80 = vector.broadcast %77 : vector<1x256xf32> to vector<2x256xf32>
    %81 = arith.mulf %79, %80 : vector<2x256xf32>
    %82 = arith.addf %74, %81 : vector<2x256xf32>
    %c19_26 = arith.constant 19 : index
    %c143 = arith.constant 143 : index
    %83 = vector.load %arg12[%c19_26, %c143] : memref<21x512xf32, #tpu.memory_space<vmem>>, vector<1x256xf32>
    %84 = vector.extract_strided_slice %2 {offsets = [2, 0], sizes = [1, 256], strides = [1, 1]} : vector<5x256xf32> to vector<1x256xf32>
    %85 = arith.mulf %83, %84 : vector<1x256xf32>
    %86 = vector.extract_strided_slice %23 {offsets = [0, 8], sizes = [2, 1], strides = [1, 1]} : vector<2x16xf32> to vector<2x1xf32>
    %87 = vector.broadcast %86 : vector<2x1xf32> to vector<2x256xf32>
    %88 = vector.broadcast %85 : vector<1x256xf32> to vector<2x256xf32>
    %89 = arith.mulf %87, %88 : vector<2x256xf32>
    %90 = arith.addf %82, %89 : vector<2x256xf32>
    %c19_27 = arith.constant 19 : index
    %c144 = arith.constant 144 : index
    %91 = vector.load %arg12[%c19_27, %c144] : memref<21x512xf32, #tpu.memory_space<vmem>>, vector<1x256xf32>
    %92 = vector.extract_strided_slice %23 {offsets = [0, 9], sizes = [2, 1], strides = [1, 1]} : vector<2x16xf32> to vector<2x1xf32>
    %93 = vector.broadcast %92 : vector<2x1xf32> to vector<2x256xf32>
    %94 = vector.broadcast %91 : vector<1x256xf32> to vector<2x256xf32>
    %95 = arith.mulf %93, %94 : vector<2x256xf32>
    %96 = arith.addf %90, %95 : vector<2x256xf32>
    %c19_28 = arith.constant 19 : index
    %c145 = arith.constant 145 : index
    %97 = vector.load %arg12[%c19_28, %c145] : memref<21x512xf32, #tpu.memory_space<vmem>>, vector<1x256xf32>
    %98 = vector.extract_strided_slice %2 {offsets = [3, 0], sizes = [1, 256], strides = [1, 1]} : vector<5x256xf32> to vector<1x256xf32>
    %99 = arith.mulf %97, %98 : vector<1x256xf32>
    %100 = vector.extract_strided_slice %23 {offsets = [0, 10], sizes = [2, 1], strides = [1, 1]} : vector<2x16xf32> to vector<2x1xf32>
    %101 = vector.broadcast %100 : vector<2x1xf32> to vector<2x256xf32>
    %102 = vector.broadcast %99 : vector<1x256xf32> to vector<2x256xf32>
    %103 = arith.mulf %101, %102 : vector<2x256xf32>
    %104 = arith.addf %96, %103 : vector<2x256xf32>
    %c19_29 = arith.constant 19 : index
    %c146 = arith.constant 146 : index
    %105 = vector.load %arg12[%c19_29, %c146] : memref<21x512xf32, #tpu.memory_space<vmem>>, vector<1x256xf32>
    %106 = vector.extract_strided_slice %2 {offsets = [4, 0], sizes = [1, 256], strides = [1, 1]} : vector<5x256xf32> to vector<1x256xf32>
    %107 = arith.mulf %105, %106 : vector<1x256xf32>
    %108 = vector.extract_strided_slice %23 {offsets = [0, 11], sizes = [2, 1], strides = [1, 1]} : vector<2x16xf32> to vector<2x1xf32>
    %109 = vector.broadcast %108 : vector<2x1xf32> to vector<2x256xf32>
    %110 = vector.broadcast %107 : vector<1x256xf32> to vector<2x256xf32>
    %111 = arith.mulf %109, %110 : vector<2x256xf32>
    %112 = arith.addf %104, %111 : vector<2x256xf32>
    %c19_30 = arith.constant 19 : index
    %c159 = arith.constant 159 : index
    %113 = vector.load %arg12[%c19_30, %c159] : memref<21x512xf32, #tpu.memory_space<vmem>>, vector<1x256xf32>
    %114 = vector.extract_strided_slice %2 {offsets = [2, 0], sizes = [1, 256], strides = [1, 1]} : vector<5x256xf32> to vector<1x256xf32>
    %115 = arith.mulf %113, %114 : vector<1x256xf32>
    %116 = vector.extract_strided_slice %23 {offsets = [0, 12], sizes = [2, 1], strides = [1, 1]} : vector<2x16xf32> to vector<2x1xf32>
    %117 = vector.broadcast %116 : vector<2x1xf32> to vector<2x256xf32>
    %118 = vector.broadcast %115 : vector<1x256xf32> to vector<2x256xf32>
    %119 = arith.mulf %117, %118 : vector<2x256xf32>
    %120 = arith.addf %112, %119 : vector<2x256xf32>
    %c19_31 = arith.constant 19 : index
    %c160 = arith.constant 160 : index
    %121 = vector.load %arg12[%c19_31, %c160] : memref<21x512xf32, #tpu.memory_space<vmem>>, vector<1x256xf32>
    %122 = vector.extract_strided_slice %23 {offsets = [0, 13], sizes = [2, 1], strides = [1, 1]} : vector<2x16xf32> to vector<2x1xf32>
    %123 = vector.broadcast %122 : vector<2x1xf32> to vector<2x256xf32>
    %124 = vector.broadcast %121 : vector<1x256xf32> to vector<2x256xf32>
    %125 = arith.mulf %123, %124 : vector<2x256xf32>
    %126 = arith.addf %120, %125 : vector<2x256xf32>
    %c19_32 = arith.constant 19 : index
    %c161 = arith.constant 161 : index
    %127 = vector.load %arg12[%c19_32, %c161] : memref<21x512xf32, #tpu.memory_space<vmem>>, vector<1x256xf32>
    %128 = vector.extract_strided_slice %2 {offsets = [3, 0], sizes = [1, 256], strides = [1, 1]} : vector<5x256xf32> to vector<1x256xf32>
    %129 = arith.mulf %127, %128 : vector<1x256xf32>
    %130 = vector.extract_strided_slice %23 {offsets = [0, 14], sizes = [2, 1], strides = [1, 1]} : vector<2x16xf32> to vector<2x1xf32>
    %131 = vector.broadcast %130 : vector<2x1xf32> to vector<2x256xf32>
    %132 = vector.broadcast %129 : vector<1x256xf32> to vector<2x256xf32>
    %133 = arith.mulf %131, %132 : vector<2x256xf32>
    %134 = arith.addf %126, %133 : vector<2x256xf32>
    %c19_33 = arith.constant 19 : index
    %c162 = arith.constant 162 : index
    %135 = vector.load %arg12[%c19_33, %c162] : memref<21x512xf32, #tpu.memory_space<vmem>>, vector<1x256xf32>
    %136 = vector.extract_strided_slice %2 {offsets = [4, 0], sizes = [1, 256], strides = [1, 1]} : vector<5x256xf32> to vector<1x256xf32>
    %137 = arith.mulf %135, %136 : vector<1x256xf32>
    %138 = vector.extract_strided_slice %23 {offsets = [0, 15], sizes = [2, 1], strides = [1, 1]} : vector<2x16xf32> to vector<2x1xf32>
    %139 = vector.broadcast %138 : vector<2x1xf32> to vector<2x256xf32>
    %140 = vector.broadcast %137 : vector<1x256xf32> to vector<2x256xf32>
    %141 = arith.mulf %139, %140 : vector<2x256xf32>
    %142 = arith.addf %134, %141 : vector<2x256xf32>
    %c0_34 = arith.constant 0 : index
    %c0_35 = arith.constant 0 : index
    %143 = vector.load %arg4[%c0_34, %c0_35] : memref<2x1xf32, #tpu.memory_space<vmem>>, vector<2x1xf32>
    %144 = vector.broadcast %143 : vector<2x1xf32> to vector<2x256xf32>
    %145 = arith.addf %142, %144 : vector<2x256xf32>
    %c16 = arith.constant 16 : index
    %c128_36 = arith.constant 128 : index
    %146 = vector.load %arg12[%c16, %c128_36] : memref<21x512xf32, #tpu.memory_space<vmem>>, vector<2x256xf32>
    tpu.vector_store %arg12[%c16, %c128_36], %145 {strides = array<i32>} : memref<21x512xf32, #tpu.memory_space<vmem>>, vector<2x256xf32>,
    %c12 = arith.constant 12 : index
    %c128_37 = arith.constant 128 : index
    %147 = vector.load %arg12[%c12, %c128_37] : memref<21x512xf32, #tpu.memory_space<vmem>>, vector<2x256xf32>
    tpu.vector_store %arg12[%c12, %c128_37], %145 {strides = array<i32>} : memref<21x512xf32, #tpu.memory_space<vmem>>, vector<2x256xf32>,
    %c0_38 = arith.constant 0 : index
    %c0_39 = arith.constant 0 : index
    %148 = vector.load %arg5[%c0_38, %c0_39] : memref<4x27xf32, #tpu.memory_space<vmem>>, vector<4x27xf32>
    %c16_40 = arith.constant 16 : index
    %c94 = arith.constant 94 : index
    %149 = vector.load %arg12[%c16_40, %c94] : memref<21x512xf32, #tpu.memory_space<vmem>>, vector<3x256xf32>
    %150 = vector.extract_strided_slice %2 {offsets = [1, 0], sizes = [1, 256], strides = [1, 1]} : vector<5x256xf32> to vector<1x256xf32>
    %151 = vector.broadcast %150 : vector<1x256xf32> to vector<3x256xf32>
    %152 = arith.mulf %149, %151 : vector<3x256xf32>
    %153 = vector.extract_strided_slice %148 {offsets = [0, 0], sizes = [4, 1], strides = [1, 1]} : vector<4x27xf32> to vector<4x1xf32>
    %154 = vector.extract_strided_slice %152 {offsets = [0, 0], sizes = [1, 256], strides = [1, 1]} : vector<3x256xf32> to vector<1x256xf32>
    %155 = vector.broadcast %153 : vector<4x1xf32> to vector<4x256xf32>
    %156 = vector.broadcast %154 : vector<1x256xf32> to vector<4x256xf32>
    %157 = arith.mulf %155, %156 : vector<4x256xf32>
    %158 = vector.extract_strided_slice %148 {offsets = [0, 1], sizes = [4, 1], strides = [1, 1]} : vector<4x27xf32> to vector<4x1xf32>
    %159 = vector.extract_strided_slice %152 {offsets = [1, 0], sizes = [1, 256], strides = [1, 1]} : vector<3x256xf32> to vector<1x256xf32>
    %160 = vector.broadcast %158 : vector<4x1xf32> to vector<4x256xf32>
    %161 = vector.broadcast %159 : vector<1x256xf32> to vector<4x256xf32>
    %162 = arith.mulf %160, %161 : vector<4x256xf32>
    %163 = arith.addf %157, %162 : vector<4x256xf32>
    %164 = vector.extract_strided_slice %148 {offsets = [0, 2], sizes = [4, 1], strides = [1, 1]} : vector<4x27xf32> to vector<4x1xf32>
    %165 = vector.extract_strided_slice %152 {offsets = [2, 0], sizes = [1, 256], strides = [1, 1]} : vector<3x256xf32> to vector<1x256xf32>
    %166 = vector.broadcast %164 : vector<4x1xf32> to vector<4x256xf32>
    %167 = vector.broadcast %165 : vector<1x256xf32> to vector<4x256xf32>
    %168 = arith.mulf %166, %167 : vector<4x256xf32>
    %169 = arith.addf %163, %168 : vector<4x256xf32>
    %c16_41 = arith.constant 16 : index
    %c96 = arith.constant 96 : index
    %170 = vector.load %arg12[%c16_41, %c96] : memref<21x512xf32, #tpu.memory_space<vmem>>, vector<3x256xf32>
    %171 = vector.extract_strided_slice %148 {offsets = [0, 3], sizes = [4, 1], strides = [1, 1]} : vector<4x27xf32> to vector<4x1xf32>
    %172 = vector.extract_strided_slice %170 {offsets = [0, 0], sizes = [1, 256], strides = [1, 1]} : vector<3x256xf32> to vector<1x256xf32>
    %173 = vector.broadcast %171 : vector<4x1xf32> to vector<4x256xf32>
    %174 = vector.broadcast %172 : vector<1x256xf32> to vector<4x256xf32>
    %175 = arith.mulf %173, %174 : vector<4x256xf32>
    %176 = arith.addf %169, %175 : vector<4x256xf32>
    %177 = vector.extract_strided_slice %148 {offsets = [0, 4], sizes = [4, 1], strides = [1, 1]} : vector<4x27xf32> to vector<4x1xf32>
    %178 = vector.extract_strided_slice %170 {offsets = [1, 0], sizes = [1, 256], strides = [1, 1]} : vector<3x256xf32> to vector<1x256xf32>
    %179 = vector.broadcast %177 : vector<4x1xf32> to vector<4x256xf32>
    %180 = vector.broadcast %178 : vector<1x256xf32> to vector<4x256xf32>
    %181 = arith.mulf %179, %180 : vector<4x256xf32>
    %182 = arith.addf %176, %181 : vector<4x256xf32>
    %183 = vector.extract_strided_slice %148 {offsets = [0, 5], sizes = [4, 1], strides = [1, 1]} : vector<4x27xf32> to vector<4x1xf32>
    %184 = vector.extract_strided_slice %170 {offsets = [2, 0], sizes = [1, 256], strides = [1, 1]} : vector<3x256xf32> to vector<1x256xf32>
    %185 = vector.broadcast %183 : vector<4x1xf32> to vector<4x256xf32>
    %186 = vector.broadcast %184 : vector<1x256xf32> to vector<4x256xf32>
    %187 = arith.mulf %185, %186 : vector<4x256xf32>
    %188 = arith.addf %182, %187 : vector<4x256xf32>
    %c16_42 = arith.constant 16 : index
    %c98 = arith.constant 98 : index
    %189 = vector.load %arg12[%c16_42, %c98] : memref<21x512xf32, #tpu.memory_space<vmem>>, vector<3x256xf32>
    %190 = vector.extract_strided_slice %2 {offsets = [4, 0], sizes = [1, 256], strides = [1, 1]} : vector<5x256xf32> to vector<1x256xf32>
    %191 = vector.broadcast %190 : vector<1x256xf32> to vector<3x256xf32>
    %192 = arith.mulf %189, %191 : vector<3x256xf32>
    %193 = vector.extract_strided_slice %148 {offsets = [0, 6], sizes = [4, 1], strides = [1, 1]} : vector<4x27xf32> to vector<4x1xf32>
    %194 = vector.extract_strided_slice %192 {offsets = [0, 0], sizes = [1, 256], strides = [1, 1]} : vector<3x256xf32> to vector<1x256xf32>
    %195 = vector.broadcast %193 : vector<4x1xf32> to vector<4x256xf32>
    %196 = vector.broadcast %194 : vector<1x256xf32> to vector<4x256xf32>
    %197 = arith.mulf %195, %196 : vector<4x256xf32>
    %198 = arith.addf %188, %197 : vector<4x256xf32>
    %199 = vector.extract_strided_slice %148 {offsets = [0, 7], sizes = [4, 1], strides = [1, 1]} : vector<4x27xf32> to vector<4x1xf32>
    %200 = vector.extract_strided_slice %192 {offsets = [1, 0], sizes = [1, 256], strides = [1, 1]} : vector<3x256xf32> to vector<1x256xf32>
    %201 = vector.broadcast %199 : vector<4x1xf32> to vector<4x256xf32>
    %202 = vector.broadcast %200 : vector<1x256xf32> to vector<4x256xf32>
    %203 = arith.mulf %201, %202 : vector<4x256xf32>
    %204 = arith.addf %198, %203 : vector<4x256xf32>
    %205 = vector.extract_strided_slice %148 {offsets = [0, 8], sizes = [4, 1], strides = [1, 1]} : vector<4x27xf32> to vector<4x1xf32>
    %206 = vector.extract_strided_slice %192 {offsets = [2, 0], sizes = [1, 256], strides = [1, 1]} : vector<3x256xf32> to vector<1x256xf32>
    %207 = vector.broadcast %205 : vector<4x1xf32> to vector<4x256xf32>
    %208 = vector.broadcast %206 : vector<1x256xf32> to vector<4x256xf32>
    %209 = arith.mulf %207, %208 : vector<4x256xf32>
    %210 = arith.addf %204, %209 : vector<4x256xf32>
    %c16_43 = arith.constant 16 : index
    %c126 = arith.constant 126 : index
    %211 = vector.load %arg12[%c16_43, %c126] : memref<21x512xf32, #tpu.memory_space<vmem>>, vector<3x256xf32>
    %212 = vector.extract_strided_slice %2 {offsets = [1, 0], sizes = [1, 256], strides = [1, 1]} : vector<5x256xf32> to vector<1x256xf32>
    %213 = vector.broadcast %212 : vector<1x256xf32> to vector<3x256xf32>
    %214 = arith.mulf %211, %213 : vector<3x256xf32>
    %215 = vector.extract_strided_slice %148 {offsets = [0, 9], sizes = [4, 1], strides = [1, 1]} : vector<4x27xf32> to vector<4x1xf32>
    %216 = vector.extract_strided_slice %214 {offsets = [0, 0], sizes = [1, 256], strides = [1, 1]} : vector<3x256xf32> to vector<1x256xf32>
    %217 = vector.broadcast %215 : vector<4x1xf32> to vector<4x256xf32>
    %218 = vector.broadcast %216 : vector<1x256xf32> to vector<4x256xf32>
    %219 = arith.mulf %217, %218 : vector<4x256xf32>
    %220 = arith.addf %210, %219 : vector<4x256xf32>
    %221 = vector.extract_strided_slice %148 {offsets = [0, 10], sizes = [4, 1], strides = [1, 1]} : vector<4x27xf32> to vector<4x1xf32>
    %222 = vector.extract_strided_slice %214 {offsets = [1, 0], sizes = [1, 256], strides = [1, 1]} : vector<3x256xf32> to vector<1x256xf32>
    %223 = vector.broadcast %221 : vector<4x1xf32> to vector<4x256xf32>
    %224 = vector.broadcast %222 : vector<1x256xf32> to vector<4x256xf32>
    %225 = arith.mulf %223, %224 : vector<4x256xf32>
    %226 = arith.addf %220, %225 : vector<4x256xf32>
    %227 = vector.extract_strided_slice %148 {offsets = [0, 11], sizes = [4, 1], strides = [1, 1]} : vector<4x27xf32> to vector<4x1xf32>
    %228 = vector.extract_strided_slice %214 {offsets = [2, 0], sizes = [1, 256], strides = [1, 1]} : vector<3x256xf32> to vector<1x256xf32>
    %229 = vector.broadcast %227 : vector<4x1xf32> to vector<4x256xf32>
    %230 = vector.broadcast %228 : vector<1x256xf32> to vector<4x256xf32>
    %231 = arith.mulf %229, %230 : vector<4x256xf32>
    %232 = arith.addf %226, %231 : vector<4x256xf32>
    %c16_44 = arith.constant 16 : index
    %c128_45 = arith.constant 128 : index
    %233 = vector.load %arg12[%c16_44, %c128_45] : memref<21x512xf32, #tpu.memory_space<vmem>>, vector<3x256xf32>
    %234 = vector.extract_strided_slice %148 {offsets = [0, 12], sizes = [4, 1], strides = [1, 1]} : vector<4x27xf32> to vector<4x1xf32>
    %235 = vector.extract_strided_slice %233 {offsets = [0, 0], sizes = [1, 256], strides = [1, 1]} : vector<3x256xf32> to vector<1x256xf32>
    %236 = vector.broadcast %234 : vector<4x1xf32> to vector<4x256xf32>
    %237 = vector.broadcast %235 : vector<1x256xf32> to vector<4x256xf32>
    %238 = arith.mulf %236, %237 : vector<4x256xf32>
    %239 = arith.addf %232, %238 : vector<4x256xf32>
    %240 = vector.extract_strided_slice %148 {offsets = [0, 13], sizes = [4, 1], strides = [1, 1]} : vector<4x27xf32> to vector<4x1xf32>
    %241 = vector.extract_strided_slice %233 {offsets = [1, 0], sizes = [1, 256], strides = [1, 1]} : vector<3x256xf32> to vector<1x256xf32>
    %242 = vector.broadcast %240 : vector<4x1xf32> to vector<4x256xf32>
    %243 = vector.broadcast %241 : vector<1x256xf32> to vector<4x256xf32>
    %244 = arith.mulf %242, %243 : vector<4x256xf32>
    %245 = arith.addf %239, %244 : vector<4x256xf32>
    %246 = vector.extract_strided_slice %148 {offsets = [0, 14], sizes = [4, 1], strides = [1, 1]} : vector<4x27xf32> to vector<4x1xf32>
    %247 = vector.extract_strided_slice %233 {offsets = [2, 0], sizes = [1, 256], strides = [1, 1]} : vector<3x256xf32> to vector<1x256xf32>
    %248 = vector.broadcast %246 : vector<4x1xf32> to vector<4x256xf32>
    %249 = vector.broadcast %247 : vector<1x256xf32> to vector<4x256xf32>
    %250 = arith.mulf %248, %249 : vector<4x256xf32>
    %251 = arith.addf %245, %250 : vector<4x256xf32>
    %c16_46 = arith.constant 16 : index
    %c130_47 = arith.constant 130 : index
    %252 = vector.load %arg12[%c16_46, %c130_47] : memref<21x512xf32, #tpu.memory_space<vmem>>, vector<3x256xf32>
    %253 = vector.extract_strided_slice %2 {offsets = [4, 0], sizes = [1, 256], strides = [1, 1]} : vector<5x256xf32> to vector<1x256xf32>
    %254 = vector.broadcast %253 : vector<1x256xf32> to vector<3x256xf32>
    %255 = arith.mulf %252, %254 : vector<3x256xf32>
    %256 = vector.extract_strided_slice %148 {offsets = [0, 15], sizes = [4, 1], strides = [1, 1]} : vector<4x27xf32> to vector<4x1xf32>
    %257 = vector.extract_strided_slice %255 {offsets = [0, 0], sizes = [1, 256], strides = [1, 1]} : vector<3x256xf32> to vector<1x256xf32>
    %258 = vector.broadcast %256 : vector<4x1xf32> to vector<4x256xf32>
    %259 = vector.broadcast %257 : vector<1x256xf32> to vector<4x256xf32>
    %260 = arith.mulf %258, %259 : vector<4x256xf32>
    %261 = arith.addf %251, %260 : vector<4x256xf32>
    %262 = vector.extract_strided_slice %148 {offsets = [0, 16], sizes = [4, 1], strides = [1, 1]} : vector<4x27xf32> to vector<4x1xf32>
    %263 = vector.extract_strided_slice %255 {offsets = [1, 0], sizes = [1, 256], strides = [1, 1]} : vector<3x256xf32> to vector<1x256xf32>
    %264 = vector.broadcast %262 : vector<4x1xf32> to vector<4x256xf32>
    %265 = vector.broadcast %263 : vector<1x256xf32> to vector<4x256xf32>
    %266 = arith.mulf %264, %265 : vector<4x256xf32>
    %267 = arith.addf %261, %266 : vector<4x256xf32>
    %268 = vector.extract_strided_slice %148 {offsets = [0, 17], sizes = [4, 1], strides = [1, 1]} : vector<4x27xf32> to vector<4x1xf32>
    %269 = vector.extract_strided_slice %255 {offsets = [2, 0], sizes = [1, 256], strides = [1, 1]} : vector<3x256xf32> to vector<1x256xf32>
    %270 = vector.broadcast %268 : vector<4x1xf32> to vector<4x256xf32>
    %271 = vector.broadcast %269 : vector<1x256xf32> to vector<4x256xf32>
    %272 = arith.mulf %270, %271 : vector<4x256xf32>
    %273 = arith.addf %267, %272 : vector<4x256xf32>
    %c16_48 = arith.constant 16 : index
    %c158 = arith.constant 158 : index
    %274 = vector.load %arg12[%c16_48, %c158] : memref<21x512xf32, #tpu.memory_space<vmem>>, vector<3x256xf32>
    %275 = vector.extract_strided_slice %2 {offsets = [1, 0], sizes = [1, 256], strides = [1, 1]} : vector<5x256xf32> to vector<1x256xf32>
    %276 = vector.broadcast %275 : vector<1x256xf32> to vector<3x256xf32>
    %277 = arith.mulf %274, %276 : vector<3x256xf32>
    %278 = vector.extract_strided_slice %148 {offsets = [0, 18], sizes = [4, 1], strides = [1, 1]} : vector<4x27xf32> to vector<4x1xf32>
    %279 = vector.extract_strided_slice %277 {offsets = [0, 0], sizes = [1, 256], strides = [1, 1]} : vector<3x256xf32> to vector<1x256xf32>
    %280 = vector.broadcast %278 : vector<4x1xf32> to vector<4x256xf32>
    %281 = vector.broadcast %279 : vector<1x256xf32> to vector<4x256xf32>
    %282 = arith.mulf %280, %281 : vector<4x256xf32>
    %283 = arith.addf %273, %282 : vector<4x256xf32>
    %284 = vector.extract_strided_slice %148 {offsets = [0, 19], sizes = [4, 1], strides = [1, 1]} : vector<4x27xf32> to vector<4x1xf32>
    %285 = vector.extract_strided_slice %277 {offsets = [1, 0], sizes = [1, 256], strides = [1, 1]} : vector<3x256xf32> to vector<1x256xf32>
    %286 = vector.broadcast %284 : vector<4x1xf32> to vector<4x256xf32>
    %287 = vector.broadcast %285 : vector<1x256xf32> to vector<4x256xf32>
    %288 = arith.mulf %286, %287 : vector<4x256xf32>
    %289 = arith.addf %283, %288 : vector<4x256xf32>
    %290 = vector.extract_strided_slice %148 {offsets = [0, 20], sizes = [4, 1], strides = [1, 1]} : vector<4x27xf32> to vector<4x1xf32>
    %291 = vector.extract_strided_slice %277 {offsets = [2, 0], sizes = [1, 256], strides = [1, 1]} : vector<3x256xf32> to vector<1x256xf32>
    %292 = vector.broadcast %290 : vector<4x1xf32> to vector<4x256xf32>
    %293 = vector.broadcast %291 : vector<1x256xf32> to vector<4x256xf32>
    %294 = arith.mulf %292, %293 : vector<4x256xf32>
    %295 = arith.addf %289, %294 : vector<4x256xf32>
    %c16_49 = arith.constant 16 : index
    %c160_50 = arith.constant 160 : index
    %296 = vector.load %arg12[%c16_49, %c160_50] : memref<21x512xf32, #tpu.memory_space<vmem>>, vector<3x256xf32>
    %297 = vector.extract_strided_slice %148 {offsets = [0, 21], sizes = [4, 1], strides = [1, 1]} : vector<4x27xf32> to vector<4x1xf32>
    %298 = vector.extract_strided_slice %296 {offsets = [0, 0], sizes = [1, 256], strides = [1, 1]} : vector<3x256xf32> to vector<1x256xf32>
    %299 = vector.broadcast %297 : vector<4x1xf32> to vector<4x256xf32>
    %300 = vector.broadcast %298 : vector<1x256xf32> to vector<4x256xf32>
    %301 = arith.mulf %299, %300 : vector<4x256xf32>
    %302 = arith.addf %295, %301 : vector<4x256xf32>
    %303 = vector.extract_strided_slice %148 {offsets = [0, 22], sizes = [4, 1], strides = [1, 1]} : vector<4x27xf32> to vector<4x1xf32>
    %304 = vector.extract_strided_slice %296 {offsets = [1, 0], sizes = [1, 256], strides = [1, 1]} : vector<3x256xf32> to vector<1x256xf32>
    %305 = vector.broadcast %303 : vector<4x1xf32> to vector<4x256xf32>
    %306 = vector.broadcast %304 : vector<1x256xf32> to vector<4x256xf32>
    %307 = arith.mulf %305, %306 : vector<4x256xf32>
    %308 = arith.addf %302, %307 : vector<4x256xf32>
    %309 = vector.extract_strided_slice %148 {offsets = [0, 23], sizes = [4, 1], strides = [1, 1]} : vector<4x27xf32> to vector<4x1xf32>
    %310 = vector.extract_strided_slice %296 {offsets = [2, 0], sizes = [1, 256], strides = [1, 1]} : vector<3x256xf32> to vector<1x256xf32>
    %311 = vector.broadcast %309 : vector<4x1xf32> to vector<4x256xf32>
    %312 = vector.broadcast %310 : vector<1x256xf32> to vector<4x256xf32>
    %313 = arith.mulf %311, %312 : vector<4x256xf32>
    %314 = arith.addf %308, %313 : vector<4x256xf32>
    %c16_51 = arith.constant 16 : index
    %c162_52 = arith.constant 162 : index
    %315 = vector.load %arg12[%c16_51, %c162_52] : memref<21x512xf32, #tpu.memory_space<vmem>>, vector<3x256xf32>
    %316 = vector.extract_strided_slice %2 {offsets = [4, 0], sizes = [1, 256], strides = [1, 1]} : vector<5x256xf32> to vector<1x256xf32>
    %317 = vector.broadcast %316 : vector<1x256xf32> to vector<3x256xf32>
    %318 = arith.mulf %315, %317 : vector<3x256xf32>
    %319 = vector.extract_strided_slice %148 {offsets = [0, 24], sizes = [4, 1], strides = [1, 1]} : vector<4x27xf32> to vector<4x1xf32>
    %320 = vector.extract_strided_slice %318 {offsets = [0, 0], sizes = [1, 256], strides = [1, 1]} : vector<3x256xf32> to vector<1x256xf32>
    %321 = vector.broadcast %319 : vector<4x1xf32> to vector<4x256xf32>
    %322 = vector.broadcast %320 : vector<1x256xf32> to vector<4x256xf32>
    %323 = arith.mulf %321, %322 : vector<4x256xf32>
    %324 = arith.addf %314, %323 : vector<4x256xf32>
    %325 = vector.extract_strided_slice %148 {offsets = [0, 25], sizes = [4, 1], strides = [1, 1]} : vector<4x27xf32> to vector<4x1xf32>
    %326 = vector.extract_strided_slice %318 {offsets = [1, 0], sizes = [1, 256], strides = [1, 1]} : vector<3x256xf32> to vector<1x256xf32>
    %327 = vector.broadcast %325 : vector<4x1xf32> to vector<4x256xf32>
    %328 = vector.broadcast %326 : vector<1x256xf32> to vector<4x256xf32>
    %329 = arith.mulf %327, %328 : vector<4x256xf32>
    %330 = arith.addf %324, %329 : vector<4x256xf32>
    %331 = vector.extract_strided_slice %148 {offsets = [0, 26], sizes = [4, 1], strides = [1, 1]} : vector<4x27xf32> to vector<4x1xf32>
    %332 = vector.extract_strided_slice %318 {offsets = [2, 0], sizes = [1, 256], strides = [1, 1]} : vector<3x256xf32> to vector<1x256xf32>
    %333 = vector.broadcast %331 : vector<4x1xf32> to vector<4x256xf32>
    %334 = vector.broadcast %332 : vector<1x256xf32> to vector<4x256xf32>
    %335 = arith.mulf %333, %334 : vector<4x256xf32>
    %336 = arith.addf %330, %335 : vector<4x256xf32>
    %c0_53 = arith.constant 0 : index
    %c0_54 = arith.constant 0 : index
    %337 = vector.load %arg6[%c0_53, %c0_54] : memref<4x1xf32, #tpu.memory_space<vmem>>, vector<4x1xf32>
    %338 = vector.broadcast %337 : vector<4x1xf32> to vector<4x256xf32>
    %339 = arith.addf %336, %338 : vector<4x256xf32>
    %c8 = arith.constant 8 : index
    %c128_55 = arith.constant 128 : index
    %340 = vector.load %arg12[%c8, %c128_55] : memref<21x512xf32, #tpu.memory_space<vmem>>, vector<4x256xf32>
    tpu.vector_store %arg12[%c8, %c128_55], %339 {strides = array<i32>} : memref<21x512xf32, #tpu.memory_space<vmem>>, vector<4x256xf32>,
    %c0_56 = arith.constant 0 : index
    %c0_57 = arith.constant 0 : index
    %341 = vector.load %arg7[%c0_56, %c0_57] : memref<8x32xf32, #tpu.memory_space<vmem>>, vector<8x32xf32>
    %c8_58 = arith.constant 8 : index
    %c111_59 = arith.constant 111 : index
    %342 = vector.load %arg12[%c8_58, %c111_59] : memref<21x512xf32, #tpu.memory_space<vmem>>, vector<8x256xf32>
    %343 = vector.extract_strided_slice %2 {offsets = [2, 0], sizes = [1, 256], strides = [1, 1]} : vector<5x256xf32> to vector<1x256xf32>
    %344 = vector.broadcast %343 : vector<1x256xf32> to vector<8x256xf32>
    %345 = arith.mulf %342, %344 : vector<8x256xf32>
    %346 = vector.extract_strided_slice %341 {offsets = [0, 0], sizes = [8, 1], strides = [1, 1]} : vector<8x32xf32> to vector<8x1xf32>
    %347 = vector.extract_strided_slice %345 {offsets = [0, 0], sizes = [1, 256], strides = [1, 1]} : vector<8x256xf32> to vector<1x256xf32>
    %348 = vector.broadcast %346 : vector<8x1xf32> to vector<8x256xf32>
    %349 = vector.broadcast %347 : vector<1x256xf32> to vector<8x256xf32>
    %350 = arith.mulf %348, %349 : vector<8x256xf32>
    %351 = vector.extract_strided_slice %341 {offsets = [0, 1], sizes = [8, 1], strides = [1, 1]} : vector<8x32xf32> to vector<8x1xf32>
    %352 = vector.extract_strided_slice %345 {offsets = [1, 0], sizes = [1, 256], strides = [1, 1]} : vector<8x256xf32> to vector<1x256xf32>
    %353 = vector.broadcast %351 : vector<8x1xf32> to vector<8x256xf32>
    %354 = vector.broadcast %352 : vector<1x256xf32> to vector<8x256xf32>
    %355 = arith.mulf %353, %354 : vector<8x256xf32>
    %356 = arith.addf %350, %355 : vector<8x256xf32>
    %357 = vector.extract_strided_slice %341 {offsets = [0, 2], sizes = [8, 1], strides = [1, 1]} : vector<8x32xf32> to vector<8x1xf32>
    %358 = vector.extract_strided_slice %345 {offsets = [2, 0], sizes = [1, 256], strides = [1, 1]} : vector<8x256xf32> to vector<1x256xf32>
    %359 = vector.broadcast %357 : vector<8x1xf32> to vector<8x256xf32>
    %360 = vector.broadcast %358 : vector<1x256xf32> to vector<8x256xf32>
    %361 = arith.mulf %359, %360 : vector<8x256xf32>
    %362 = arith.addf %356, %361 : vector<8x256xf32>
    %363 = vector.extract_strided_slice %341 {offsets = [0, 3], sizes = [8, 1], strides = [1, 1]} : vector<8x32xf32> to vector<8x1xf32>
    %364 = vector.extract_strided_slice %345 {offsets = [3, 0], sizes = [1, 256], strides = [1, 1]} : vector<8x256xf32> to vector<1x256xf32>
    %365 = vector.broadcast %363 : vector<8x1xf32> to vector<8x256xf32>
    %366 = vector.broadcast %364 : vector<1x256xf32> to vector<8x256xf32>
    %367 = arith.mulf %365, %366 : vector<8x256xf32>
    %368 = arith.addf %362, %367 : vector<8x256xf32>
    %369 = vector.extract_strided_slice %341 {offsets = [0, 4], sizes = [8, 1], strides = [1, 1]} : vector<8x32xf32> to vector<8x1xf32>
    %370 = vector.extract_strided_slice %345 {offsets = [4, 0], sizes = [1, 256], strides = [1, 1]} : vector<8x256xf32> to vector<1x256xf32>
    %371 = vector.broadcast %369 : vector<8x1xf32> to vector<8x256xf32>
    %372 = vector.broadcast %370 : vector<1x256xf32> to vector<8x256xf32>
    %373 = arith.mulf %371, %372 : vector<8x256xf32>
    %374 = arith.addf %368, %373 : vector<8x256xf32>
    %375 = vector.extract_strided_slice %341 {offsets = [0, 5], sizes = [8, 1], strides = [1, 1]} : vector<8x32xf32> to vector<8x1xf32>
    %376 = vector.extract_strided_slice %345 {offsets = [5, 0], sizes = [1, 256], strides = [1, 1]} : vector<8x256xf32> to vector<1x256xf32>
    %377 = vector.broadcast %375 : vector<8x1xf32> to vector<8x256xf32>
    %378 = vector.broadcast %376 : vector<1x256xf32> to vector<8x256xf32>
    %379 = arith.mulf %377, %378 : vector<8x256xf32>
    %380 = arith.addf %374, %379 : vector<8x256xf32>
    %381 = vector.extract_strided_slice %341 {offsets = [0, 6], sizes = [8, 1], strides = [1, 1]} : vector<8x32xf32> to vector<8x1xf32>
    %382 = vector.extract_strided_slice %345 {offsets = [6, 0], sizes = [1, 256], strides = [1, 1]} : vector<8x256xf32> to vector<1x256xf32>
    %383 = vector.broadcast %381 : vector<8x1xf32> to vector<8x256xf32>
    %384 = vector.broadcast %382 : vector<1x256xf32> to vector<8x256xf32>
    %385 = arith.mulf %383, %384 : vector<8x256xf32>
    %386 = arith.addf %380, %385 : vector<8x256xf32>
    %387 = vector.extract_strided_slice %341 {offsets = [0, 7], sizes = [8, 1], strides = [1, 1]} : vector<8x32xf32> to vector<8x1xf32>
    %388 = vector.extract_strided_slice %345 {offsets = [7, 0], sizes = [1, 256], strides = [1, 1]} : vector<8x256xf32> to vector<1x256xf32>
    %389 = vector.broadcast %387 : vector<8x1xf32> to vector<8x256xf32>
    %390 = vector.broadcast %388 : vector<1x256xf32> to vector<8x256xf32>
    %391 = arith.mulf %389, %390 : vector<8x256xf32>
    %392 = arith.addf %386, %391 : vector<8x256xf32>
    %c8_60 = arith.constant 8 : index
    %c114_61 = arith.constant 114 : index
    %393 = vector.load %arg12[%c8_60, %c114_61] : memref<21x512xf32, #tpu.memory_space<vmem>>, vector<8x256xf32>
    %394 = vector.extract_strided_slice %2 {offsets = [4, 0], sizes = [1, 256], strides = [1, 1]} : vector<5x256xf32> to vector<1x256xf32>
    %395 = vector.broadcast %394 : vector<1x256xf32> to vector<8x256xf32>
    %396 = arith.mulf %393, %395 : vector<8x256xf32>
    %397 = vector.extract_strided_slice %341 {offsets = [0, 8], sizes = [8, 1], strides = [1, 1]} : vector<8x32xf32> to vector<8x1xf32>
    %398 = vector.extract_strided_slice %396 {offsets = [0, 0], sizes = [1, 256], strides = [1, 1]} : vector<8x256xf32> to vector<1x256xf32>
    %399 = vector.broadcast %397 : vector<8x1xf32> to vector<8x256xf32>
    %400 = vector.broadcast %398 : vector<1x256xf32> to vector<8x256xf32>
    %401 = arith.mulf %399, %400 : vector<8x256xf32>
    %402 = arith.addf %392, %401 : vector<8x256xf32>
    %403 = vector.extract_strided_slice %341 {offsets = [0, 9], sizes = [8, 1], strides = [1, 1]} : vector<8x32xf32> to vector<8x1xf32>
    %404 = vector.extract_strided_slice %396 {offsets = [1, 0], sizes = [1, 256], strides = [1, 1]} : vector<8x256xf32> to vector<1x256xf32>
    %405 = vector.broadcast %403 : vector<8x1xf32> to vector<8x256xf32>
    %406 = vector.broadcast %404 : vector<1x256xf32> to vector<8x256xf32>
    %407 = arith.mulf %405, %406 : vector<8x256xf32>
    %408 = arith.addf %402, %407 : vector<8x256xf32>
    %409 = vector.extract_strided_slice %341 {offsets = [0, 10], sizes = [8, 1], strides = [1, 1]} : vector<8x32xf32> to vector<8x1xf32>
    %410 = vector.extract_strided_slice %396 {offsets = [2, 0], sizes = [1, 256], strides = [1, 1]} : vector<8x256xf32> to vector<1x256xf32>
    %411 = vector.broadcast %409 : vector<8x1xf32> to vector<8x256xf32>
    %412 = vector.broadcast %410 : vector<1x256xf32> to vector<8x256xf32>
    %413 = arith.mulf %411, %412 : vector<8x256xf32>
    %414 = arith.addf %408, %413 : vector<8x256xf32>
    %415 = vector.extract_strided_slice %341 {offsets = [0, 11], sizes = [8, 1], strides = [1, 1]} : vector<8x32xf32> to vector<8x1xf32>
    %416 = vector.extract_strided_slice %396 {offsets = [3, 0], sizes = [1, 256], strides = [1, 1]} : vector<8x256xf32> to vector<1x256xf32>
    %417 = vector.broadcast %415 : vector<8x1xf32> to vector<8x256xf32>
    %418 = vector.broadcast %416 : vector<1x256xf32> to vector<8x256xf32>
    %419 = arith.mulf %417, %418 : vector<8x256xf32>
    %420 = arith.addf %414, %419 : vector<8x256xf32>
    %421 = vector.extract_strided_slice %341 {offsets = [0, 12], sizes = [8, 1], strides = [1, 1]} : vector<8x32xf32> to vector<8x1xf32>
    %422 = vector.extract_strided_slice %396 {offsets = [4, 0], sizes = [1, 256], strides = [1, 1]} : vector<8x256xf32> to vector<1x256xf32>
    %423 = vector.broadcast %421 : vector<8x1xf32> to vector<8x256xf32>
    %424 = vector.broadcast %422 : vector<1x256xf32> to vector<8x256xf32>
    %425 = arith.mulf %423, %424 : vector<8x256xf32>
    %426 = arith.addf %420, %425 : vector<8x256xf32>
    %427 = vector.extract_strided_slice %341 {offsets = [0, 13], sizes = [8, 1], strides = [1, 1]} : vector<8x32xf32> to vector<8x1xf32>
    %428 = vector.extract_strided_slice %396 {offsets = [5, 0], sizes = [1, 256], strides = [1, 1]} : vector<8x256xf32> to vector<1x256xf32>
    %429 = vector.broadcast %427 : vector<8x1xf32> to vector<8x256xf32>
    %430 = vector.broadcast %428 : vector<1x256xf32> to vector<8x256xf32>
    %431 = arith.mulf %429, %430 : vector<8x256xf32>
    %432 = arith.addf %426, %431 : vector<8x256xf32>
    %433 = vector.extract_strided_slice %341 {offsets = [0, 14], sizes = [8, 1], strides = [1, 1]} : vector<8x32xf32> to vector<8x1xf32>
    %434 = vector.extract_strided_slice %396 {offsets = [6, 0], sizes = [1, 256], strides = [1, 1]} : vector<8x256xf32> to vector<1x256xf32>
    %435 = vector.broadcast %433 : vector<8x1xf32> to vector<8x256xf32>
    %436 = vector.broadcast %434 : vector<1x256xf32> to vector<8x256xf32>
    %437 = arith.mulf %435, %436 : vector<8x256xf32>
    %438 = arith.addf %432, %437 : vector<8x256xf32>
    %439 = vector.extract_strided_slice %341 {offsets = [0, 15], sizes = [8, 1], strides = [1, 1]} : vector<8x32xf32> to vector<8x1xf32>
    %440 = vector.extract_strided_slice %396 {offsets = [7, 0], sizes = [1, 256], strides = [1, 1]} : vector<8x256xf32> to vector<1x256xf32>
    %441 = vector.broadcast %439 : vector<8x1xf32> to vector<8x256xf32>
    %442 = vector.broadcast %440 : vector<1x256xf32> to vector<8x256xf32>
    %443 = arith.mulf %441, %442 : vector<8x256xf32>
    %444 = arith.addf %438, %443 : vector<8x256xf32>
    %c8_62 = arith.constant 8 : index
    %c159_63 = arith.constant 159 : index
    %445 = vector.load %arg12[%c8_62, %c159_63] : memref<21x512xf32, #tpu.memory_space<vmem>>, vector<8x256xf32>
    %446 = vector.extract_strided_slice %2 {offsets = [2, 0], sizes = [1, 256], strides = [1, 1]} : vector<5x256xf32> to vector<1x256xf32>
    %447 = vector.broadcast %446 : vector<1x256xf32> to vector<8x256xf32>
    %448 = arith.mulf %445, %447 : vector<8x256xf32>
    %449 = vector.extract_strided_slice %341 {offsets = [0, 16], sizes = [8, 1], strides = [1, 1]} : vector<8x32xf32> to vector<8x1xf32>
    %450 = vector.extract_strided_slice %448 {offsets = [0, 0], sizes = [1, 256], strides = [1, 1]} : vector<8x256xf32> to vector<1x256xf32>
    %451 = vector.broadcast %449 : vector<8x1xf32> to vector<8x256xf32>
    %452 = vector.broadcast %450 : vector<1x256xf32> to vector<8x256xf32>
    %453 = arith.mulf %451, %452 : vector<8x256xf32>
    %454 = arith.addf %444, %453 : vector<8x256xf32>
    %455 = vector.extract_strided_slice %341 {offsets = [0, 17], sizes = [8, 1], strides = [1, 1]} : vector<8x32xf32> to vector<8x1xf32>
    %456 = vector.extract_strided_slice %448 {offsets = [1, 0], sizes = [1, 256], strides = [1, 1]} : vector<8x256xf32> to vector<1x256xf32>
    %457 = vector.broadcast %455 : vector<8x1xf32> to vector<8x256xf32>
    %458 = vector.broadcast %456 : vector<1x256xf32> to vector<8x256xf32>
    %459 = arith.mulf %457, %458 : vector<8x256xf32>
    %460 = arith.addf %454, %459 : vector<8x256xf32>
    %461 = vector.extract_strided_slice %341 {offsets = [0, 18], sizes = [8, 1], strides = [1, 1]} : vector<8x32xf32> to vector<8x1xf32>
    %462 = vector.extract_strided_slice %448 {offsets = [2, 0], sizes = [1, 256], strides = [1, 1]} : vector<8x256xf32> to vector<1x256xf32>
    %463 = vector.broadcast %461 : vector<8x1xf32> to vector<8x256xf32>
    %464 = vector.broadcast %462 : vector<1x256xf32> to vector<8x256xf32>
    %465 = arith.mulf %463, %464 : vector<8x256xf32>
    %466 = arith.addf %460, %465 : vector<8x256xf32>
    %467 = vector.extract_strided_slice %341 {offsets = [0, 19], sizes = [8, 1], strides = [1, 1]} : vector<8x32xf32> to vector<8x1xf32>
    %468 = vector.extract_strided_slice %448 {offsets = [3, 0], sizes = [1, 256], strides = [1, 1]} : vector<8x256xf32> to vector<1x256xf32>
    %469 = vector.broadcast %467 : vector<8x1xf32> to vector<8x256xf32>
    %470 = vector.broadcast %468 : vector<1x256xf32> to vector<8x256xf32>
    %471 = arith.mulf %469, %470 : vector<8x256xf32>
    %472 = arith.addf %466, %471 : vector<8x256xf32>
    %473 = vector.extract_strided_slice %341 {offsets = [0, 20], sizes = [8, 1], strides = [1, 1]} : vector<8x32xf32> to vector<8x1xf32>
    %474 = vector.extract_strided_slice %448 {offsets = [4, 0], sizes = [1, 256], strides = [1, 1]} : vector<8x256xf32> to vector<1x256xf32>
    %475 = vector.broadcast %473 : vector<8x1xf32> to vector<8x256xf32>
    %476 = vector.broadcast %474 : vector<1x256xf32> to vector<8x256xf32>
    %477 = arith.mulf %475, %476 : vector<8x256xf32>
    %478 = arith.addf %472, %477 : vector<8x256xf32>
    %479 = vector.extract_strided_slice %341 {offsets = [0, 21], sizes = [8, 1], strides = [1, 1]} : vector<8x32xf32> to vector<8x1xf32>
    %480 = vector.extract_strided_slice %448 {offsets = [5, 0], sizes = [1, 256], strides = [1, 1]} : vector<8x256xf32> to vector<1x256xf32>
    %481 = vector.broadcast %479 : vector<8x1xf32> to vector<8x256xf32>
    %482 = vector.broadcast %480 : vector<1x256xf32> to vector<8x256xf32>
    %483 = arith.mulf %481, %482 : vector<8x256xf32>
    %484 = arith.addf %478, %483 : vector<8x256xf32>
    %485 = vector.extract_strided_slice %341 {offsets = [0, 22], sizes = [8, 1], strides = [1, 1]} : vector<8x32xf32> to vector<8x1xf32>
    %486 = vector.extract_strided_slice %448 {offsets = [6, 0], sizes = [1, 256], strides = [1, 1]} : vector<8x256xf32> to vector<1x256xf32>
    %487 = vector.broadcast %485 : vector<8x1xf32> to vector<8x256xf32>
    %488 = vector.broadcast %486 : vector<1x256xf32> to vector<8x256xf32>
    %489 = arith.mulf %487, %488 : vector<8x256xf32>
    %490 = arith.addf %484, %489 : vector<8x256xf32>
    %491 = vector.extract_strided_slice %341 {offsets = [0, 23], sizes = [8, 1], strides = [1, 1]} : vector<8x32xf32> to vector<8x1xf32>
    %492 = vector.extract_strided_slice %448 {offsets = [7, 0], sizes = [1, 256], strides = [1, 1]} : vector<8x256xf32> to vector<1x256xf32>
    %493 = vector.broadcast %491 : vector<8x1xf32> to vector<8x256xf32>
    %494 = vector.broadcast %492 : vector<1x256xf32> to vector<8x256xf32>
    %495 = arith.mulf %493, %494 : vector<8x256xf32>
    %496 = arith.addf %490, %495 : vector<8x256xf32>
    %c8_64 = arith.constant 8 : index
    %c162_65 = arith.constant 162 : index
    %497 = vector.load %arg12[%c8_64, %c162_65] : memref<21x512xf32, #tpu.memory_space<vmem>>, vector<8x256xf32>
    %498 = vector.extract_strided_slice %2 {offsets = [4, 0], sizes = [1, 256], strides = [1, 1]} : vector<5x256xf32> to vector<1x256xf32>
    %499 = vector.broadcast %498 : vector<1x256xf32> to vector<8x256xf32>
    %500 = arith.mulf %497, %499 : vector<8x256xf32>
    %501 = vector.extract_strided_slice %341 {offsets = [0, 24], sizes = [8, 1], strides = [1, 1]} : vector<8x32xf32> to vector<8x1xf32>
    %502 = vector.extract_strided_slice %500 {offsets = [0, 0], sizes = [1, 256], strides = [1, 1]} : vector<8x256xf32> to vector<1x256xf32>
    %503 = vector.broadcast %501 : vector<8x1xf32> to vector<8x256xf32>
    %504 = vector.broadcast %502 : vector<1x256xf32> to vector<8x256xf32>
    %505 = arith.mulf %503, %504 : vector<8x256xf32>
    %506 = arith.addf %496, %505 : vector<8x256xf32>
    %507 = vector.extract_strided_slice %341 {offsets = [0, 25], sizes = [8, 1], strides = [1, 1]} : vector<8x32xf32> to vector<8x1xf32>
    %508 = vector.extract_strided_slice %500 {offsets = [1, 0], sizes = [1, 256], strides = [1, 1]} : vector<8x256xf32> to vector<1x256xf32>
    %509 = vector.broadcast %507 : vector<8x1xf32> to vector<8x256xf32>
    %510 = vector.broadcast %508 : vector<1x256xf32> to vector<8x256xf32>
    %511 = arith.mulf %509, %510 : vector<8x256xf32>
    %512 = arith.addf %506, %511 : vector<8x256xf32>
    %513 = vector.extract_strided_slice %341 {offsets = [0, 26], sizes = [8, 1], strides = [1, 1]} : vector<8x32xf32> to vector<8x1xf32>
    %514 = vector.extract_strided_slice %500 {offsets = [2, 0], sizes = [1, 256], strides = [1, 1]} : vector<8x256xf32> to vector<1x256xf32>
    %515 = vector.broadcast %513 : vector<8x1xf32> to vector<8x256xf32>
    %516 = vector.broadcast %514 : vector<1x256xf32> to vector<8x256xf32>
    %517 = arith.mulf %515, %516 : vector<8x256xf32>
    %518 = arith.addf %512, %517 : vector<8x256xf32>
    %519 = vector.extract_strided_slice %341 {offsets = [0, 27], sizes = [8, 1], strides = [1, 1]} : vector<8x32xf32> to vector<8x1xf32>
    %520 = vector.extract_strided_slice %500 {offsets = [3, 0], sizes = [1, 256], strides = [1, 1]} : vector<8x256xf32> to vector<1x256xf32>
    %521 = vector.broadcast %519 : vector<8x1xf32> to vector<8x256xf32>
    %522 = vector.broadcast %520 : vector<1x256xf32> to vector<8x256xf32>
    %523 = arith.mulf %521, %522 : vector<8x256xf32>
    %524 = arith.addf %518, %523 : vector<8x256xf32>
    %525 = vector.extract_strided_slice %341 {offsets = [0, 28], sizes = [8, 1], strides = [1, 1]} : vector<8x32xf32> to vector<8x1xf32>
    %526 = vector.extract_strided_slice %500 {offsets = [4, 0], sizes = [1, 256], strides = [1, 1]} : vector<8x256xf32> to vector<1x256xf32>
    %527 = vector.broadcast %525 : vector<8x1xf32> to vector<8x256xf32>
    %528 = vector.broadcast %526 : vector<1x256xf32> to vector<8x256xf32>
    %529 = arith.mulf %527, %528 : vector<8x256xf32>
    %530 = arith.addf %524, %529 : vector<8x256xf32>
    %531 = vector.extract_strided_slice %341 {offsets = [0, 29], sizes = [8, 1], strides = [1, 1]} : vector<8x32xf32> to vector<8x1xf32>
    %532 = vector.extract_strided_slice %500 {offsets = [5, 0], sizes = [1, 256], strides = [1, 1]} : vector<8x256xf32> to vector<1x256xf32>
    %533 = vector.broadcast %531 : vector<8x1xf32> to vector<8x256xf32>
    %534 = vector.broadcast %532 : vector<1x256xf32> to vector<8x256xf32>
    %535 = arith.mulf %533, %534 : vector<8x256xf32>
    %536 = arith.addf %530, %535 : vector<8x256xf32>
    %537 = vector.extract_strided_slice %341 {offsets = [0, 30], sizes = [8, 1], strides = [1, 1]} : vector<8x32xf32> to vector<8x1xf32>
    %538 = vector.extract_strided_slice %500 {offsets = [6, 0], sizes = [1, 256], strides = [1, 1]} : vector<8x256xf32> to vector<1x256xf32>
    %539 = vector.broadcast %537 : vector<8x1xf32> to vector<8x256xf32>
    %540 = vector.broadcast %538 : vector<1x256xf32> to vector<8x256xf32>
    %541 = arith.mulf %539, %540 : vector<8x256xf32>
    %542 = arith.addf %536, %541 : vector<8x256xf32>
    %543 = vector.extract_strided_slice %341 {offsets = [0, 31], sizes = [8, 1], strides = [1, 1]} : vector<8x32xf32> to vector<8x1xf32>
    %544 = vector.extract_strided_slice %500 {offsets = [7, 0], sizes = [1, 256], strides = [1, 1]} : vector<8x256xf32> to vector<1x256xf32>
    %545 = vector.broadcast %543 : vector<8x1xf32> to vector<8x256xf32>
    %546 = vector.broadcast %544 : vector<1x256xf32> to vector<8x256xf32>
    %547 = arith.mulf %545, %546 : vector<8x256xf32>
    %548 = arith.addf %542, %547 : vector<8x256xf32>
    %c0_66 = arith.constant 0 : index
    %c0_67 = arith.constant 0 : index
    %549 = vector.load %arg8[%c0_66, %c0_67] : memref<8x1xf32, #tpu.memory_space<vmem>>, vector<8x1xf32>
    %550 = vector.broadcast %549 : vector<8x1xf32> to vector<8x256xf32>
    %551 = arith.addf %548, %550 : vector<8x256xf32>
    %c0_68 = arith.constant 0 : index
    %c128_69 = arith.constant 128 : index
    %552 = vector.load %arg12[%c0_68, %c128_69] : memref<21x512xf32, #tpu.memory_space<vmem>>, vector<8x256xf32>
    tpu.vector_store %arg12[%c0_68, %c128_69], %551 {strides = array<i32>} : memref<21x512xf32, #tpu.memory_space<vmem>>, vector<8x256xf32>,
    %c0_70 = arith.constant 0 : index
    %c0_71 = arith.constant 0 : index
    %553 = vector.load %arg9[%c0_70, %c0_71] : memref<16x20xf32, #tpu.memory_space<vmem>>, vector<16x20xf32>
    %c0_72 = arith.constant 0 : index
    %c128_73 = arith.constant 128 : index
    %554 = vector.load %arg12[%c0_72, %c128_73] : memref<21x512xf32, #tpu.memory_space<vmem>>, vector<20x256xf32>
    %555 = vector.extract_strided_slice %553 {offsets = [0, 0], sizes = [16, 1], strides = [1, 1]} : vector<16x20xf32> to vector<16x1xf32>
    %556 = vector.extract_strided_slice %554 {offsets = [0, 0], sizes = [1, 256], strides = [1, 1]} : vector<20x256xf32> to vector<1x256xf32>
    %557 = vector.broadcast %555 : vector<16x1xf32> to vector<16x256xf32>
    %558 = vector.broadcast %556 : vector<1x256xf32> to vector<16x256xf32>
    %559 = arith.mulf %557, %558 : vector<16x256xf32>
    %560 = vector.extract_strided_slice %553 {offsets = [0, 1], sizes = [16, 1], strides = [1, 1]} : vector<16x20xf32> to vector<16x1xf32>
    %561 = vector.extract_strided_slice %554 {offsets = [1, 0], sizes = [1, 256], strides = [1, 1]} : vector<20x256xf32> to vector<1x256xf32>
    %562 = vector.broadcast %560 : vector<16x1xf32> to vector<16x256xf32>
    %563 = vector.broadcast %561 : vector<1x256xf32> to vector<16x256xf32>
    %564 = arith.mulf %562, %563 : vector<16x256xf32>
    %565 = arith.addf %559, %564 : vector<16x256xf32>
    %566 = vector.extract_strided_slice %553 {offsets = [0, 2], sizes = [16, 1], strides = [1, 1]} : vector<16x20xf32> to vector<16x1xf32>
    %567 = vector.extract_strided_slice %554 {offsets = [2, 0], sizes = [1, 256], strides = [1, 1]} : vector<20x256xf32> to vector<1x256xf32>
    %568 = vector.broadcast %566 : vector<16x1xf32> to vector<16x256xf32>
    %569 = vector.broadcast %567 : vector<1x256xf32> to vector<16x256xf32>
    %570 = arith.mulf %568, %569 : vector<16x256xf32>
    %571 = arith.addf %565, %570 : vector<16x256xf32>
    %572 = vector.extract_strided_slice %553 {offsets = [0, 3], sizes = [16, 1], strides = [1, 1]} : vector<16x20xf32> to vector<16x1xf32>
    %573 = vector.extract_strided_slice %554 {offsets = [3, 0], sizes = [1, 256], strides = [1, 1]} : vector<20x256xf32> to vector<1x256xf32>
    %574 = vector.broadcast %572 : vector<16x1xf32> to vector<16x256xf32>
    %575 = vector.broadcast %573 : vector<1x256xf32> to vector<16x256xf32>
    %576 = arith.mulf %574, %575 : vector<16x256xf32>
    %577 = arith.addf %571, %576 : vector<16x256xf32>
    %578 = vector.extract_strided_slice %553 {offsets = [0, 4], sizes = [16, 1], strides = [1, 1]} : vector<16x20xf32> to vector<16x1xf32>
    %579 = vector.extract_strided_slice %554 {offsets = [4, 0], sizes = [1, 256], strides = [1, 1]} : vector<20x256xf32> to vector<1x256xf32>
    %580 = vector.broadcast %578 : vector<16x1xf32> to vector<16x256xf32>
    %581 = vector.broadcast %579 : vector<1x256xf32> to vector<16x256xf32>
    %582 = arith.mulf %580, %581 : vector<16x256xf32>
    %583 = arith.addf %577, %582 : vector<16x256xf32>
    %584 = vector.extract_strided_slice %553 {offsets = [0, 5], sizes = [16, 1], strides = [1, 1]} : vector<16x20xf32> to vector<16x1xf32>
    %585 = vector.extract_strided_slice %554 {offsets = [5, 0], sizes = [1, 256], strides = [1, 1]} : vector<20x256xf32> to vector<1x256xf32>
    %586 = vector.broadcast %584 : vector<16x1xf32> to vector<16x256xf32>
    %587 = vector.broadcast %585 : vector<1x256xf32> to vector<16x256xf32>
    %588 = arith.mulf %586, %587 : vector<16x256xf32>
    %589 = arith.addf %583, %588 : vector<16x256xf32>
    %590 = vector.extract_strided_slice %553 {offsets = [0, 6], sizes = [16, 1], strides = [1, 1]} : vector<16x20xf32> to vector<16x1xf32>
    %591 = vector.extract_strided_slice %554 {offsets = [6, 0], sizes = [1, 256], strides = [1, 1]} : vector<20x256xf32> to vector<1x256xf32>
    %592 = vector.broadcast %590 : vector<16x1xf32> to vector<16x256xf32>
    %593 = vector.broadcast %591 : vector<1x256xf32> to vector<16x256xf32>
    %594 = arith.mulf %592, %593 : vector<16x256xf32>
    %595 = arith.addf %589, %594 : vector<16x256xf32>
    %596 = vector.extract_strided_slice %553 {offsets = [0, 7], sizes = [16, 1], strides = [1, 1]} : vector<16x20xf32> to vector<16x1xf32>
    %597 = vector.extract_strided_slice %554 {offsets = [7, 0], sizes = [1, 256], strides = [1, 1]} : vector<20x256xf32> to vector<1x256xf32>
    %598 = vector.broadcast %596 : vector<16x1xf32> to vector<16x256xf32>
    %599 = vector.broadcast %597 : vector<1x256xf32> to vector<16x256xf32>
    %600 = arith.mulf %598, %599 : vector<16x256xf32>
    %601 = arith.addf %595, %600 : vector<16x256xf32>
    %602 = vector.extract_strided_slice %553 {offsets = [0, 8], sizes = [16, 1], strides = [1, 1]} : vector<16x20xf32> to vector<16x1xf32>
    %603 = vector.extract_strided_slice %554 {offsets = [8, 0], sizes = [1, 256], strides = [1, 1]} : vector<20x256xf32> to vector<1x256xf32>
    %604 = vector.broadcast %602 : vector<16x1xf32> to vector<16x256xf32>
    %605 = vector.broadcast %603 : vector<1x256xf32> to vector<16x256xf32>
    %606 = arith.mulf %604, %605 : vector<16x256xf32>
    %607 = arith.addf %601, %606 : vector<16x256xf32>
    %608 = vector.extract_strided_slice %553 {offsets = [0, 9], sizes = [16, 1], strides = [1, 1]} : vector<16x20xf32> to vector<16x1xf32>
    %609 = vector.extract_strided_slice %554 {offsets = [9, 0], sizes = [1, 256], strides = [1, 1]} : vector<20x256xf32> to vector<1x256xf32>
    %610 = vector.broadcast %608 : vector<16x1xf32> to vector<16x256xf32>
    %611 = vector.broadcast %609 : vector<1x256xf32> to vector<16x256xf32>
    %612 = arith.mulf %610, %611 : vector<16x256xf32>
    %613 = arith.addf %607, %612 : vector<16x256xf32>
    %614 = vector.extract_strided_slice %553 {offsets = [0, 10], sizes = [16, 1], strides = [1, 1]} : vector<16x20xf32> to vector<16x1xf32>
    %615 = vector.extract_strided_slice %554 {offsets = [10, 0], sizes = [1, 256], strides = [1, 1]} : vector<20x256xf32> to vector<1x256xf32>
    %616 = vector.broadcast %614 : vector<16x1xf32> to vector<16x256xf32>
    %617 = vector.broadcast %615 : vector<1x256xf32> to vector<16x256xf32>
    %618 = arith.mulf %616, %617 : vector<16x256xf32>
    %619 = arith.addf %613, %618 : vector<16x256xf32>
    %620 = vector.extract_strided_slice %553 {offsets = [0, 11], sizes = [16, 1], strides = [1, 1]} : vector<16x20xf32> to vector<16x1xf32>
    %621 = vector.extract_strided_slice %554 {offsets = [11, 0], sizes = [1, 256], strides = [1, 1]} : vector<20x256xf32> to vector<1x256xf32>
    %622 = vector.broadcast %620 : vector<16x1xf32> to vector<16x256xf32>
    %623 = vector.broadcast %621 : vector<1x256xf32> to vector<16x256xf32>
    %624 = arith.mulf %622, %623 : vector<16x256xf32>
    %625 = arith.addf %619, %624 : vector<16x256xf32>
    %626 = vector.extract_strided_slice %553 {offsets = [0, 12], sizes = [16, 1], strides = [1, 1]} : vector<16x20xf32> to vector<16x1xf32>
    %627 = vector.extract_strided_slice %554 {offsets = [12, 0], sizes = [1, 256], strides = [1, 1]} : vector<20x256xf32> to vector<1x256xf32>
    %628 = vector.broadcast %626 : vector<16x1xf32> to vector<16x256xf32>
    %629 = vector.broadcast %627 : vector<1x256xf32> to vector<16x256xf32>
    %630 = arith.mulf %628, %629 : vector<16x256xf32>
    %631 = arith.addf %625, %630 : vector<16x256xf32>
    %632 = vector.extract_strided_slice %553 {offsets = [0, 13], sizes = [16, 1], strides = [1, 1]} : vector<16x20xf32> to vector<16x1xf32>
    %633 = vector.extract_strided_slice %554 {offsets = [13, 0], sizes = [1, 256], strides = [1, 1]} : vector<20x256xf32> to vector<1x256xf32>
    %634 = vector.broadcast %632 : vector<16x1xf32> to vector<16x256xf32>
    %635 = vector.broadcast %633 : vector<1x256xf32> to vector<16x256xf32>
    %636 = arith.mulf %634, %635 : vector<16x256xf32>
    %637 = arith.addf %631, %636 : vector<16x256xf32>
    %638 = vector.extract_strided_slice %553 {offsets = [0, 14], sizes = [16, 1], strides = [1, 1]} : vector<16x20xf32> to vector<16x1xf32>
    %639 = vector.extract_strided_slice %554 {offsets = [14, 0], sizes = [1, 256], strides = [1, 1]} : vector<20x256xf32> to vector<1x256xf32>
    %640 = vector.broadcast %638 : vector<16x1xf32> to vector<16x256xf32>
    %641 = vector.broadcast %639 : vector<1x256xf32> to vector<16x256xf32>
    %642 = arith.mulf %640, %641 : vector<16x256xf32>
    %643 = arith.addf %637, %642 : vector<16x256xf32>
    %644 = vector.extract_strided_slice %553 {offsets = [0, 15], sizes = [16, 1], strides = [1, 1]} : vector<16x20xf32> to vector<16x1xf32>
    %645 = vector.extract_strided_slice %554 {offsets = [15, 0], sizes = [1, 256], strides = [1, 1]} : vector<20x256xf32> to vector<1x256xf32>
    %646 = vector.broadcast %644 : vector<16x1xf32> to vector<16x256xf32>
    %647 = vector.broadcast %645 : vector<1x256xf32> to vector<16x256xf32>
    %648 = arith.mulf %646, %647 : vector<16x256xf32>
    %649 = arith.addf %643, %648 : vector<16x256xf32>
    %650 = vector.extract_strided_slice %553 {offsets = [0, 16], sizes = [16, 1], strides = [1, 1]} : vector<16x20xf32> to vector<16x1xf32>
    %651 = vector.extract_strided_slice %554 {offsets = [16, 0], sizes = [1, 256], strides = [1, 1]} : vector<20x256xf32> to vector<1x256xf32>
    %652 = vector.broadcast %650 : vector<16x1xf32> to vector<16x256xf32>
    %653 = vector.broadcast %651 : vector<1x256xf32> to vector<16x256xf32>
    %654 = arith.mulf %652, %653 : vector<16x256xf32>
    %655 = arith.addf %649, %654 : vector<16x256xf32>
    %656 = vector.extract_strided_slice %553 {offsets = [0, 17], sizes = [16, 1], strides = [1, 1]} : vector<16x20xf32> to vector<16x1xf32>
    %657 = vector.extract_strided_slice %554 {offsets = [17, 0], sizes = [1, 256], strides = [1, 1]} : vector<20x256xf32> to vector<1x256xf32>
    %658 = vector.broadcast %656 : vector<16x1xf32> to vector<16x256xf32>
    %659 = vector.broadcast %657 : vector<1x256xf32> to vector<16x256xf32>
    %660 = arith.mulf %658, %659 : vector<16x256xf32>
    %661 = arith.addf %655, %660 : vector<16x256xf32>
    %662 = vector.extract_strided_slice %553 {offsets = [0, 18], sizes = [16, 1], strides = [1, 1]} : vector<16x20xf32> to vector<16x1xf32>
    %663 = vector.extract_strided_slice %554 {offsets = [18, 0], sizes = [1, 256], strides = [1, 1]} : vector<20x256xf32> to vector<1x256xf32>
    %664 = vector.broadcast %662 : vector<16x1xf32> to vector<16x256xf32>
    %665 = vector.broadcast %663 : vector<1x256xf32> to vector<16x256xf32>
    %666 = arith.mulf %664, %665 : vector<16x256xf32>
    %667 = arith.addf %661, %666 : vector<16x256xf32>
    %668 = vector.extract_strided_slice %553 {offsets = [0, 19], sizes = [16, 1], strides = [1, 1]} : vector<16x20xf32> to vector<16x1xf32>
    %669 = vector.extract_strided_slice %554 {offsets = [19, 0], sizes = [1, 256], strides = [1, 1]} : vector<20x256xf32> to vector<1x256xf32>
    %670 = vector.broadcast %668 : vector<16x1xf32> to vector<16x256xf32>
    %671 = vector.broadcast %669 : vector<1x256xf32> to vector<16x256xf32>
    %672 = arith.mulf %670, %671 : vector<16x256xf32>
    %673 = arith.addf %667, %672 : vector<16x256xf32>
    %c0_74 = arith.constant 0 : index
    %c0_75 = arith.constant 0 : index
    %674 = vector.load %arg10[%c0_74, %c0_75] : memref<16x1xf32, #tpu.memory_space<vmem>>, vector<16x1xf32>
    %675 = vector.broadcast %674 : vector<16x1xf32> to vector<16x256xf32>
    %676 = arith.addf %673, %675 : vector<16x256xf32>
    %c0_76 = arith.constant 0 : index
    %c128_77 = arith.constant 128 : index
    %677 = vector.load %arg12[%c0_76, %c128_77] : memref<21x512xf32, #tpu.memory_space<vmem>>, vector<20x256xf32>
    %c0_78 = arith.constant 0 : index
    %c0_79 = arith.constant 0 : index
    %c0_80 = arith.constant 0 : index
    %678 = vector.load %arg11[%c0_78, %c0_79, %c0_80] : memref<1x48x256xf32, #tpu.memory_space<vmem>>, vector<1x16x256xf32>
    %679 = vector.shape_cast %678 : vector<1x16x256xf32> to vector<16x256xf32>
    %680 = vector.shape_cast %676 : vector<16x256xf32> to vector<1x16x256xf32>
    tpu.vector_store %arg11[%c0_78, %c0_79, %c0_80], %680 {strides = array<i32>} : memref<1x48x256xf32, #tpu.memory_space<vmem>>, vector<1x16x256xf32>,
    %c0_81 = arith.constant 0 : index
    %c16_82 = arith.constant 16 : index
    %c0_83 = arith.constant 0 : index
    %681 = vector.load %arg11[%c0_81, %c16_82, %c0_83] : memref<1x48x256xf32, #tpu.memory_space<vmem>>, vector<1x20x256xf32>
    %682 = vector.shape_cast %681 : vector<1x20x256xf32> to vector<20x256xf32>
    %683 = vector.shape_cast %677 : vector<20x256xf32> to vector<1x20x256xf32>
    tpu.vector_store %arg11[%c0_81, %c16_82, %c0_83], %683 {strides = array<i32>} : memref<1x48x256xf32, #tpu.memory_space<vmem>>, vector<1x20x256xf32>,
    %684 = vector.extract_strided_slice %677 {offsets = [8, 0], sizes = [8, 256], strides = [1, 1]} : vector<20x256xf32> to vector<8x256xf32>
    %c0_84 = arith.constant 0 : index
    %c36 = arith.constant 36 : index
    %c0_85 = arith.constant 0 : index
    %685 = vector.load %arg11[%c0_84, %c36, %c0_85] : memref<1x48x256xf32, #tpu.memory_space<vmem>>, vector<1x8x256xf32>
    %686 = vector.shape_cast %685 : vector<1x8x256xf32> to vector<8x256xf32>
    %687 = vector.shape_cast %684 : vector<8x256xf32> to vector<1x8x256xf32>
    tpu.vector_store %arg11[%c0_84, %c36, %c0_85], %687 {strides = array<i32>} : memref<1x48x256xf32, #tpu.memory_space<vmem>>, vector<1x8x256xf32>,
    %688 = vector.extract_strided_slice %677 {offsets = [16, 0], sizes = [3, 256], strides = [1, 1]} : vector<20x256xf32> to vector<3x256xf32>
    %c0_86 = arith.constant 0 : index
    %c44 = arith.constant 44 : index
    %c0_87 = arith.constant 0 : index
    %689 = vector.load %arg11[%c0_86, %c44, %c0_87] : memref<1x48x256xf32, #tpu.memory_space<vmem>>, vector<1x3x256xf32>
    %690 = vector.shape_cast %689 : vector<1x3x256xf32> to vector<3x256xf32>
    %691 = vector.shape_cast %688 : vector<3x256xf32> to vector<1x3x256xf32>
    tpu.vector_store %arg11[%c0_86, %c44, %c0_87], %691 {strides = array<i32>} : memref<1x48x256xf32, #tpu.memory_space<vmem>>, vector<1x3x256xf32>,
    %692 = vector.extract_strided_slice %677 {offsets = [19, 0], sizes = [1, 256], strides = [1, 1]} : vector<20x256xf32> to vector<1x256xf32>
    %c0_88 = arith.constant 0 : index
    %c47 = arith.constant 47 : index
    %c0_89 = arith.constant 0 : index
    %693 = vector.load %arg11[%c0_88, %c47, %c0_89] : memref<1x48x256xf32, #tpu.memory_space<vmem>>, vector<1x1x256xf32>
    %694 = vector.shape_cast %693 : vector<1x1x256xf32> to vector<1x256xf32>
    %695 = vector.shape_cast %692 : vector<1x256xf32> to vector<1x1x256xf32>
    tpu.vector_store %arg11[%c0_88, %c47, %c0_89], %695 {strides = array<i32>} : memref<1x48x256xf32, #tpu.memory_space<vmem>>, vector<1x1x256xf32>,
    return
  }
  func.func @transform_0(%arg0: i32) -> (i32, i32, i32) {
    %c0_i32 = arith.constant 0 : i32
    %c0_i32_0 = arith.constant 0 : i32
    %c0_i32_1 = arith.constant 0 : i32
    return %arg0, %c0_i32, %c0_i32_0 : i32, i32, i32
  }
  func.func @transform_1(%arg0: i32) -> (i32, i32) {
    %c0_i32 = arith.constant 0 : i32
    %c0_i32_0 = arith.constant 0 : i32
    %c0_i32_1 = arith.constant 0 : i32
    return %c0_i32, %c0_i32_0 : i32, i32
  }
  func.func @transform_2(%arg0: i32) -> (i32, i32) {
    %c0_i32 = arith.constant 0 : i32
    %c0_i32_0 = arith.constant 0 : i32
    %c0_i32_1 = arith.constant 0 : i32
    return %c0_i32, %c0_i32_0 : i32, i32
  }
  func.func @transform_3(%arg0: i32) -> (i32, i32) {
    %c0_i32 = arith.constant 0 : i32
    %c0_i32_0 = arith.constant 0 : i32
    %c0_i32_1 = arith.constant 0 : i32
    return %c0_i32, %c0_i32_0 : i32, i32
  }
  func.func @transform_4(%arg0: i32) -> (i32, i32) {
    %c0_i32 = arith.constant 0 : i32
    %c0_i32_0 = arith.constant 0 : i32
    %c0_i32_1 = arith.constant 0 : i32
    return %c0_i32, %c0_i32_0 : i32, i32
  }
  func.func @transform_5(%arg0: i32) -> (i32, i32) {
    %c0_i32 = arith.constant 0 : i32
    %c0_i32_0 = arith.constant 0 : i32
    %c0_i32_1 = arith.constant 0 : i32
    return %c0_i32, %c0_i32_0 : i32, i32
  }
  func.func @transform_6(%arg0: i32) -> (i32, i32) {
    %c0_i32 = arith.constant 0 : i32
    %c0_i32_0 = arith.constant 0 : i32
    %c0_i32_1 = arith.constant 0 : i32
    return %c0_i32, %c0_i32_0 : i32, i32
  }
  func.func @transform_7(%arg0: i32) -> (i32, i32) {
    %c0_i32 = arith.constant 0 : i32
    %c0_i32_0 = arith.constant 0 : i32
    %c0_i32_1 = arith.constant 0 : i32
    return %c0_i32, %c0_i32_0 : i32, i32
  }
  func.func @transform_8(%arg0: i32) -> (i32, i32) {
    %c0_i32 = arith.constant 0 : i32
    %c0_i32_0 = arith.constant 0 : i32
    %c0_i32_1 = arith.constant 0 : i32
    return %c0_i32, %c0_i32_0 : i32, i32
  }
  func.func @transform_9(%arg0: i32) -> (i32, i32) {
    %c0_i32 = arith.constant 0 : i32
    %c0_i32_0 = arith.constant 0 : i32
    %c0_i32_1 = arith.constant 0 : i32
    return %c0_i32, %c0_i32_0 : i32, i32
  }
  func.func @transform_10(%arg0: i32) -> (i32, i32, i32) {
    %c0_i32 = arith.constant 0 : i32
    %c0_i32_0 = arith.constant 0 : i32
    %c0_i32_1 = arith.constant 0 : i32
    return %arg0, %c0_i32, %c0_i32_0 : i32, i32, i32
  }
}

</mosaic_0001>

<bundles_post_ra>
// kernel: tpu_custom_call.1
= control target key start
LH: loop header
LB: loop body
LE: loop exit
PB: predicated region body
PF: predicated region fallthrough
CT: control target
= control target key end

     0   :  { %15 = vsyncpa [#allocation4], 0  ;;  %s5822_s0 = inlined_call_operand.vmem [shape: f32[2,1,256], index: 0, kind: input, shape index: {}]   ;;  %s5823_s1 = inlined_call_operand.vmem [shape: f32[5,256], index: 1, kind: input, shape index: {}]   ;;  %s5824_s2 = inlined_call_operand.vmem [shape: f32[2,16], index: 2, kind: input, shape index: {}]   ;;  %s5825_s3 = inlined_call_operand.vmem [shape: f32[2,1], index: 3, kind: input, shape index: {}]   ;;  %s5826_s4 = inlined_call_operand.hbm [shape: f32[4,27], index: 4, kind: input, shape index: {}]   ;;  %s5827_s5 = inlined_call_operand.vmem [shape: f32[4,1], index: 5, kind: input, shape index: {}]   ;;  %s5828_s6 = inlined_call_operand.vmem [shape: f32[8,32], index: 6, kind: input, shape index: {}]   ;;  %s5829_s7 = inlined_call_operand.vmem [shape: f32[8,1], index: 7, kind: input, shape index: {}]   ;;  %s5830_s8 = inlined_call_operand.hbm [shape: f32[16,20], index: 8, kind: input, shape index: {}]   ;;  %s5831_s9 = inlined_call_operand.vmem [shape: f32[16,1], index: 9, kind: input, shape index: {}]   ;;  %s5832_s10 = inlined_call_operand.hbm [shape: f32[2,48,256], index: 10, kind: output, shape index: {}]  }
   0x1   :  { %16 = vsyncpa [#allocation7], 0 }
   0x2   :  { %17 = vsyncpa [#allocation5], 0 }
   0x3   :  { %19 = vsyncpa [#allocation5 + $0x1], 0  ;;  %s3757_s13 = smov 0   ;;  %s3759_s14 = smov 0  }
   0x4   :  { %s3761_s15 = smov 0   ;;  %s3763_s16 = smov 0  }
   0x5 LB: > { %s3778_s17 = sadd.s32 4294967295, %s3629_s16   ;;  %s3228_s18 = sadd.s32 4294967294, %s3629_s16   ;;  %s3629_s16 = sphi %s3763_s16, %s6061_s16   ;;  %s3625_s15 = sphi %s3761_s15, %s6060_s15   ;;  %s3621_s14 = sphi %s3759_s14, %s6059_s14   ;;  %s3617_s13 = sphi %s3757_s13, %s6058_s13  }
   0x6   : > { %s3782_s19 = sadd.s32 1, %s3629_s16   ;;  %s247_s20 = sadd.s32 1, %s3625_s15 }
   0x7   : > { %s244_s21 = ssub.s32 %s3629_s16, %s3782_s19  ;;  %p257_p0 = scmp.ne.s32.totalorder %s3625_s15, %s3621_s14 }
   0x8   : > { %p245_p1 = scmp.eq.s32.totalorder %s244_s21, 0  ;;  %p258_p2 = scmp.eq.s32.totalorder %s3778_s17, 1 }
   0x9   : > { %p263_p3 = scmp.ne.s32.totalorder %s3621_s14, %s3617_s13  ;;  %p264_p4 = scmp.eq.s32.totalorder %s3228_s18, 1 }
   0xa   : > { %s3793_s22 = scalar_select %p245_p1, %s3625_s15, %s247_s20  }
   0xb   : > { %p3795_p5 = por %p258_p2, %p257_p0  ;;  %p3799_p6 = por %p264_p4, %p263_p3 }
   0xc   : > { %p3229_p7 = scmp.ge.s32.totalorder %s3629_s16, 1  ;;  %p271_p8 = scmp.lt.s32.totalorder %s3629_s16, 3 }
   0xd   : > { %p3264_p9 = scmp.eq.s32.totalorder %s3778_s17, 0  ;;  %s292_s28 = sshll.u32 %s5826_s4, 4  ;;  %s293_s28 = int_to_ptr.hbm [resolvable:$true] %s292_s28 }
   0xe   : > { %p3806_p10 = pnand %p3229_p7, %p271_p8  ;;  %s3631_s29 = smov [#allocation3]  }
   0xf   : > { %s294_s30 = sshll.u32 %s3631_s29, 4  ;;  %s312_s18 = sshll.u32 %s5830_s8, 4  ;;  %s295_s30 = int_to_ptr.vmem [resolvable:$true] %s294_s30  ;;  %s313_s18 = int_to_ptr.hbm [resolvable:$true] %s312_s18 }
  0x10   : > { %p3253_p11 = pneg %p3806_p10  ;;  %s3632_s20 = smov [#allocation6]  }
  0x11   : > { %s314_s21 = sshll.u32 %s3632_s20, 4  ;;  %s3633_s26 = smov 128   ;;  %s315_s21 = int_to_ptr.vmem [resolvable:$true] %s314_s21 }
  0x12   : > { %p3254_p12 = pnand %p3264_p9, %p3253_p11  ;;  %s3634_s27 = smov 8  }
  0x13   : > { %340 = sbr.rel (%p3806_p10) target bundleno = 4092 (0xffc), region = 60 }
  0x14   : > { %3256 = dma.hbm_to_vmem [thread:$0]  (!%p3254_p12), %s293_s28, 64, %s295_s30, [#allocation4]  }
  0x15   : > { %3259 = dma.hbm_to_vmem [thread:$0]  (!%p3254_p12), %s313_s18, 256, %s315_s21, [#allocation7], %s3633_s26, %s3633_s26, %s3634_s27  }
  0x18   : > { %3604 = dma.done.wait (%p3264_p9), [#allocation4], 64  }
  0x19   : > { %3606 = vsyncadd (%p3264_p9), [#allocation4], 4294967232 }
  0x1a   : > { %3608 = dma.done.wait (%p3264_p9), [#allocation7], 256  }
  0x1b   : > { %3610 = vsyncadd (%p3264_p9), [#allocation7], 4294967040  ;;  %p383_p13 = scmp.lt.s32.totalorder %s3778_s17, 1  ;;  %v5845_v0 = vmov 2   ;;  %v5853_v1 = vmov 0   ;;  %v3637_v2 = vmov 0.0   ;;  %v402_v3 = vlaneseq }
  0x1c   : > { %3374 = vset.pattern.permute.xlu2 %v5845_v0  ;;  %3372 = vset.pattern.permute.xlu1 %v5853_v1  ;;  %395 = vst [vmem:[#allocation2 + $0x40] sm:$0x1f] %v3637_v2  ;;  %v5843_v4 = vmov 4   ;;  %v3845_v6 = vld [vmem:[%s5824_s2] sm:$0x3]  ;;  %v5841_v11 = vmov 5  }
  0x1d   : > { %s384_s25 = scalar_select %p383_p13, %s3778_s17, 1  ;;  %396 = vst [vmem:[#allocation2 + $0x48] sm:$0x1f] %v3637_v2  ;;  %3376 = vset.pattern.permute.xlu0 %v5843_v4  ;;  %vm3838_vm0 = vcmp.lt.s32.totalorder %v402_v3, 256  ;;  %518 = vperm.xlu2 %3374, %v3845_v6   ;;  %v3857_v8 = vld [vmem:[%s5823_s1] sm:$0x1f] }
  0x1e   : > { %397 = vst [vmem:[#allocation2 + $0x50] sm:$0x1f] %v3637_v2  ;;  %460 = vperm.xlu1 %3372, %v3845_v6   ;;  %v3862_v9 = vld [vmem:[%s5823_s1 + $0x8] sm:$0x1f]  ;;  %v5850_v12 = vmov 1   ;;  %v5866_v14 = vmov 9  }
  0x1f   : > { %s3236_s28 = sshll.u32 %s384_s25, 1  ;;  %387 = vst [vmem:[#allocation2] sm:$0xff] %v3637_v2  ;;  %s5833_s25 = smov 16   ;;  %v5848_v15 = vmov 3   ;;  %v5870_v18 = vmov 6   ;;  %v5874_v19 = vmov 13  }
  0x20   : > { %s386_s11 = scalar_lea.vmem %s5822_s0, %s3236_s28  ;;  %392 = vst [vmem:[#allocation2 + $0x28] sm:$0xff] %v3637_v2  ;;  %s5886_s28 = smov 111   ;;  %v5861_v21 = vmov 10   ;;  %v5839_v23 = vmov 7   ;;  %v5868_v25 = vmov 8   ;;  %v5864_v27 = vmov 11  }
  0x21   : > { %v3847_v7 = vld [vmem:[%s386_s11] sm:$0x3]  ;;  %393 = vst [vmem:[#allocation2 + $0x30] sm:$0xff] %v3637_v2  ;;  %s3645_s29 = smov 113   ;;  %s5882_s30 = smov 114   ;;  %v5859_v30 = vmov 12  }
  0x22   : > { %407 = vst.msk [vmem:[#allocation2 + $0x4c] ss:$8 sm:$0x3] %vm3838_vm0, %v3847_v7  ;;  %s3649_s11 = smov 127   ;;  %s3652_s12 = smov 1   ;;  %vm415_vm1 = vcmask 130048  }
  0x23   : > { %5926 = vst [vmem:[#allocation12_spill] sm:$0xff] %v3857_v8  ;;  %s3654_s18 = smov 2   ;;  %s3656_s20 = smov 15   ;;  %v427_v43 = vrot.slane %v3862_v9, 7  ;;  %vm428_vm2 = vcmask 1040384   ;;  %vm513_vm3 = vcmask 924672  }
  0x24   : > { %5927 = vst [vmem:[#allocation13_spill] sm:$0xff] %v3862_v9  ;;  %s3657_s21 = smov 17   ;;  %s3658_s26 = smov 18   ;;  %vm5852_vm4 = vcmask 932864   ;;  %vm497_vm5 = vcmask 1039360   ;;  %vm833_vm6 = vcmask 138240  }
  0x25   : > { %398 = vst [vmem:[#allocation2 + $0x58] sm:$0x1f] %v3637_v2  ;;  %3377 = vset.pattern.permute.xlu2 %v5841_v11  ;;  %s5834_s27 = smov 31   ;;  %v429_v49 = vsel %vm428_vm2, %v3857_v8, %v427_v43  ;;  %vm669_vm7 = vcmask 7168   ;;  %vm713_vm8 = vcmask 15360   ;;  %vm757_vm9 = vcmask 121856  }
  0x26   : > { %447 = vst [vmem:[#allocation1] sm:$0xff] %v3857_v8  ;;  %3373 = vset.pattern.permute.xlu1 %v5850_v12  ;;  %638 = vperm.xlu2 %3377, %v3845_v6   ;;  %vm877_vm10 = vcmask 146432   ;;  %vm5847_vm11 = vcmask 252928   ;;  %vm5838_vm12 = vcmask 908288   ;;  %vm997_vm13 = vcmask 269312  }
  0x27   : > { %448 = vst [vmem:[#allocation1 + $0x9] sm:$0xff] %v3862_v9  ;;  %475 = vperm.xlu1 %3373, %v3845_v6   ;;  %vm540_vm14 = vcmask 1031168   ;;  %vm5863_vm15 = vcmask 277504   ;;  %vm627_vm2 = vcmask 916480  }
  0x29   : > { %v410_v10 = vld [vmem:[#allocation2 + $0x44] ss:$8 sm:$0x7] }
  0x2a   : > { %412 = vrot.lane.b32.xlu0 %v410_v10, %s5833_s25  ;;  %s3671_s25 = smov 110  }
  0x2e   : > { %v450_v13 = vld [vmem:[#allocation1 + $0x2] ss:$9 sm:$0xff]  ;;  %3381 = vset.pattern.permute.xlu2 %v5866_v14 }
  0x2f   : > { %506 = vst [vmem:[#allocation1] sm:$0xff] %v3857_v8  ;;  %3375 = vset.pattern.permute.xlu1 %v5848_v15  ;;  %795 = vperm.xlu2 %3381, %v3845_v6  }
  0x30   : > { %507 = vst [vmem:[#allocation1 + $0x9] sm:$0xff] %v3862_v9  ;;  %562 = vperm.xlu1 %3375, %v3845_v6  }
  0x32   : > { %451 = vrot.lane.b32.xlu0 %v450_v13, %s5886_s28 }
  0x37   : > { %v509_v16 = vld [vmem:[#allocation1 + $0x3] ss:$9 sm:$0xff]  ;;  %3385 = vset.pattern.permute.xlu2 %v5874_v19 }
  0x38   : > { %550 = vst [vmem:[#allocation1] sm:$0xff] %v3857_v8  ;;  %510 = vrot.lane.b32.xlu1 %v509_v16, %s3645_s29  ;;  %s3662_s29 = smov 95  }
  0x39   : > { %551 = vst [vmem:[#allocation1 + $0x9] sm:$0xff] %v3862_v9  ;;  %3382 = vset.pattern.permute.xlu1 %v5861_v21 }
  0x3a   : > { %605 = vperm.xlu0 %3376, %v3845_v6  }
  0x40   : > { %v553_v17 = vld [vmem:[#allocation1 + $0x4] ss:$9 sm:$0xff]  ;;  %838 = vperm.xlu1 %3382, %v3845_v6  }
  0x41   : > { %594 = vst [vmem:[#allocation1] sm:$0xff] %v3857_v8 }
  0x42   : > { %595 = vst [vmem:[#allocation1 + $0x9] sm:$0xff] %v3862_v9  ;;  %554 = vrot.lane.b32.xlu0 %v553_v17, %s5882_s30 }
  0x43   : > { %3378 = vset.pattern.permute.xlu0 %v5870_v18 }
  0x49   : > { %v597_v20 = vld [vmem:[#allocation1 + $0x2] ss:$9 sm:$0xff] }
  0x4a   : > { %598 = vrot.lane.b32.xlu2 %v597_v20, %s3649_s11  ;;  %662 = vst [vmem:[#allocation1] sm:$0xff] %v3857_v8  ;;  %674 = vperm.xlu0 %3378, %v3845_v6  }
  0x4b   : > { %663 = vst [vmem:[#allocation1 + $0x9] sm:$0xff] %v3862_v9 }
  0x52   : > { %v665_v22 = vld [vmem:[#allocation1 + $0x3] ss:$9 sm:$0xff]  ;;  %3379 = vset.pattern.permute.xlu0 %v5839_v23 }
  0x53   : > { %666 = vrot.lane.b32.xlu2 %v665_v22, %s3652_s12  ;;  %706 = vst [vmem:[#allocation1] sm:$0xff] %v3857_v8  ;;  %718 = vperm.xlu0 %3379, %v3845_v6   ;;  %s3664_s12 = smov 79  }
  0x54   : > { %707 = vst [vmem:[#allocation1 + $0x9] sm:$0xff] %v3862_v9 }
  0x5b   : > { %v709_v24 = vld [vmem:[#allocation1 + $0x4] ss:$9 sm:$0xff]  ;;  %3380 = vset.pattern.permute.xlu0 %v5868_v25 }
  0x5c   : > { %710 = vrot.lane.b32.xlu2 %v709_v24, %s3654_s18  ;;  %750 = vst [vmem:[#allocation1] sm:$0xff] %v3857_v8  ;;  %762 = vperm.xlu0 %3380, %v3845_v6  }
  0x5d   : > { %751 = vst [vmem:[#allocation1 + $0x9] sm:$0xff] %v3862_v9 }
  0x64   : > { %v753_v26 = vld [vmem:[#allocation1 + $0x2] ss:$9 sm:$0xff]  ;;  %3383 = vset.pattern.permute.xlu0 %v5864_v27 }
  0x65   : > { %754 = vrot.lane.b32.xlu2 %v753_v26, %s3656_s20  ;;  %826 = vst [vmem:[#allocation1] sm:$0xff] %v3857_v8  ;;  %s5836_s20 = smov 125  }
  0x66   : > { %827 = vst [vmem:[#allocation1 + $0x9] sm:$0xff] %v3862_v9 }
  0x6d   : > { %959 = vperm.xlu2 %3385, %v3845_v6   ;;  %v829_v28 = vld [vmem:[#allocation1 + $0x3] ss:$9 sm:$0xff] }
  0x6e   : > { %830 = vrot.lane.b32.xlu0 %v829_v28, %s3657_s21  ;;  %870 = vst [vmem:[#allocation1] sm:$0xff] %v3857_v8  ;;  %v5855_v28 = vmov 14  }
  0x6f   : > { %871 = vst [vmem:[#allocation1 + $0x9] sm:$0xff] %v3862_v9  ;;  %3386 = vset.pattern.permute.xlu1 %v5855_v28 }
  0x75   : > { %3388 = vset.pattern.permute.xlu2 %v5853_v1 }
  0x76   : > { %v873_v29 = vld [vmem:[#allocation1 + $0x4] ss:$9 sm:$0xff]  ;;  %882 = vperm.xlu0 %3383, %v3845_v6  }
  0x77   : > { %874 = vrot.lane.b32.xlu2 %v873_v29, %s3658_s26  ;;  %914 = vst [vmem:[#allocation1] sm:$0xff] %v3857_v8  ;;  %v3917_v32 = vpop.permute.xlu2 %518  ;;  %s3667_s26 = smov 33  }
  0x78   : > { %915 = vst [vmem:[#allocation1 + $0x9] sm:$0xff] %v3862_v9 }
  0x7e   : > { %3384 = vset.pattern.permute.xlu0 %v5859_v30 }
  0x7f   : > { %v917_v31 = vld [vmem:[#allocation1 + $0x2] ss:$9 sm:$0xff]  ;;  %926 = vperm.xlu0 %3384, %v3845_v6  }
  0x80   : > { %918 = vrot.lane.b32.xlu2 %v917_v31, %s5834_s27  ;;  %990 = vst [vmem:[#allocation1] sm:$0xff] %v3857_v8  ;;  %v639_v33 = vpop.permute.xlu2 %638  ;;  %s3673_s27 = smov 96  }
  0x81   : > { %991 = vst [vmem:[#allocation1 + $0x9] sm:$0xff] %v3862_v9 }
  0x89   : > { %v796_v39 = vpop.permute.xlu2 %795 }
  0x90   : > { %v3919_v36 = vpop.permute.xlu1 %460 }
  0x99   : > { %v476_v46 = vpop.permute.xlu1 %475 }
  0x9c   : > { %v413_v34 = vpop.permute.xlu0 %412 }
  0x9d   : > { %v414_v35 = vrot.slane %v413_v34, 1 }
  0x9f   : > { %v416_v37 = vsel %vm415_vm1, %v413_v34, %v414_v35  ;;  %vm584_vm1 = vcmask 1022976  }
  0xa0   : > { %v418_v38 = vsub.f32 %v3847_v7, %v416_v37 }
  0xa2   : > { %v419_v40 = vadd.f32 3.1415927, %v418_v38  ;;  %v3936_v53 = vpop.permute.xlu1 %562 }
  0xa4   : > { %v420_v41 = vmul.f32 0.15915494, %v419_v40  ;;  %v3923_v44 = vpop.permute.xlu0 %451  ;;  %v3925_v48 = vpop.permute.xlu2 %598 }
  0xa6   : > { %v421_v42 = vfloor.f32 %v420_v41 }
  0xa8   : > { %v422_v45 = vmul.f32 6.2831855, %v421_v42 }
  0xaa   : > { %v423_v47 = vsub.f32 %v418_v38, %v422_v45  ;;  %v511_v60 = vpop.permute.xlu1 %510 }
  0xab   : > { %v512_v7 = vrot.slane %v511_v60, 7 }
  0xac   : > { %v424_v50 = vmul.f32 %v423_v47, %v423_v47  ;;  %v3932_v52 = vpop.permute.xlu0 %605 }
  0xad   : > { %v3940_v54 = vpop.permute.xlu2 %666  ;;  %v514_v20 = vsel %vm513_vm3, %v512_v7, %v511_v60  ;;  %vm696_vm3 = vcmask 900096  }
  0xae   : > { %v431_v51 = vmul.f32 %v429_v49, %v424_v50  ;;  %v993_v49 = vld [vmem:[#allocation1 + $0x3] ss:$9 sm:$0xff] }
  0xaf   : > { %1034 = vst [vmem:[#allocation1] sm:$0xff] %v3857_v8 }
  0xb0   : > { %439 = vst.msk [vmem:[#allocation2 + $0x4a] ss:$8 sm:$0x3] %vm3838_vm0, %v431_v51 }
  0xb1   : > { %442 = vst.msk [vmem:[#allocation2 + $0x4b] ss:$8 sm:$0x3] %vm3838_vm0, %v431_v51 }
  0xb2   : > { %433 = vst.msk [vmem:[#allocation2 + $0x2e] ss:$8 sm:$0x3] %vm3838_vm0, %v431_v51 }
  0xb3   : > { %436 = vst.msk [vmem:[#allocation2 + $0x2f] ss:$8 sm:$0x3] %vm3838_vm0, %v431_v51 }
  0xb4   : > { %v555_v56 = vpop.permute.xlu0 %554  ;;  %1035 = vst [vmem:[#allocation1 + $0x9] sm:$0xff] %v3862_v9 }
  0xb5   : > { %v556_v41 = vrot.slane %v555_v56, 7 }
  0xb6   : > { %v3942_v3 = vpop.permute.xlu2 %710 }
  0xb7   : > { %v558_v51 = vsel %vm5852_vm4, %v556_v41, %v555_v56  ;;  %vm981_vm4 = vcmask 646144  }
  0xb8   : > { %v473_v55 = vld [vmem:[#allocation2 + $0x43] ss:$8 sm:$0x7] }
  0xb9   : > { %v636_v57 = vld [vmem:[#allocation2 + $0x4b] ss:$8 sm:$0x3]  ;;  %v481_v58 = vperm.slane %v473_v55, 2  ;;  %v479_v59 = vperm.slane %v473_v55, 0  ;;  %v480_v16 = vperm.slane %v473_v55, 1  ;;  %v516_v29 = vmul.f32 %v514_v20, %v473_v55 }
  0xba   : > { %v643_v61 = vperm.slane %v636_v57, 1  ;;  %v3946_v10 = vld [vmem:[#allocation2 + $0x4b] ss:$8 sm:$0x7]  ;;  %v642_v13 = vperm.slane %v636_v57, 0 }
  0xbb   : > { %v487_v62 = vmul.f32 %v481_v58, %v476_v46  ;;  %v485_v63 = vmul.f32 %v479_v59, %v476_v46  ;;  %v800_v17 = vperm.slane %v3946_v10, 1  ;;  %v486_v26 = vmul.f32 %v480_v16, %v476_v46  ;;  %v3963_v45 = vld [vmem:[#allocation2 + $0x4b] ss:$8 sm:$0x7] }
  0xbc   : > { %v647_v2 = vmul.f32 %v643_v61, %v639_v33  ;;  %v3950_v22 = vpop.permute.xlu0 %674  ;;  %v646_v24 = vmul.f32 %v642_v13, %v639_v33  ;;  %v799_v35 = vperm.slane %v3946_v10, 0  ;;  %v801_v37 = vperm.slane %v3946_v10, 2  ;;  %v549_v50 = vld [vmem:[#allocation2 + $0x43] ss:$8 sm:$0x7] }
  0xbd   : > { %495 = vrot.lane.b32.xlu0 %v487_v62, %s3649_s11  ;;  %491 = vrot.lane.b32.xlu2 %v485_v63, %s3649_s11  ;;  %v806_v31 = vmul.f32 %v800_v17, %v796_v39  ;;  %v523_v38 = vperm.slane %v516_v29, 1  ;;  %v522_v46 = vperm.slane %v516_v29, 0  ;;  %v524_v47 = vperm.slane %v516_v29, 2 }
  0xbe   : > { %652 = vrot.lane.b32.xlu1 %v647_v2, %s5886_s28  ;;  %v805_v33 = vmul.f32 %v799_v35, %v796_v39  ;;  %v807_v40 = vmul.f32 %v801_v37, %v796_v39  ;;  %v964_v55 = vperm.slane %v3963_v45, 1  ;;  %v560_v57 = vmul.f32 %v558_v51, %v549_v50  ;;  %v661_v50 = vld [vmem:[#allocation2 + $0x4b] ss:$8 sm:$0x7] }
  0xbf   : > { %v3955_v34 = vpop.permute.xlu2 %754  ;;  %v529_v42 = vmul.f32 %v523_v38, %v3917_v32  ;;  %v528_v58 = vmul.f32 %v522_v46, %v3917_v32  ;;  %v530_v59 = vmul.f32 %v524_v47, %v3917_v32  ;;  %v5857_v63 = vmov 15  }
  0xc0   : > { %v567_v61 = vperm.slane %v560_v57, 1  ;;  %v566_v62 = vperm.slane %v560_v57, 0  ;;  %3387 = vset.pattern.permute.xlu0 %v5857_v63  ;;  %v600_v32 = vrot.slane %v3925_v48, 7  ;;  %v568_v13 = vperm.slane %v560_v57, 2 }
  0xc1   : > { %v963_v20 = vperm.slane %v3963_v45, 0 }
  0xc2   : > { %v573_v2 = vmul.f32 %v567_v61, %v3936_v53  ;;  %v572_v7 = vmul.f32 %v566_v62, %v3936_v53  ;;  %v601_v16 = vsel %vm497_vm5, %v600_v32, %v3925_v48  ;;  %v574_v37 = vmul.f32 %v568_v13, %v3936_v53  ;;  %v705_v61 = vld [vmem:[#allocation2 + $0x4b] ss:$8 sm:$0x7] }
  0xc5   : > { %650 = vrot.lane.b32.xlu0 %v646_v24, %s5886_s28  ;;  %493 = vrot.lane.b32.xlu2 %v486_v26, %s3649_s11  ;;  %v3960_v43 = vpop.permute.xlu0 %718  ;;  %s3663_s11 = smov 126   ;;  %v965_v24 = vperm.slane %v3963_v45, 2  ;;  %v593_v26 = vld [vmem:[#allocation2 + $0x43] ss:$8 sm:$0x7] }
  0xc6   : > { %813 = vrot.lane.b32.xlu1 %v806_v31, %s3662_s29  ;;  %v603_v38 = vmul.f32 %v601_v16, %v593_v26 }
  0xc7   : > { %v960_v39 = vpop.permute.xlu2 %959 }
  0xc8   : > { %v970_v60 = vmul.f32 %v964_v55, %v960_v39  ;;  %v969_v29 = vmul.f32 %v963_v20, %v960_v39  ;;  %v971_v31 = vmul.f32 %v965_v24, %v960_v39  ;;  %v610_v53 = vperm.slane %v603_v38, 1 }
  0xc9   : > { %v611_v39 = vperm.slane %v603_v38, 2 }
  0xca   : > { %v616_v57 = vmul.f32 %v610_v53, %v3932_v52 }
  0xcd   : > { %811 = vrot.lane.b32.xlu0 %v805_v33, %s3662_s29  ;;  %815 = vrot.lane.b32.xlu2 %v807_v40, %s3662_s29  ;;  %v609_v33 = vperm.slane %v603_v38, 0  ;;  %v1037_v40 = vld [vmem:[#allocation1 + $0x4] ss:$9 sm:$0xff]  ;;  %s3668_s29 = smov 34  }
  0xce   : > { %536 = vrot.lane.b32.xlu1 %v529_v42, %s3663_s11  ;;  %v3973_v56 = vpop.permute.xlu0 %762  ;;  %v668_v42 = vrot.slane %v3940_v54, 7 }
  0xcf   : > { %v615_v46 = vmul.f32 %v609_v33, %v3932_v52 }
  0xd0   : > { %v670_v51 = vsel %vm669_vm7, %v668_v42, %v3940_v54  ;;  %vm740_vm7 = vcmask 891904  }
  0xd1   : > { %v672_v55 = vmul.f32 %v670_v51, %v661_v50 }
  0xd3   : > { %v678_v54 = vperm.slane %v672_v55, 0  ;;  %v680_v13 = vperm.slane %v672_v55, 2 }
  0xd5   : > { %534 = vrot.lane.b32.xlu0 %v528_v58, %s3663_s11  ;;  %538 = vrot.lane.b32.xlu2 %v530_v59, %s3663_s11  ;;  %v712_v59 = vrot.slane %v3942_v3, 7  ;;  %v686_v24 = vmul.f32 %v680_v13, %v3950_v22 }
  0xd6   : > { %977 = vrot.lane.b32.xlu1 %v970_v60, %s3664_s12  ;;  %v679_v60 = vperm.slane %v672_v55, 1  ;;  %v4034_v55 = vld [vmem:[#allocation3] sm:$0xf] }
  0xd7   : > { %v714_v62 = vsel %vm713_vm8, %v712_v59, %v3942_v3 }
  0xd8   : > { %v716_v32 = vmul.f32 %v714_v62, %v705_v61 }
  0xda   : > { %v723_v16 = vperm.slane %v716_v32, 1  ;;  %v724_v38 = vperm.slane %v716_v32, 2 }
  0xdc   : > { %v729_v3 = vmul.f32 %v723_v16, %v3960_v43  ;;  %v730_v33 = vmul.f32 %v724_v38, %v3960_v43 }
  0xdd   : > { %580 = vrot.lane.b32.xlu0 %v573_v2, %s5836_s20  ;;  %578 = vrot.lane.b32.xlu2 %v572_v7, %s5836_s20  ;;  %v685_v2 = vmul.f32 %v679_v60, %v3950_v22  ;;  %v684_v7 = vmul.f32 %v678_v54, %v3950_v22 }
  0xde   : > { %1002 = vperm.xlu1 %3386, %v3845_v6  }
  0xe0   : > { %v831_v17 = vpop.permute.xlu0 %830 }
  0xe1   : > { %v832_v35 = vrot.slane %v831_v17, 7 }
  0xe3   : > { %v834_v48 = vsel %vm833_vm6, %v832_v35, %v831_v17  ;;  %v749_v17 = vld [vmem:[#allocation2 + $0x4b] ss:$8 sm:$0x7] }
  0xe4   : > { %v3991_v41 = vmul.f32 %v834_v48, %v3946_v10  ;;  %v3998_v10 = vpop.permute.xlu1 %838 }
  0xe5   : > { %975 = vrot.lane.b32.xlu0 %v969_v29, %s3664_s12  ;;  %979 = vrot.lane.b32.xlu2 %v971_v31, %s3664_s12  ;;  %s3669_s12 = smov 112   ;;  %v722_v29 = vperm.slane %v716_v32, 0  ;;  %v913_v32 = vld [vmem:[#allocation2 + $0x4b] ss:$8 sm:$0x7] }
  0xe6   : > { %582 = vrot.lane.b32.xlu1 %v574_v37, %s5836_s20  ;;  %v843_v47 = vperm.slane %v3991_v41, 1  ;;  %v4019_v37 = vperm.slane %v3857_v8, 1  ;;  %v842_v22 = vperm.slane %v3991_v41, 0  ;;  %s3674_s20 = smov 93   ;;  %v844_v16 = vperm.slane %v3991_v41, 2 }
  0xe7   : > { %3390 = vset.pattern.permute.xlu1 %v5845_v0  ;;  %v728_v35 = vmul.f32 %v722_v29, %v3960_v43 }
  0xe8   : > { %v849_v58 = vmul.f32 %v843_v47, %v3998_v10  ;;  %v848_v48 = vmul.f32 %v842_v22, %v3998_v10  ;;  %v883_v47 = vpop.permute.xlu0 %882 }
  0xed   : > { %994 = vrot.lane.b32.xlu0 %v993_v49, %s3667_s26  ;;  %1038 = vrot.lane.b32.xlu2 %v1037_v40, %s3668_s29  ;;  %v617_v49 = vmul.f32 %v611_v39, %v3932_v52  ;;  %s3670_s26 = smov 94   ;;  %v756_v52 = vrot.slane %v3955_v34, 7 }
  0xee   : > { %621 = vrot.lane.b32.xlu1 %v615_v46, %s3669_s12  ;;  %v1077_v46 = vld [vmem:[%s5825_s3] sm:$0x3] }
  0xef   : > { %v758_v20 = vsel %vm757_vm9, %v756_v52, %v3955_v34  ;;  %v875_v34 = vpop.permute.xlu2 %874  ;;  %vm784_vm9 = vcmask 785408  }
  0xf0   : > { %v760_v26 = vmul.f32 %v758_v20, %v749_v17  ;;  %v876_v50 = vrot.slane %v875_v34, 7 }
  0xf1   : > { %v927_v60 = vpop.permute.xlu0 %926 }
  0xf2   : > { %v766_v42 = vperm.slane %v760_v26, 0  ;;  %v878_v43 = vsel %vm877_vm10, %v876_v50, %v875_v34  ;;  %v768_v39 = vperm.slane %v760_v26, 2  ;;  %vm817_vm10 = vcmask 777216  }
  0xf4   : > { %v772_v53 = vmul.f32 %v766_v42, %v3973_v56 }
  0xf5   : > { %623 = vrot.lane.b32.xlu2 %v616_v57, %s3669_s12  ;;  %856 = vrot.lane.b32.xlu0 %v849_v58, %s3670_s26  ;;  %v869_v57 = vld [vmem:[#allocation2 + $0x4b] ss:$8 sm:$0x7]  ;;  %v774_v58 = vmul.f32 %v768_v39, %v3973_v56  ;;  %v453_v39 = vrot.slane %v3923_v44, 7 }
  0xf6   : > { %625 = vrot.lane.b32.xlu1 %v617_v49, %s3669_s12  ;;  %s3672_s12 = smov 109   ;;  %v880_v49 = vmul.f32 %v878_v43, %v869_v57  ;;  %v446_v57 = vld [vmem:[#allocation2 + $0x43] ss:$8 sm:$0x7] }
  0xf7   : > { %v919_v40 = vpop.permute.xlu2 %918 }
  0xf8   : > { %v920_v59 = vrot.slane %v919_v40, 7  ;;  %v887_v54 = vperm.slane %v880_v49, 1  ;;  %v886_v29 = vperm.slane %v880_v49, 0  ;;  %v888_v22 = vperm.slane %v880_v49, 2 }
  0xfa   : > { %v922_v61 = vsel %vm5847_vm11, %v920_v59, %v919_v40  ;;  %vm948_vm11 = vcmask 654336  }
  0xfb   : > { %v924_v52 = vmul.f32 %v922_v61, %v913_v32 }
  0xfd   : > { %692 = vrot.lane.b32.xlu2 %v685_v2, %s3671_s25  ;;  %1046 = vperm.xlu0 %3387, %v3845_v6   ;;  %v767_v6 = vperm.slane %v760_v26, 1  ;;  %v4043_v2 = vperm.slane %v3862_v9, 1  ;;  %v931_v17 = vperm.slane %v924_v52, 1  ;;  %v930_v40 = vperm.slane %v924_v52, 0 }
  0xfe   : > { %690 = vrot.lane.b32.xlu1 %v684_v7, %s3671_s25  ;;  %v893_v7 = vmul.f32 %v887_v54, %v883_v47  ;;  %v932_v43 = vperm.slane %v924_v52, 2 }
  0xff   : > { %v773_v31 = vmul.f32 %v767_v6, %v3973_v56  ;;  %v937_v20 = vmul.f32 %v931_v17, %v927_v60  ;;  %v936_v42 = vmul.f32 %v930_v40, %v927_v60 }
 0x105   : > { %736 = vrot.lane.b32.xlu2 %v729_v3, %s3672_s12  ;;  %3389 = vset.pattern.permute.xlu0 %v5850_v12 }
 0x106   : > { %694 = vrot.lane.b32.xlu1 %v686_v24, %s3671_s25  ;;  %1124 = vrot.lane.b32.xlu0 %v4019_v37, %s3670_s26  ;;  %v850_v24 = vmul.f32 %v844_v16, %v3998_v10  ;;  %v894_v10 = vmul.f32 %v888_v22, %v883_v47  ;;  %s3676_s25 = smov 78  }
 0x10d   : > { %780 = vrot.lane.b32.xlu2 %v773_v31, %s3673_s27  ;;  %v892_v31 = vmul.f32 %v886_v29, %v883_v47  ;;  %v938_v47 = vmul.f32 %v932_v43, %v927_v60 }
 0x10e   : > { %734 = vrot.lane.b32.xlu1 %v728_v35, %s3672_s12 }
 0x115   : > { %854 = vrot.lane.b32.xlu2 %v848_v48, %s3670_s26 }
 0x116   : > { %738 = vrot.lane.b32.xlu1 %v730_v33, %s3672_s12  ;;  %s5880_s12 = smov 80  }
 0x117   : > { %v4032_v51 = vpop.permute.xlu2 %491 }
 0x11d   : > { %1080 = vperm.xlu2 %3388, %v1077_v46  }
 0x11e   : > { %778 = vrot.lane.b32.xlu1 %v772_v53, %s3673_s27 }
 0x11f   : > { %v4040_v62 = vpop.permute.xlu2 %493 }
 0x125   : > { %1137 = vperm.xlu2 %3388, %v4034_v55  }
 0x126   : > { %782 = vrot.lane.b32.xlu1 %v774_v58, %s3673_s27  ;;  %v455_v58 = vsel %vm5838_vm12, %v453_v39, %v3923_v44 }
 0x127   : > { %v4053_v3 = vpop.permute.xlu2 %815  ;;  %v4087_v54 = vmul.f32 %v455_v58, %v446_v57 }
 0x12d   : > { %900 = vrot.lane.b32.xlu2 %v893_v7, %s3674_s20  ;;  %v465_v7 = vperm.slane %v4087_v54, 1 }
 0x12e   : > { %1126 = vrot.lane.b32.xlu1 %v4043_v2, %s3670_s26  ;;  %3391 = vset.pattern.permute.xlu2 %v5848_v15 }
 0x12f   : > { %v4048_v56 = vpop.permute.xlu0 %495  ;;  %v4062_v35 = vpop.permute.xlu2 %538  ;;  %v471_v16 = vmul.f32 %v465_v7, %v3919_v36 }
 0x130   : > { %v4050_v13 = vpop.permute.xlu1 %652  ;;  %v499_v44 = vsel %vm497_vm5, %v4040_v62, %v4048_v56 }
 0x135   : > { %944 = vrot.lane.b32.xlu2 %v937_v20, %s5880_s12 }
 0x136   : > { %858 = vrot.lane.b32.xlu1 %v850_v24, %s3670_s26 }
 0x137   : > { %v4058_v26 = vpop.permute.xlu0 %650  ;;  %v4070_v48 = vpop.permute.xlu2 %578 }
 0x138   : > { %v4060_v6 = vpop.permute.xlu1 %813 }
 0x13e   : > { %898 = vrot.lane.b32.xlu1 %v892_v31, %s3674_s20  ;;  %v504_v31 = vadd.f32 %v499_v44, %v471_v16  ;;  %v1033_v44 = vld [vmem:[#allocation2 + $0x4b] ss:$8 sm:$0x7] }
 0x13f   : > { %v4064_v41 = vpop.permute.xlu0 %811  ;;  %v4077_v50 = vpop.permute.xlu2 %979 }
 0x140   : > { %v4066_v34 = vpop.permute.xlu1 %536 }
 0x141   : > { %v542_v20 = vsel %vm540_vm14, %v4066_v34, %v4062_v35 }
 0x142   : > { %v547_v43 = vadd.f32 %v542_v20, %v504_v31 }
 0x146   : > { %902 = vrot.lane.b32.xlu1 %v894_v10, %s3674_s20  ;;  %s5878_s20 = smov 77  }
 0x147   : > { %v4068_v38 = vpop.permute.xlu0 %534  ;;  %v1039_v61 = vpop.permute.xlu2 %1038 }
 0x148   : > { %v4072_v33 = vpop.permute.xlu1 %977  ;;  %v1040_v24 = vrot.slane %v1039_v61, 7 }
 0x14e   : > { %942 = vrot.lane.b32.xlu1 %v936_v42, %s5880_s12 }
 0x14f   : > { %v4075_v46 = vpop.permute.xlu0 %580  ;;  %v4104_v39 = vpop.permute.xlu2 %623 }
 0x150   : > { %v1003_v53 = vpop.permute.xlu1 %1002 }
 0x156   : > { %946 = vrot.lane.b32.xlu1 %v938_v47, %s5880_s12  ;;  %v1042_v47 = vsel %vm5863_vm15, %v1040_v24, %v1039_v61  ;;  %vm1024_vm15 = vcmask 637952   ;;  %s3683_s12 = smov 30  }
 0x157   : > { %v4083_v49 = vpop.permute.xlu0 %975 }
 0x158   : > { %v4085_v59 = vpop.permute.xlu1 %582  ;;  %v982_v28 = vsel %vm981_vm4, %v4083_v49, %v4072_v33 }
 0x159   : > { %v586_v22 = vsel %vm584_vm1, %v4075_v46, %v4085_v59 }
 0x15e   : > { %1160 = vperm.xlu1 %3390, %v4034_v55  }
 0x15f   : > { %v995_v32 = vpop.permute.xlu0 %994 }
 0x160   : > { %v4091_v60 = vpop.permute.xlu1 %621  ;;  %v996_v52 = vrot.slane %v995_v32, 7 }
 0x162   : > { %v998_v17 = vsel %vm997_vm13, %v996_v52, %v995_v32  ;;  %v591_v32 = vadd.f32 %v586_v22, %v547_v43  ;;  %vm860_vm13 = vcmask 769024  }
 0x163   : > { %v1000_v29 = vmul.f32 %v998_v17, %v3963_v45  ;;  %v1044_v17 = vmul.f32 %v1042_v47, %v1033_v44 }
 0x165   : > { %v1008_v10 = vperm.slane %v1000_v29, 2  ;;  %v1007_v40 = vperm.slane %v1000_v29, 1  ;;  %v1006_v42 = vperm.slane %v1000_v29, 0  ;;  %v1050_v61 = vperm.slane %v1044_v17, 0  ;;  %v4118_v29 = vpop.permute.xlu2 %692 }
 0x166   : > { %3392 = vset.pattern.permute.xlu1 %v5843_v4  ;;  %v1051_v43 = vperm.slane %v1044_v17, 1  ;;  %v1052_v47 = vperm.slane %v1044_v17, 2 }
 0x167   : > { %v4108_v57 = vpop.permute.xlu0 %856  ;;  %v1014_v45 = vmul.f32 %v1008_v10, %v1003_v53  ;;  %v1013_v58 = vmul.f32 %v1007_v40, %v1003_v53  ;;  %v1012_v7 = vmul.f32 %v1006_v42, %v1003_v53  ;;  %v654_v53 = vsel %vm5838_vm12, %v4058_v26, %v4050_v13 }
 0x168   : > { %v4110_v52 = vpop.permute.xlu1 %625  ;;  %vm904_vm12 = vcmask 760832  }
 0x169   : > { %v629_v16 = vsel %vm627_vm2, %v4104_v39, %v4110_v52  ;;  %1022 = vrot.lane.b32.xlu1 %v1014_v45, %s3676_s25  ;;  %1020 = vrot.lane.b32.xlu0 %v1013_v58, %s3676_s25 }
 0x16a   : > { %v634_v20 = vadd.f32 %v629_v16, %v591_v32  ;;  %1018 = vrot.lane.b32.xlu2 %v1012_v7, %s3676_s25  ;;  %s3678_s25 = smov 98  }
 0x16c   : > { %v659_v22 = vadd.f32 %v654_v53, %v634_v20 }
 0x16d   : > { %v4134_v32 = vpop.permute.xlu2 %736 }
 0x16f   : > { %v1047_v24 = vpop.permute.xlu0 %1046 }
 0x170   : > { %v4120_v31 = vpop.permute.xlu1 %690  ;;  %v1056_v10 = vmul.f32 %v1050_v61, %v1047_v24  ;;  %v1057_v58 = vmul.f32 %v1051_v43, %v1047_v24  ;;  %v1058_v7 = vmul.f32 %v1052_v47, %v1047_v24 }
 0x171   : > { %v697_v40 = vsel %vm696_vm3, %v4120_v31, %v4118_v29  ;;  %1147 = vperm.xlu0 %3389, %v4034_v55  }
 0x172   : > { %v703_v42 = vadd.f32 %v697_v40, %v659_v22  ;;  %1173 = vperm.xlu2 %3391, %v4034_v55   ;;  %1062 = vrot.lane.b32.xlu1 %v1056_v10, %s5878_s20  ;;  %v818_v40 = vsel %vm817_vm10, %v4064_v41, %v4060_v6 }
 0x175   : > { %v4141_v20 = vpop.permute.xlu2 %780 }
 0x178   : > { %v4128_v45 = vpop.permute.xlu1 %694  ;;  %v4184_v21 = vpop.permute.xlu0 %1124 }
 0x179   : > { %3395 = vset.pattern.permute.xlu0 %v5839_v23  ;;  %5930 = vst [vmem:[#allocation16_spill] sm:$0xff] %v4184_v21 }
 0x17a   : > { %1064 = vrot.lane.b32.xlu2 %v1057_v58, %s5878_s20  ;;  %1066 = vrot.lane.b32.xlu1 %v1058_v7, %s5878_s20  ;;  %s3679_s20 = smov 124  }
 0x17b   : > { %3393 = vset.pattern.permute.xlu2 %v5841_v11 }
 0x17d   : > { %v4150_v22 = vpop.permute.xlu2 %854 }
 0x17e   : > { %v861_v23 = vsel %vm860_vm13, %v4150_v22, %v4108_v57 }
 0x180   : > { %v4136_v44 = vpop.permute.xlu1 %734 }
 0x181   : > { %v741_v16 = vsel %vm740_vm7, %v4136_v44, %v4134_v32 }
 0x182   : > { %v747_v17 = vadd.f32 %v741_v16, %v703_v42 }
 0x185   : > { %v4155_v47 = vpop.permute.xlu2 %1080 }
 0x188   : > { %v4143_v61 = vpop.permute.xlu1 %738 }
 0x18d   : > { %v4159_v7 = vpop.permute.xlu2 %1137 }
 0x18e   : > { %5929 = vst [vmem:[#allocation15_spill] sm:$0xff] %v4159_v7 }
 0x190   : > { %v4145_v53 = vpop.permute.xlu1 %778 }
 0x191   : > { %v785_v24 = vsel %vm784_vm9, %v4145_v53, %v4141_v20 }
 0x192   : > { %v791_v10 = vadd.f32 %v785_v24, %v747_v17 }
 0x194   : > { %v824_v42 = vadd.f32 %v818_v40, %v791_v10 }
 0x195   : > { %v901_v17 = vpop.permute.xlu2 %900 }
 0x196   : > { %v867_v11 = vadd.f32 %v861_v23, %v824_v42  ;;  %v4177_v42 = vld [vmem:[#allocation2 + $0x40] sm:$0x7] }
 0x197   : > { %v1203_v18 = vperm.slane %v4177_v42, 1 }
 0x198   : > { %v783_v43 = vpop.permute.xlu1 %782 }
 0x19d   : > { %v945_v0 = vpop.permute.xlu2 %944 }
 0x1a0   : > { %v4157_v58 = vpop.permute.xlu1 %1126 }
 0x1a1   : > { %5928 = vst [vmem:[#allocation14_spill] sm:$0xff] %v4157_v58  ;;  %v5933_v58 = vmov 6  }
 0x1a8   : > { %v859_v16 = vpop.permute.xlu1 %858 }
 0x1b0   : > { %v4164_v24 = vpop.permute.xlu1 %898 }
 0x1b1   : > { %v905_v10 = vsel %vm904_vm12, %v4164_v24, %v901_v17 }
 0x1b2   : > { %v911_v40 = vadd.f32 %v905_v10, %v867_v11  ;;  %v1176_v11 = vperm.slane %v4177_v42, 0 }
 0x1b8   : > { %v903_v4 = vpop.permute.xlu1 %902 }
 0x1c0   : > { %v4168_v15 = vpop.permute.xlu1 %942 }
 0x1c1   : > { %v949_v12 = vsel %vm948_vm11, %v4168_v15, %v945_v0 }
 0x1c2   : > { %v955_v1 = vadd.f32 %v949_v12, %v911_v40 }
 0x1c4   : > { %v4175_v63 = vpop.permute.xlu2 %1018  ;;  %v988_v23 = vadd.f32 %v982_v28, %v955_v1 }
 0x1c8   : > { %v947_v28 = vpop.permute.xlu1 %946 }
 0x1cc   : > { %v4180_v10 = vpop.permute.xlu2 %1173 }
 0x1cd   : > { %v1179_v30 = vmul.f32 %v1176_v11, %v4180_v10 }
 0x1cf   : > { %1185 = vrot.lane.b32.xlu1 %v1179_v30, %s3663_s11 }
 0x1d0   : > { %v4192_v27 = vpop.permute.xlu1 %1160 }
 0x1d1   : > { %5931 = vst [vmem:[#allocation17_spill] sm:$0xff] %v4192_v27 }
 0x1d7   : > { %1200 = vperm.xlu1 %3392, %v4034_v55  }
 0x1db   : > { %v1021_v12 = vpop.permute.xlu0 %1020  ;;  %v1023_v14 = vpop.permute.xlu1 %1022 }
 0x1dc   : > { %v1025_v40 = vsel %vm1024_vm15, %v4175_v63, %v1021_v12 }
 0x1dd   : > { %v4189_v1 = vadd.f32 %v1025_v40, %v988_v23  ;;  %v466_v23 = vperm.slane %v4087_v54, 2 }
 0x1df   : > { %3401 = vset.pattern.permute.xlu1 %v5874_v19  ;;  %v472_v40 = vmul.f32 %v466_v23, %v3919_v36 }
 0x1e1   : > { %v505_v19 = vadd.f32 %v4048_v56, %v472_v40  ;;  %v742_v56 = vsel %vm740_vm7, %v4134_v32, %v4143_v61  ;;  %v5935_v32 = vmov 9  }
 0x1e3   : > { %v548_v27 = vadd.f32 %v4062_v35, %v505_v19  ;;  %v786_v19 = vsel %vm784_vm9, %v4141_v20, %v783_v43  ;;  %v950_v20 = vsel %vm948_vm11, %v945_v0, %v947_v28 }
 0x1e4   : > { %v4194_v11 = vpop.permute.xlu1 %1062 }
 0x1ec   : > { %v1067_v30 = vpop.permute.xlu1 %1066 }
 0x241   : > { %v4196_v25 = vpop.permute.xlu1 %1185 }
 0x242   : > { %5932 = vst [vmem:[#allocation18_spill] sm:$0xff] %v4196_v25  ;;  %v592_v25 = vadd.f32 %v4085_v59, %v548_v27  ;;  %v5934_v27 = vmov 8   ;;  %v819_v59 = vsel %vm817_vm10, %v4060_v6, %v4053_v3  ;;  %v1026_v3 = vsel %vm1024_vm15, %v1021_v12, %v1023_v14 }
 0x243   : > { %v4248_v14 = vperm.slane %v3862_v9, 4  ;;  %v5964_v9 = vld [vmem:[#allocation17_spill] sm:$0xff]  ;;  %vm1709_vm15 = vcmask 506880   ;;  %vm6028_vm10 = vcmask 932864  }
 0x245   : > { %5937 = vst [vmem:[#allocation19_spill] sm:$0xff] %v4248_v14  ;;  %1259 = vrot.lane.b32.xlu1 %v4248_v14, %s3678_s25 }
 0x249   : > { %v4199_v7 = vpop.permute.xlu1 %1200 }
 0x24a   : > { %v1206_v21 = vmul.f32 %v1203_v18, %v4199_v7  ;;  %v635_v18 = vadd.f32 %v4110_v52, %v592_v25 }
 0x24c   : > { %1212 = vrot.lane.b32.xlu2 %v1206_v21, %s3663_s11  ;;  %v698_v21 = vsel %vm696_vm3, %v4118_v29, %v4128_v45  ;;  %v660_v23 = vadd.f32 %v4050_v13, %v635_v18  ;;  %v862_v13 = vsel %vm860_vm13, %v4108_v57, %v859_v16  ;;  %v906_v29 = vsel %vm904_vm12, %v901_v17, %v903_v4  ;;  %v4236_v57 = vpop.permute.xlu2 %1064 }
 0x24d   : > { %v983_v18 = vsel %vm981_vm4, %v4072_v33, %v4077_v50  ;;  %vm1068_vm3 = vcmask 629760   ;;  %v5936_v16 = vmov 11   ;;  %v1230_v50 = vperm.slane %v4177_v42, 2 }
 0x24e   : > { %v704_v40 = vadd.f32 %v698_v21, %v660_v23  ;;  %v1070_v4 = vsel %vm1068_vm3, %v4236_v57, %v1067_v30  ;;  %v4261_v21 = vperm.slane %v3857_v8, 4  ;;  %v4264_v23 = vpop.permute.xlu0 %1147  ;;  %vm1261_vm4 = vcmask 801792  }
 0x24f   : > { %vm1627_vm12 = vcmask 523264  }
 0x250   : > { %v748_v35 = vadd.f32 %v742_v56, %v704_v40  ;;  %5938 = vst [vmem:[#allocation20_spill] sm:$0xff] %v4261_v21 }
 0x252   : > { %v792_v25 = vadd.f32 %v786_v19, %v748_v35 }
 0x254   : > { %1227 = vperm.xlu2 %3393, %v4034_v55   ;;  %v825_v52 = vadd.f32 %v819_v59, %v792_v25 }
 0x256   : > { %v868_v45 = vadd.f32 %v862_v13, %v825_v52 }
 0x258   : > { %v912_v61 = vadd.f32 %v906_v29, %v868_v45  ;;  %v5939_v45 = vmov 10  }
 0x25a   : > { %v956_v43 = vadd.f32 %v950_v20, %v912_v61  ;;  %v5894_v20 = vmov 16  }
 0x25c   : > { %3394 = vset.pattern.permute.xlu2 %v5933_v58  ;;  %v989_v6 = vadd.f32 %v983_v18, %v956_v43  ;;  %v464_v43 = vperm.slane %v4087_v54, 0  ;;  %v585_v54 = vsel %vm584_vm1, %v4070_v48, %v4075_v46 }
 0x25d   : > { %1270 = vperm.xlu2 %3394, %v4034_v55  }
 0x25e   : > { %v1032_v0 = vadd.f32 %v1026_v3, %v989_v6  ;;  %v498_v3 = vsel %vm497_vm5, %v4032_v51, %v4040_v62  ;;  %v628_v51 = vsel %vm627_vm2, %v4091_v60, %v4104_v39  ;;  %vm1288_vm5 = vcmask 1014784  }
 0x25f   : > { %vm5971_vm2 = vcmask 277504  }
 0x260   : > { %v1076_v17 = vadd.f32 %v1070_v4, %v1032_v0  ;;  %v470_v4 = vmul.f32 %v464_v43, %v3919_v36  ;;  %vm6025_vm7 = vmmov %vm5971_vm2 }
 0x262   : > { %v4243_v28 = vadd.f32 %v4155_v47, %v1076_v17  ;;  %v541_v17 = vsel %vm540_vm14, %v4068_v38, %v4066_v34 }
 0x265   : > { %3396 = vset.pattern.permute.xlu2 %v5934_v27 }
 0x266   : > { %1325 = vperm.xlu2 %3396, %v4034_v55  }
 0x26e   : > { %3397 = vset.pattern.permute.xlu2 %v5935_v32 }
 0x26f   : > { %1363 = vperm.xlu2 %3397, %v4034_v55  }
 0x277   : > { %3399 = vset.pattern.permute.xlu2 %v5936_v16 }
 0x278   : > { %1417 = vperm.xlu2 %3399, %v4034_v55  }
 0x280   : > { %1093 = vrot.lane.b32.xlu2 %v4243_v28, %s3657_s21 }
 0x281   : > { %3404 = vset.pattern.permute.xlu2 %v5894_v20 }
 0x288   : > { %1505 = vrot.lane.b32.xlu2 %v4248_v14, %s3654_s18 }
 0x290   : > { %1543 = vperm.xlu2 %3404, %v4034_v55  }
 0x2a6   : > { %v4253_v33 = vpop.permute.xlu2 %1212 }
 0x2ae   : > { %v4256_v12 = vpop.permute.xlu2 %1227 }
 0x2af   : > { %v1233_v30 = vmul.f32 %v1230_v50, %v4256_v12  ;;  %v503_v50 = vadd.f32 %v498_v3, %v470_v4 }
 0x2b1   : > { %1239 = vrot.lane.b32.xlu0 %v1233_v30, %s3663_s11  ;;  %v546_v30 = vadd.f32 %v541_v17, %v503_v50 }
 0x2b3   : > { %v590_v62 = vadd.f32 %v585_v54, %v546_v30  ;;  %v5888_v54 = vmov 19  }
 0x2b4   : > { %3407 = vset.pattern.permute.xlu2 %v5888_v54 }
 0x2b7   : > { %v4272_v25 = vpop.permute.xlu2 %1270 }
 0x2b9   : > { %1257 = vrot.lane.b32.xlu0 %v4261_v21, %s3678_s25  ;;  %s3682_s25 = smov 92  }
 0x2c0   : > { %v4277_v52 = vpop.permute.xlu2 %1325 }
 0x323   : > { %v4266_v56 = vpop.permute.xlu0 %1239 }
 0x32b   : > { %v4268_v40 = vpop.permute.xlu0 %1257 }
 0x32c   : > { %v1266_v19 = vmul.f32 %v4268_v40, %v4177_v42 }
 0x32e   : > { %v1273_v35 = vperm.slane %v1266_v19, 0  ;;  %v1328_v13 = vperm.slane %v1266_v19, 2  ;;  %v1301_v18 = vperm.slane %v1266_v19, 1  ;;  %v633_v19 = vadd.f32 %v628_v51, %v590_v62 }
 0x32f   : > { %v5941_v51 = vmov 15   ;;  %v5890_v62 = vmov 17  }
 0x330   : > { %v1276_v59 = vmul.f32 %v1273_v35, %v4272_v25  ;;  %v1331_v29 = vmul.f32 %v1328_v13, %v4277_v52  ;;  %v658_v34 = vadd.f32 %v4058_v26, %v633_v19  ;;  %v5884_v19 = vmov 20  }
 0x332   : > { %1282 = vrot.lane.b32.xlu0 %v1276_v59, %s3679_s20  ;;  %v702_v38 = vadd.f32 %v4120_v31, %v658_v34  ;;  %v4318_v59 = vpop.permute.xlu2 %1363 }
 0x334   : > { %v746_v48 = vadd.f32 %v4136_v44, %v702_v38 }
 0x336   : > { %v790_v60 = vadd.f32 %v4145_v53, %v746_v48 }
 0x33a   : > { %1298 = vperm.xlu0 %3395, %v4034_v55   ;;  %v4328_v43 = vpop.permute.xlu2 %1417 }
 0x342   : > { %1337 = vrot.lane.b32.xlu0 %v1331_v29, %s3679_s20  ;;  %v823_v29 = vadd.f32 %v4064_v41, %v790_v60  ;;  %v5940_v41 = vmov 12   ;;  %v1069_v60 = vsel %vm1068_vm3, %v4194_v11, %v4236_v57 }
 0x343   : > { %3398 = vset.pattern.permute.xlu0 %v5939_v45  ;;  %v5963_v45 = vld [vmem:[#allocation15_spill] sm:$0xff] }
 0x344   : > { %v866_v26 = vadd.f32 %v4150_v22, %v823_v29 }
 0x346   : > { %v910_v31 = vadd.f32 %v4164_v24, %v866_v26  ;;  %v5943_v26 = vmov 14  }
 0x348   : > { %v954_v44 = vadd.f32 %v4168_v15, %v910_v31  ;;  %v4337_v15 = vpop.permute.xlu2 %1093 }
 0x34a   : > { %1351 = vrot.lane.b32.xlu0 %v4019_v37, %s3663_s11  ;;  %v987_v53 = vadd.f32 %v4083_v49, %v954_v44 }
 0x34c   : > { %v1030_v3 = vadd.f32 %v4175_v63, %v987_v53 }
 0x34e   : > { %v1074_v22 = vadd.f32 %v4194_v11, %v1030_v3 }
 0x350   : > { %v1083_v24 = vadd.f32 %v4155_v47, %v1074_v22  ;;  %v4340_v49 = vpop.permute.xlu2 %1505 }
 0x352   : > { %v1101_v4 = vrot.slane %v1083_v24, 4 }
 0x358   : > { %v4347_v17 = vpop.permute.xlu2 %1543 }
 0x3a4   : > { %v4286_v61 = vpop.permute.xlu0 %1282 }
 0x3ac   : > { %v4292_v6 = vpop.permute.xlu0 %1298 }
 0x3ad   : > { %v1304_v0 = vmul.f32 %v1301_v18, %v4292_v6 }
 0x3af   : > { %1310 = vrot.lane.b32.xlu1 %v1304_v0, %s3679_s20  ;;  %v4342_v0 = vld [vmem:[#allocation2 + $0x58] sm:$0x7] }
 0x3b0   : > { %v1513_v63 = vmul.f32 %v4340_v49, %v4342_v0 }
 0x3b2   : > { %v1548_v50 = vperm.slane %v1513_v63, 1  ;;  %v1520_v57 = vperm.slane %v1513_v63, 0  ;;  %v1575_v53 = vperm.slane %v1513_v63, 2 }
 0x3b4   : > { %v4306_v36 = vpop.permute.xlu0 %1337  ;;  %v1551_v30 = vmul.f32 %v1548_v50, %v4347_v17 }
 0x3b6   : > { %1559 = vrot.lane.b32.xlu2 %v1551_v30, %s3682_s25 }
 0x3b7   : > { %1353 = vrot.lane.b32.xlu1 %v4043_v2, %s3663_s11 }
 0x3bc   : > { %v4312_v35 = vpop.permute.xlu0 %1351 }
 0x3bd   : > { %v1359_v46 = vmul.f32 %v4312_v35, %v4177_v42 }
 0x3be   : > { %1596 = vrot.lane.b32.xlu2 %v4019_v37, %s3683_s12 }
 0x3bf   : > { %v1366_v39 = vperm.slane %v1359_v46, 0  ;;  %v1420_v42 = vperm.slane %v1359_v46, 2  ;;  %v1393_v38 = vperm.slane %v1359_v46, 1 }
 0x3c1   : > { %v1369_v13 = vmul.f32 %v1366_v39, %v4318_v59  ;;  %v1423_v18 = vmul.f32 %v1420_v42, %v4328_v43 }
 0x3c3   : > { %1375 = vrot.lane.b32.xlu0 %v1369_v13, %s3673_s27 }
 0x3c6   : > { %1637 = vperm.xlu2 %3407, %v4034_v55  }
 0x3cb   : > { %1390 = vperm.xlu0 %3398, %v4034_v55  }
 0x3d3   : > { %1429 = vrot.lane.b32.xlu0 %v1423_v18, %s3673_s27 }
 0x3d4   : > { %3400 = vset.pattern.permute.xlu0 %v5940_v41 }
 0x3db   : > { %1089 = vrot.lane.b32.xlu0 %v1083_v24, %s3657_s21 }
 0x3e3   : > { %1104 = vrot.lane.b32.xlu0 %v1101_v4, %s3657_s21 }
 0x3eb   : > { %1444 = vperm.xlu0 %3400, %v4034_v55  }
 0x3f3   : > { %3403 = vset.pattern.permute.xlu0 %v5941_v51 }
 0x3f4   : > { %1515 = vperm.xlu0 %3403, %v4034_v55  }
 0x3fc   : > { %3405 = vset.pattern.permute.xlu0 %v5890_v62 }
 0x3fd   : > { %1570 = vperm.xlu0 %3405, %v4034_v55  }
 0x405   : > { %1598 = vrot.lane.b32.xlu0 %v4043_v2, %s3683_s12  ;;  %v1075_v2 = vadd.f32 %v1069_v60, %v4189_v1  ;;  %v5885_v1 = vmov 21   ;;  %v4417_v60 = vpop.permute.xlu1 %1259  ;;  %s380_s12 = sand.u32 1, %s3621_s14  }
 0x406   : > { %3408 = vset.pattern.permute.xlu0 %v5884_v19  ;;  %3409 = vset.pattern.permute.xlu2 %v5885_v1  ;;  %s3241_s30 = smul.u32 96, %s380_s12 }
 0x407   : > { %v4374_v13 = vadd.f32 %v4155_v47, %v1075_v2  ;;  %v5892_v47 = vmov 18  }
 0x408   : > { %s4442_s28 = scalar_lea.vmem [#allocation8], %s3241_s30  ;;  %s3689_s30 = smov 62  }
 0x40d   : > { %1664 = vperm.xlu0 %3408, %v4034_v55  }
 0x410   : > { %v4389_v31 = vpop.permute.xlu2 %1559 }
 0x411   : > { %5944 = vst [vmem:[#allocation22_spill] sm:$0xff] %v4389_v31 }
 0x418   : > { %v4397_v3 = vpop.permute.xlu2 %1596 }
 0x420   : > { %v4407_v50 = vpop.permute.xlu2 %1637 }
 0x421   : > { %v4419_v2 = vpop.permute.xlu1 %1310 }
 0x435   : > { %v4361_v34 = vpop.permute.xlu0 %1375 }
 0x43d   : > { %v4363_v48 = vpop.permute.xlu0 %1390 }
 0x43e   : > { %v1396_v37 = vmul.f32 %v1393_v38, %v4363_v48  ;;  %v5945_v38 = vmov 0  }
 0x440   : > { %1402 = vrot.lane.b32.xlu1 %v1396_v37, %s3673_s27  ;;  %v1103_v37 = vrot.slane %v4243_v28, 4 }
 0x445   : > { %v4371_v39 = vpop.permute.xlu0 %1429 }
 0x446   : > { %5942 = vst [vmem:[#allocation21_spill] sm:$0xff] %v4371_v39 }
 0x448   : > { %1091 = vrot.lane.b32.xlu1 %v4374_v13, %s3657_s21 }
 0x44d   : > { %v1090_v46 = vpop.permute.xlu0 %1089 }
 0x450   : > { %1463 = vperm.xlu1 %3401, %v4034_v55  }
 0x455   : > { %v4379_v29 = vpop.permute.xlu0 %1104 }
 0x458   : > { %3402 = vset.pattern.permute.xlu1 %v5943_v26 }
 0x459   : > { %1482 = vperm.xlu1 %3402, %v4034_v55  }
 0x45d   : > { %v4383_v11 = vpop.permute.xlu0 %1444 }
 0x461   : > { %1503 = vrot.lane.b32.xlu1 %v4261_v21, %s3654_s18  ;;  %s3688_s18 = smov 64  }
 0x462   : > { %3406 = vset.pattern.permute.xlu1 %v5892_v47 }
 0x466   : > { %v4391_v44 = vpop.permute.xlu0 %1515 }
 0x467   : > { %v1523_v42 = vmul.f32 %v1520_v57, %v4391_v44  ;;  %v4421_v57 = vpop.permute.xlu1 %1353 }
 0x469   : > { %1531 = vrot.lane.b32.xlu1 %v1523_v42, %s3682_s25 }
 0x46f   : > { %v4395_v18 = vpop.permute.xlu0 %1570 }
 0x470   : > { %v1578_v22 = vmul.f32 %v1575_v53, %v4395_v18 }
 0x472   : > { %1586 = vrot.lane.b32.xlu1 %v1578_v22, %s3682_s25 }
 0x477   : > { %v4401_v24 = vpop.permute.xlu0 %1598 }
 0x478   : > { %v4405_v4 = vmul.f32 %v4401_v24, %v4342_v0 }
 0x47a   : > { %1609 = vperm.xlu1 %3406, %v4034_v55   ;;  %v1642_v63 = vperm.slane %v4405_v4, 1 }
 0x47c   : > { %v1645_v30 = vmul.f32 %v1642_v63, %v4407_v50 }
 0x47e   : > { %1653 = vrot.lane.b32.xlu2 %v1645_v30, %s3688_s18 }
 0x482   : > { %3416 = vset.pattern.permute.xlu1 %v5945_v38 }
 0x486   : > { %1691 = vperm.xlu2 %3409, %v4034_v55  }
 0x48e   : > { %1108 = vrot.lane.b32.xlu2 %v1103_v37, %s3657_s21 }
 0x4b2   : > { %v4423_v42 = vpop.permute.xlu1 %1402 }
 0x4ba   : > { %v1092_v53 = vpop.permute.xlu1 %1091 }
 0x4bb   : > { %v1095_v22 = vsel %vm833_vm6, %v1090_v46, %v1092_v53  ;;  %v1096_v63 = vsel %vm833_vm6, %v1092_v53, %v4337_v15 }
 0x4bc   : > { %1099 = vst [vmem:[#allocation2 + $0x48] sm:$0x3] %v1095_v22 }
 0x4bd   : > { %1100 = vst [vmem:[#allocation2 + $0x50] sm:$0x3] %v1096_v63 }
 0x4c2   : > { %v4429_v28 = vpop.permute.xlu1 %1463 }
 0x4c3   : > { %v4439_v1 = vld [vmem:[#allocation2 + $0x48] sm:$0x7] }
 0x4c4   : > { %v4433_v30 = vld [vmem:[#allocation2 + $0x50] sm:$0x7]  ;;  %v2716_v15 = vld [vmem:[#allocation2 + $0x48] sm:$0xf]  ;;  %v5897_v53 = vperm.slane %v4439_v1, 1 }
 0x4c5   : > { %5946 = vst [vmem:[#allocation23_spill] sm:$0xff] %v4433_v30  ;;  %v5896_v37 = vperm.slane %v4433_v30, 0  ;;  %v2717_v46 = vld [vmem:[#allocation2 + $0x50] sm:$0xf]  ;;  %v1205_v63 = vperm.slane %v4433_v30, 1  ;;  %v1232_v26 = vperm.slane %v4433_v30, 2 }
 0x4c6   : > { %3100 = vst [vmem:[%s4442_s28 + $0x40] sm:$0xf] %v2716_v15  ;;  %v3115_v41 = vrot.slane %v2717_v46, 4  ;;  %v4474_v16 = vld [vmem:[#allocation2 + $0x48] sm:$0x7] }
 0x4c7   : > { %v1181_v19 = vmul.f32 %v5896_v37, %v4180_v10  ;;  %3101 = vst [vmem:[%s4442_s28 + $0x48] sm:$0xf] %v2717_v46  ;;  %v1467_v47 = vmul.f32 %v4429_v28, %v1205_v63  ;;  %v4495_v31 = vld [vmem:[#allocation2 + $0x50] sm:$0x7] }
 0x4c8   : > { %3120 = vst [vmem:[#allocation1] sm:$0xff] %v2716_v15 }
 0x4c9   : > { %1189 = vrot.lane.b32.xlu0 %v1181_v19, %s3663_s11  ;;  %3121 = vst [vmem:[#allocation1 + $0x9] sm:$0xff] %v2717_v46  ;;  %v1207_v19 = vmul.f32 %v5897_v53, %v4199_v7  ;;  %v3114_v53 = vrot.slane %v2716_v15, 4  ;;  %v5898_v15 = vmov 22   ;;  %v1694_v46 = vperm.slane %v4474_v16, 0 }
 0x4ca   : > { %3119 = vst [vmem:[%s4442_s28 + $0x58] sm:$0x70] %v3115_v41  ;;  %3410 = vset.pattern.permute.xlu0 %v5898_v15  ;;  %v1177_v41 = vperm.slane %v4439_v1, 0 }
 0x4cb   : > { %v4446_v22 = vpop.permute.xlu1 %1482  ;;  %3118 = vst [vmem:[%s4442_s28 + $0x50] sm:$0x70] %v3114_v53 }
 0x4cc   : > { %v1486_v51 = vmul.f32 %v4446_v22, %v1232_v26 }
 0x4d0   : > { %v3123_v62 = vld [vmem:[#allocation1 + $0x3] ss:$9 sm:$0xff] }
 0x4d1   : > { %1214 = vrot.lane.b32.xlu0 %v1207_v19, %s3663_s11  ;;  %3237 = vst.msk [vmem:[%s4442_s28 + $0x57] ss:$8 sm:$0x3] %vm3838_vm0, %v3123_v62  ;;  %v1696_v19 = vperm.slane %v4342_v0, 0  ;;  %vm1600_vm0 = vcmask 244736  }
 0x4d3   : > { %v4454_v54 = vpop.permute.xlu1 %1503 }
 0x4d4   : > { %v4484_v53 = vmul.f32 %v4454_v54, %v4474_v16 }
 0x4d6   : > { %v1546_v15 = vperm.slane %v4484_v53, 1 }
 0x4d8   : > { %v4460_v20 = vpop.permute.xlu2 %1653 }
 0x4d9   : > { %5947 = vst [vmem:[#allocation24_spill] sm:$0xff] %v4460_v20  ;;  %1472 = vrot.lane.b32.xlu0 %v1467_v47, %s3670_s26 }
 0x4db   : > { %v4463_v37 = vpop.permute.xlu1 %1531 }
 0x4dc   : > { %5948 = vst [vmem:[#allocation25_spill] sm:$0xff] %v4463_v37 }
 0x4e0   : > { %v4470_v5 = vpop.permute.xlu2 %1691 }
 0x4e1   : > { %1491 = vrot.lane.b32.xlu0 %v1486_v51, %s3670_s26  ;;  %v1699_v62 = vmul.f32 %v1696_v19, %v4470_v5  ;;  %v1697_v51 = vmul.f32 %v1694_v46, %v4470_v5  ;;  %v1180_v19 = vmul.f32 %v1177_v41, %v4180_v10  ;;  %v1549_v46 = vmul.f32 %v1546_v15, %v4347_v17 }
 0x4e2   : > { %v1601_v10 = vsel %vm1600_vm0, %v4397_v3, %v4401_v24  ;;  %vm6030_vm0 = vcmask 908288  }
 0x4e3   : > { %1707 = vrot.lane.b32.xlu2 %v1699_v62, %s3689_s30  ;;  %v1614_v62 = vperm.slane %v4405_v4, 0 }
 0x4e4   : > { %v4477_v47 = vpop.permute.xlu1 %1586 }
 0x4e5   : > { %5949 = vst [vmem:[#allocation26_spill] sm:$0xff] %v4477_v47 }
 0x4e9   : > { %1703 = vrot.lane.b32.xlu0 %v1697_v51, %s3689_s30  ;;  %v1235_v51 = vmul.f32 %v1232_v26, %v4256_v12  ;;  %v5950_v26 = vperm.slane %v4433_v30, 0 }
 0x4eb   : > { %1187 = vrot.lane.b32.xlu2 %v1180_v19, %s3663_s11  ;;  %v4504_v19 = vmul.f32 %v1601_v10, %v4495_v31  ;;  %v1448_v15 = vmul.f32 %v4383_v11, %v5950_v26  ;;  %v4520_v10 = vpop.permute.xlu0 %1664 }
 0x4ec   : > { %v4492_v20 = vpop.permute.xlu1 %1609 }
 0x4ed   : > { %v1617_v47 = vmul.f32 %v1614_v62, %v4492_v20  ;;  %v1102_v62 = vrot.slane %v4374_v13, 4  ;;  %v1613_v37 = vperm.slane %v4504_v19, 0 }
 0x4ef   : > { %1625 = vrot.lane.b32.xlu1 %v1617_v47, %s3688_s18  ;;  %v4511_v47 = vmul.f32 %v4397_v3, %v4474_v16  ;;  %v1616_v24 = vmul.f32 %v1613_v37, %v4492_v20 }
 0x4f1   : > { %1555 = vrot.lane.b32.xlu0 %v1549_v46, %s3682_s25  ;;  %v1669_v46 = vperm.slane %v4405_v4, 2  ;;  %v1640_v13 = vperm.slane %v4511_v47, 1  ;;  %v1208_v4 = vmul.f32 %v1205_v63, %v4199_v7  ;;  %v1262_v7 = vsel %vm1261_vm4, %v4268_v40, %v4417_v60 }
 0x4f3   : > { %1243 = vrot.lane.b32.xlu2 %v1235_v51, %s3663_s11  ;;  %v1672_v3 = vmul.f32 %v1669_v46, %v4520_v10  ;;  %v1643_v37 = vmul.f32 %v1640_v13, %v4407_v50  ;;  %v5951_v51 = vperm.slane %v4439_v1, 1 }
 0x4f7   : > { %1106 = vrot.lane.b32.xlu1 %v1102_v62, %s3657_s21  ;;  %v1466_v62 = vmul.f32 %v4429_v28, %v5951_v51 }
 0x4f9   : > { %1623 = vrot.lane.b32.xlu0 %v1616_v24, %s3688_s18  ;;  %v1231_v24 = vperm.slane %v4439_v1, 2 }
 0x4fb   : > { %1453 = vrot.lane.b32.xlu2 %v1448_v15, %s3670_s26  ;;  %v1485_v26 = vmul.f32 %v4446_v22, %v1231_v24  ;;  %v1268_v15 = vmul.f32 %v4417_v60, %v4433_v30  ;;  %v1234_v28 = vmul.f32 %v1231_v24, %v4256_v12  ;;  %v1267_v22 = vmul.f32 %v1262_v7, %v4439_v1 }
 0x4fc   : > { %v1695_v12 = vperm.slane %v4495_v31, 0 }
 0x4fd   : > { %v1275_v46 = vperm.slane %v1268_v15, 0  ;;  %v1302_v13 = vperm.slane %v1267_v22, 1  ;;  %v1330_v40 = vperm.slane %v1268_v15, 2  ;;  %v1274_v51 = vperm.slane %v1267_v22, 0 }
 0x4fe   : > { %v1303_v24 = vperm.slane %v1268_v15, 1  ;;  %v1329_v7 = vperm.slane %v1267_v22, 2  ;;  %v1507_v15 = vsel %vm713_vm8, %v4454_v54, %v4340_v49  ;;  %vm1533_vm8 = vcmask 752640  }
 0x4ff   : > { %1680 = vrot.lane.b32.xlu1 %v1672_v3, %s3688_s18  ;;  %v1278_v63 = vmul.f32 %v1275_v46, %v4272_v25  ;;  %v1305_v3 = vmul.f32 %v1302_v13, %v4292_v6  ;;  %v1333_v60 = vmul.f32 %v1330_v40, %v4277_v52 }
 0x501   : > { %1649 = vrot.lane.b32.xlu0 %v1643_v37, %s3688_s18  ;;  %v1698_v37 = vmul.f32 %v1695_v12, %v4470_v5  ;;  %v1355_v5 = vsel %vm540_vm14, %v4312_v35, %v4421_v57  ;;  %v1332_v35 = vmul.f32 %v1329_v7, %v4277_v52 }
 0x503   : > { %1470 = vrot.lane.b32.xlu2 %v1466_v62, %s3670_s26 }
 0x507   : > { %1216 = vrot.lane.b32.xlu1 %v1208_v4, %s3663_s11 }
 0x509   : > { %1719 = vperm.xlu0 %3410, %v4034_v55   ;;  %v1447_v55 = vmul.f32 %v4383_v11, %v1177_v41  ;;  %v1361_v11 = vmul.f32 %v4421_v57, %v4433_v30  ;;  %v1277_v41 = vmul.f32 %v1274_v51, %v4272_v25 }
 0x50b   : > { %1489 = vrot.lane.b32.xlu2 %v1485_v26, %s3670_s26  ;;  %v1368_v62 = vperm.slane %v1361_v11, 0  ;;  %v1360_v26 = vmul.f32 %v1355_v5, %v4439_v1  ;;  %v1422_v57 = vperm.slane %v1361_v11, 2  ;;  %v1395_v54 = vperm.slane %v1361_v11, 1 }
 0x50d   : > { %v1371_v4 = vmul.f32 %v1368_v62, %v4318_v59  ;;  %v1394_v46 = vperm.slane %v1360_v26, 1  ;;  %v1367_v13 = vperm.slane %v1360_v26, 0  ;;  %v1398_v51 = vmul.f32 %v1395_v54, %v4363_v48 }
 0x50e   : > { %v1421_v62 = vperm.slane %v1360_v26, 2 }
 0x50f   : > { %1241 = vrot.lane.b32.xlu1 %v1234_v28, %s3663_s11  ;;  %v1306_v28 = vmul.f32 %v1303_v24, %v4292_v6  ;;  %v1397_v25 = vmul.f32 %v1394_v46, %v4363_v48  ;;  %v1512_v6 = vmul.f32 %v1507_v15, %v4495_v31  ;;  %v1370_v52 = vmul.f32 %v1367_v13, %v4318_v59  ;;  %s6019_s11 = smov 31  }
 0x510   : > { %v1424_v11 = vmul.f32 %v1421_v62, %v4328_v43  ;;  %v1518_v24 = vperm.slane %v4484_v53, 0  ;;  %v1668_v46 = vperm.slane %v4504_v19, 2  ;;  %v5899_v13 = vmov 23  }
 0x511   : > { %v1519_v22 = vperm.slane %v1512_v6, 0  ;;  %v1574_v40 = vperm.slane %v1512_v6, 2  ;;  %3411 = vset.pattern.permute.xlu2 %v5899_v13 }
 0x512   : > { %v1521_v26 = vmul.f32 %v1518_v24, %v4391_v44  ;;  %v1671_v7 = vmul.f32 %v1668_v46, %v4520_v10  ;;  %v4651_v24 = vld [vmem:[#allocation3] sm:$0xf] }
 0x513   : > { %1286 = vrot.lane.b32.xlu2 %v1278_v63, %s3679_s20  ;;  %v1109_v63 = vpop.permute.xlu2 %1108  ;;  %v1522_v49 = vmul.f32 %v1519_v22, %v4391_v44 }
 0x517   : > { %1451 = vrot.lane.b32.xlu1 %v1447_v55, %s3670_s26  ;;  %v1425_v55 = vmul.f32 %v1422_v57, %v4328_v43  ;;  %v1573_v57 = vperm.slane %v4484_v53, 2  ;;  %s6023_s26 = smov 80  }
 0x51b   : > { %1312 = vrot.lane.b32.xlu2 %v1305_v3, %s3679_s20 }
 0x51f   : > { %1705 = vrot.lane.b32.xlu1 %v1698_v37, %s3689_s30 }
 0x523   : > { %1341 = vrot.lane.b32.xlu2 %v1333_v60, %s3679_s20 }
 0x527   : > { %1284 = vrot.lane.b32.xlu1 %v1277_v41, %s3679_s20  ;;  %v1577_v41 = vmul.f32 %v1574_v40, %v4395_v18 }
 0x52b   : > { %1379 = vrot.lane.b32.xlu2 %v1371_v4, %s3673_s27  ;;  %v1612_v4 = vperm.slane %v4511_v47, 0 }
 0x52d   : > { %v1615_v48 = vmul.f32 %v1612_v4, %v4492_v20 }
 0x52f   : > { %1314 = vrot.lane.b32.xlu1 %v1306_v28, %s3679_s20 }
 0x533   : > { %1404 = vrot.lane.b32.xlu2 %v1397_v25, %s3673_s27  ;;  %v1547_v25 = vperm.slane %v1512_v6, 1  ;;  %v1576_v6 = vmul.f32 %v1573_v57, %v4395_v18  ;;  %v1667_v18 = vperm.slane %v4511_v47, 2  ;;  %v1724_v47 = vperm.slane %v4342_v0, 1 }
 0x535   : > { %v1550_v20 = vmul.f32 %v1547_v25, %v4347_v17  ;;  %v1641_v17 = vperm.slane %v4504_v19, 1  ;;  %v1670_v19 = vmul.f32 %v1667_v18, %v4520_v10 }
 0x537   : > { %1339 = vrot.lane.b32.xlu1 %v1332_v35, %s3679_s20  ;;  %v1644_v40 = vmul.f32 %v1641_v17, %v4407_v50  ;;  %s3579_s20 = scalar_lea.hbm %s5832_s10, 192 }
 0x53b   : > { %v4577_v3 = vpop.permute.xlu0 %1189  ;;  %1433 = vrot.lane.b32.xlu2 %v1425_v55, %s3673_s27 }
 0x53d   : > { %v4580_v12 = vpop.permute.xlu2 %1707 }
 0x53e   : > { %5952 = vst [vmem:[#allocation27_spill] sm:$0xff] %v4580_v12 }
 0x53f   : > { %1377 = vrot.lane.b32.xlu1 %v1370_v52, %s3673_s27 }
 0x543   : > { %v4585_v37 = vpop.permute.xlu0 %1214  ;;  %1529 = vrot.lane.b32.xlu2 %v1522_v49, %s3682_s25 }
 0x545   : > { %v4588_v60 = vpop.permute.xlu2 %1187 }
 0x547   : > { %1406 = vrot.lane.b32.xlu1 %v1398_v51, %s3673_s27 }
 0x54b   : > { %v4593_v59 = vpop.permute.xlu0 %1472  ;;  %1584 = vrot.lane.b32.xlu2 %v1577_v41, %s3682_s25 }
 0x54d   : > { %v4597_v5 = vpop.permute.xlu2 %1243 }
 0x54f   : > { %1431 = vrot.lane.b32.xlu1 %v1424_v11, %s3673_s27  ;;  %s3694_s27 = smov 60  }
 0x553   : > { %v4603_v28 = vpop.permute.xlu0 %1491  ;;  %1621 = vrot.lane.b32.xlu2 %v1615_v48, %s3688_s18 }
 0x555   : > { %v4609_v43 = vpop.permute.xlu2 %1453 }
 0x557   : > { %1527 = vrot.lane.b32.xlu1 %v1521_v26, %s3682_s25 }
 0x55b   : > { %v4612_v35 = vpop.permute.xlu0 %1703  ;;  %1678 = vrot.lane.b32.xlu2 %v1671_v7, %s3688_s18 }
 0x55d   : > { %v4620_v15 = vpop.permute.xlu2 %1470 }
 0x55f   : > { %1557 = vrot.lane.b32.xlu1 %v1550_v20, %s3682_s25 }
 0x561   : > { %v4618_v44 = vpop.permute.xlu1 %1625 }
 0x562   : > { %5953 = vst [vmem:[#allocation28_spill] sm:$0xff] %v4618_v44 }
 0x563   : > { %v4622_v55 = vpop.permute.xlu0 %1555 }
 0x565   : > { %v4633_v54 = vpop.permute.xlu2 %1489 }
 0x567   : > { %1582 = vrot.lane.b32.xlu1 %v1576_v6, %s3682_s25 }
 0x569   : > { %v1107_v22 = vpop.permute.xlu1 %1106 }
 0x56a   : > { %v1110_v52 = vsel %vm833_vm6, %v4379_v29, %v1107_v22  ;;  %v1111_v53 = vsel %vm833_vm6, %v1107_v22, %v1109_v63  ;;  %v1723_v29 = vperm.slane %v4495_v31, 1  ;;  %v1722_v63 = vperm.slane %v4474_v16, 1 }
 0x56b   : > { %1114 = vst [vmem:[#allocation2 + $0x28] sm:$0x30] %v1110_v52  ;;  %v4631_v49 = vpop.permute.xlu0 %1623 }
 0x56c   : > { %1115 = vst [vmem:[#allocation2 + $0x30] sm:$0x30] %v1111_v53 }
 0x56d   : > { %v4641_v41 = vpop.permute.xlu2 %1286 }
 0x56f   : > { %1651 = vrot.lane.b32.xlu1 %v1644_v40, %s3688_s18 }
 0x571   : > { %v4661_v25 = vpop.permute.xlu1 %1680 }
 0x572   : > { %5955 = vst [vmem:[#allocation30_spill] sm:$0xff] %v4661_v25 }
 0x573   : > { %v4638_v51 = vpop.permute.xlu0 %1649 }
 0x575   : > { %v4648_v50 = vpop.permute.xlu2 %1312 }
 0x577   : > { %1676 = vrot.lane.b32.xlu1 %v1670_v19, %s3688_s18  ;;  %s5977_s18 = smov 111  }
 0x579   : > { %v4665_v20 = vpop.permute.xlu1 %1216 }
 0x57b   : > { %v1720_v62 = vpop.permute.xlu0 %1719 }
 0x57c   : > { %v1726_v11 = vmul.f32 %v1723_v29, %v1720_v62  ;;  %v1725_v4 = vmul.f32 %v1722_v63, %v1720_v62  ;;  %v1727_v10 = vmul.f32 %v1724_v47, %v1720_v62  ;;  %v5900_v29 = vmov 24  }
 0x57d   : > { %v4655_v48 = vpop.permute.xlu2 %1341  ;;  %v1751_v63 = vperm.slane %v4342_v0, 2  ;;  %v1750_v62 = vperm.slane %v4495_v31, 2 }
 0x57e   : > { %1733 = vrot.lane.b32.xlu2 %v1726_v11, %s3689_s30  ;;  %v1749_v11 = vperm.slane %v4474_v16, 2 }
 0x57f   : > { %1731 = vrot.lane.b32.xlu1 %v1725_v4, %s3689_s30 }
 0x581   : > { %v4669_v6 = vpop.permute.xlu1 %1241 }
 0x585   : > { %v4657_v26 = vpop.permute.xlu2 %1379 }
 0x586   : > { %1746 = vperm.xlu2 %3411, %v4651_v24   ;;  %5954 = vst [vmem:[#allocation29_spill] sm:$0xff] %v4657_v26 }
 0x587   : > { %1735 = vrot.lane.b32.xlu1 %v1727_v10, %s3689_s30 }
 0x589   : > { %v4673_v17 = vpop.permute.xlu1 %1451 }
 0x58d   : > { %v4659_v46 = vpop.permute.xlu2 %1404 }
 0x58e   : > { %3412 = vset.pattern.permute.xlu2 %v5900_v29 }
 0x591   : > { %v4677_v53 = vpop.permute.xlu1 %1705 }
 0x592   : > { %5957 = vst [vmem:[#allocation32_spill] sm:$0xff] %v4677_v53 }
 0x595   : > { %v4663_v7 = vpop.permute.xlu2 %1433 }
 0x599   : > { %v4681_v18 = vpop.permute.xlu1 %1284 }
 0x59d   : > { %v4667_v57 = vpop.permute.xlu2 %1529 }
 0x5a1   : > { %v4689_v4 = vpop.permute.xlu1 %1314 }
 0x5a2   : > { %5960 = vst [vmem:[#allocation35_spill] sm:$0xff] %v4689_v4 }
 0x5a5   : > { %v4671_v22 = vpop.permute.xlu2 %1584 }
 0x5a6   : > { %5956 = vst [vmem:[#allocation31_spill] sm:$0xff] %v4671_v22 }
 0x5a9   : > { %v4694_v25 = vpop.permute.xlu1 %1339 }
 0x5ad   : > { %v4675_v52 = vpop.permute.xlu2 %1621 }
 0x5b1   : > { %v4701_v29 = vpop.permute.xlu1 %1377 }
 0x5b5   : > { %v4679_v40 = vpop.permute.xlu2 %1678 }
 0x5b6   : > { %5958 = vst [vmem:[#allocation33_spill] sm:$0xff] %v4679_v40 }
 0x5d8   : > { %v4683_v19 = vpop.permute.xlu2 %1733 }
 0x5d9   : > { %5959 = vst [vmem:[#allocation34_spill] sm:$0xff] %v4683_v19 }
 0x5e0   : > { %v1747_v47 = vpop.permute.xlu2 %1746 }
 0x5e1   : > { %v1753_v10 = vmul.f32 %v1750_v62, %v1747_v47  ;;  %v1754_v13 = vmul.f32 %v1751_v63, %v1747_v47  ;;  %v1752_v12 = vmul.f32 %v1749_v11, %v1747_v47  ;;  %v4703_v63 = vpop.permute.xlu1 %1406 }
 0x5e3   : > { %1762 = vrot.lane.b32.xlu2 %v1754_v13, %s3689_s30  ;;  %1758 = vrot.lane.b32.xlu0 %v1752_v12, %s3689_s30  ;;  %v5961_v13 = vld [vmem:[#allocation14_spill] sm:$0xff]  ;;  %v5962_v12 = vld [vmem:[#allocation16_spill] sm:$0xff] }
 0x5e4   : > { %1760 = vrot.lane.b32.xlu1 %v1753_v10, %s3689_s30  ;;  %v1128_v11 = vsel %vm860_vm13, %v5962_v12, %v5961_v13  ;;  %v1192_v13 = vsel %vm540_vm14, %v4588_v60, %v4577_v3  ;;  %s5987_s30 = smov 114  }
 0x5e5   : > { %v1133_v47 = vmul.f32 %v1128_v11, %v4439_v1  ;;  %v1219_v1 = vsel %vm540_vm14, %v4585_v37, %v4665_v20 }
 0x5e7   : > { %v1141_v44 = vperm.slane %v1133_v47, 0  ;;  %v1151_v32 = vperm.slane %v1133_v47, 1 }
 0x5e9   : > { %v4705_v62 = vpop.permute.xlu1 %1431  ;;  %v1144_v27 = vmul.f32 %v1141_v44, %v5963_v45 }
 0x5eb   : > { %1772 = vrot.lane.b32.xlu0 %v4261_v21, %s3668_s29  ;;  %1784 = vperm.xlu2 %3412, %v4651_v24   ;;  %v1164_v21 = vperm.slane %v1133_v47, 2 }
 0x5ec   : > { %1774 = vrot.lane.b32.xlu1 %v4248_v14, %s3668_s29  ;;  %v1154_v14 = vmul.f32 %v1151_v32, %v4264_v23  ;;  %v1246_v32 = vsel %vm540_vm14, %v4669_v6, %v4597_v5 }
 0x5ed   : > { %v1167_v8 = vmul.f32 %v1164_v21, %v5964_v9 }
 0x5ee   : > { %v1157_v30 = vadd.f32 %v1154_v14, %v1144_v27  ;;  %v1290_v27 = vsel %vm1288_vm5, %v4681_v18, %v4641_v41 }
 0x5f0   : > { %v1170_v39 = vadd.f32 %v1167_v8, %v1157_v30  ;;  %v1317_v8 = vsel %vm1288_vm5, %v4648_v50, %v4689_v4 }
 0x5f1   : > { %v4711_v10 = vpop.permute.xlu1 %1527 }
 0x5f2   : > { %v1197_v11 = vadd.f32 %v1192_v13, %v1170_v39  ;;  %v1344_v39 = vsel %vm1288_vm5, %v4694_v25, %v4655_v48  ;;  %v1382_v13 = vsel %vm784_vm9, %v4701_v29, %v4657_v26 }
 0x5f4   : > { %v1224_v44 = vadd.f32 %v1219_v1, %v1197_v11  ;;  %v1409_v11 = vsel %vm784_vm9, %v4659_v46, %v4703_v63 }
 0x5f6   : > { %v1251_v14 = vadd.f32 %v1246_v32, %v1224_v44 }
 0x5f8   : > { %v1295_v21 = vadd.f32 %v1290_v27, %v1251_v14  ;;  %v1436_v27 = vsel %vm784_vm9, %v4705_v62, %v4663_v7 }
 0x5f9   : > { %v4715_v58 = vpop.permute.xlu1 %1557 }
 0x5fa   : > { %v1322_v30 = vadd.f32 %v1317_v8, %v1295_v21  ;;  %v1455_v8 = vsel %vm860_vm13, %v4673_v17, %v4609_v43 }
 0x5fc   : > { %v1349_v1 = vadd.f32 %v1344_v39, %v1322_v30  ;;  %v1474_v39 = vsel %vm860_vm13, %v4620_v15, %v4593_v59 }
 0x5fe   : > { %v1387_v32 = vadd.f32 %v1382_v13, %v1349_v1  ;;  %v1493_v13 = vsel %vm860_vm13, %v4633_v54, %v4603_v28  ;;  %vm6029_vm13 = vcmask 252928  }
 0x600   : > { %v1414_v14 = vadd.f32 %v1409_v11, %v1387_v32  ;;  %v1534_v11 = vsel %vm1533_vm8, %v4711_v10, %v4667_v57 }
 0x601   : > { %v4727_v47 = vpop.permute.xlu1 %1582 }
 0x602   : > { %v1441_v4 = vadd.f32 %v1436_v27, %v1414_v14  ;;  %v1588_v14 = vsel %vm1533_vm8, %v4727_v47, %v4671_v22 }
 0x604   : > { %v1460_v21 = vadd.f32 %v1455_v8, %v1441_v4  ;;  %v1561_v4 = vsel %vm1533_vm8, %v4622_v55, %v4715_v58 }
 0x606   : > { %v1479_v30 = vadd.f32 %v1474_v39, %v1460_v21  ;;  %v5911_v21 = vmov 25  }
 0x607   : > { %3413 = vset.pattern.permute.xlu0 %v5911_v21 }
 0x608   : > { %v1498_v1 = vadd.f32 %v1493_v13, %v1479_v30  ;;  %v1628_v30 = vsel %vm1627_vm12, %v4675_v52, %v4631_v49 }
 0x609   : > { %v4744_v44 = vpop.permute.xlu1 %1651 }
 0x60a   : > { %5965 = vst [vmem:[#allocation16_spill] sm:$0xff] %v4744_v44  ;;  %v1540_v32 = vadd.f32 %v1534_v11, %v1498_v1  ;;  %v1655_v13 = vsel %vm1627_vm12, %v4638_v51, %v4744_v44 }
 0x60c   : > { %v1567_v8 = vadd.f32 %v1561_v4, %v1540_v32 }
 0x60e   : > { %v1594_v39 = vadd.f32 %v1588_v14, %v1567_v8  ;;  %v1710_v14 = vsel %vm1709_vm15, %v4612_v35, %v4677_v53 }
 0x610   : > { %v1634_v1 = vadd.f32 %v1628_v30, %v1594_v39 }
 0x611   : > { %v4752_v26 = vpop.permute.xlu1 %1676 }
 0x612   : > { %v1682_v11 = vsel %vm1627_vm12, %v4752_v26, %v4679_v40  ;;  %v1661_v22 = vadd.f32 %v1655_v13, %v1634_v1 }
 0x614   : > { %v1688_v32 = vadd.f32 %v1682_v11, %v1661_v22 }
 0x616   : > { %v1716_v21 = vadd.f32 %v1710_v14, %v1688_v32 }
 0x619   : > { %v4766_v27 = vpop.permute.xlu1 %1731 }
 0x61a   : > { %v1737_v8 = vsel %vm1709_vm15, %v4766_v27, %v4683_v19 }
 0x61b   : > { %v1743_v39 = vadd.f32 %v1737_v8, %v1716_v21 }
 0x621   : > { %v4781_v4 = vpop.permute.xlu1 %1735 }
 0x622   : > { %5966 = vst [vmem:[#allocation15_spill] sm:$0xff] %v4781_v4 }
 0x63d   : > { %v4793_v40 = vpop.permute.xlu2 %1762 }
 0x63e   : > { %5968 = vst [vmem:[#allocation36_spill] sm:$0xff] %v4793_v40 }
 0x645   : > { %v1785_v8 = vpop.permute.xlu2 %1784 }
 0x655   : > { %v4789_v44 = vpop.permute.xlu0 %1758 }
 0x656   : > { %v4791_v30 = vpop.permute.xlu1 %1760 }
 0x657   : > { %5967 = vst [vmem:[#allocation17_spill] sm:$0xff] %v4791_v30  ;;  %v1764_v22 = vsel %vm1709_vm15, %v4789_v44, %v4791_v30 }
 0x658   : > { %v4798_v13 = vadd.f32 %v1764_v22, %v1743_v39 }
 0x65d   : > { %v4800_v1 = vpop.permute.xlu0 %1772 }
 0x65e   : > { %5969 = vst [vmem:[#allocation37_spill] sm:$0xff] %v4800_v1  ;;  %v4804_v11 = vmul.f32 %v4800_v1, %v4474_v16  ;;  %v4806_v32 = vpop.permute.xlu1 %1774 }
 0x65f   : > { %5970 = vst [vmem:[#allocation38_spill] sm:$0xff] %v4806_v32  ;;  %v4811_v21 = vsel %vm5971_vm2, %v4800_v1, %v4806_v32  ;;  %v4815_v14 = vmul.f32 %v4806_v32, %v4342_v0  ;;  %v3492_v0 = vld [vmem:[#allocation2 + $0x40] sm:$0x7] }
 0x660   : > { %5972 = vst [vmem:[#allocation39_spill] sm:$0xff] %v4811_v21  ;;  %v4819_v39 = vmul.f32 %v4811_v21, %v4495_v31  ;;  %v1787_v22 = vperm.slane %v4804_v11, 0  ;;  %v1132_v31 = vmul.f32 %v3492_v0, %v5962_v12  ;;  %v1218_v12 = vsel %vm540_vm14, %v4253_v33, %v4585_v37 }
 0x661   : > { %v1789_v16 = vperm.slane %v4815_v14, 0  ;;  %v1245_v0 = vsel %vm540_vm14, %v4266_v56, %v4669_v6  ;;  %v1381_v56 = vsel %vm784_vm9, %v4361_v34, %v4701_v29 }
 0x662   : > { %v1788_v30 = vperm.slane %v4819_v39, 0  ;;  %v1790_v40 = vmul.f32 %v1787_v22, %v1785_v8  ;;  %v1150_v1 = vperm.slane %v1132_v31, 1  ;;  %v1140_v21 = vperm.slane %v1132_v31, 0 }
 0x663   : > { %v1792_v19 = vmul.f32 %v1789_v16, %v1785_v8  ;;  %v1163_v32 = vperm.slane %v1132_v31, 2 }
 0x664   : > { %v1791_v4 = vmul.f32 %v1788_v30, %v1785_v8  ;;  %1796 = vrot.lane.b32.xlu0 %v1790_v40, %s3694_s27  ;;  %v1153_v22 = vmul.f32 %v1150_v1, %v4264_v23  ;;  %v1143_v30 = vmul.f32 %v1140_v21, %v5963_v45 }
 0x665   : > { %1800 = vrot.lane.b32.xlu2 %v1792_v19, %s3694_s27  ;;  %v1166_v40 = vmul.f32 %v1163_v32, %v5964_v9  ;;  %v5973_v19 = vld [vmem:[#allocation18_spill] sm:$0xff]  ;;  %v1289_v32 = vsel %vm1288_vm5, %v4286_v61, %v4681_v18  ;;  %v1408_v61 = vsel %vm784_vm9, %v4423_v42, %v4659_v46 }
 0x666   : > { %1798 = vrot.lane.b32.xlu1 %v1791_v4, %s3694_s27  ;;  %v1156_v8 = vadd.f32 %v1153_v22, %v1143_v30  ;;  %v1191_v4 = vsel %vm540_vm14, %v5973_v19, %v4588_v60  ;;  %v1316_v60 = vsel %vm1288_vm5, %v4419_v2, %v4648_v50  ;;  %v1343_v22 = vsel %vm1288_vm5, %v4306_v36, %v4694_v25 }
 0x667   : > { %vm1802_vm14 = vcmask 490496  }
 0x668   : > { %v1169_v16 = vadd.f32 %v1166_v40, %v1156_v8  ;;  %v5920_v40 = vmov 26  }
 0x669   : > { %3414 = vset.pattern.permute.xlu2 %v5920_v40 }
 0x66a   : > { %v1196_v53 = vadd.f32 %v1191_v4, %v1169_v16 }
 0x66c   : > { %1812 = vperm.xlu0 %3413, %v4651_v24   ;;  %v1223_v1 = vadd.f32 %v1218_v12, %v1196_v53  ;;  %v5974_v53 = vld [vmem:[#allocation21_spill] sm:$0xff] }
 0x66d   : > { %v1435_v18 = vsel %vm784_vm9, %v5974_v53, %v4705_v62  ;;  %v5981_v53 = vmov 4   ;;  %vm6027_vm9 = vmmov %vm5971_vm2 }
 0x66e   : > { %v1250_v21 = vadd.f32 %v1245_v0, %v1223_v1  ;;  %v1842_v1 = vperm.slane %v4804_v11, 2 }
 0x670   : > { %v1294_v31 = vadd.f32 %v1289_v32, %v1250_v21  ;;  %v1843_v32 = vperm.slane %v4819_v39, 2  ;;  %v1844_v21 = vperm.slane %v4815_v14, 2 }
 0x672   : > { %v1321_v33 = vadd.f32 %v1316_v60, %v1294_v31 }
 0x674   : > { %3415 = vset.pattern.permute.xlu0 %v5945_v38  ;;  %v1348_v37 = vadd.f32 %v1343_v22, %v1321_v33 }
 0x676   : > { %v1386_v6 = vadd.f32 %v1381_v56, %v1348_v37 }
 0x678   : > { %v1413_v2 = vadd.f32 %v1408_v61, %v1386_v6  ;;  %v5979_v6 = vmov 3   ;;  %v5980_v61 = vmov 2  }
 0x67a   : > { %v1440_v50 = vadd.f32 %v1435_v18, %v1413_v2  ;;  %v5982_v18 = vmov 5   ;;  %v5983_v2 = vld [vmem:[#allocation23_spill] sm:$0xff] }
 0x67c   : > { %v1459_v30 = vadd.f32 %v4673_v17, %v1440_v50  ;;  %v5984_v50 = vld [vmem:[#allocation14_spill] sm:$0xff] }
 0x67e   : > { %v1478_v36 = vadd.f32 %v4620_v15, %v1459_v30  ;;  %v1134_v30 = vmul.f32 %v5984_v50, %v5983_v2  ;;  %v5999_v50 = vld [vmem:[#allocation28_spill] sm:$0xff] }
 0x680   : > { %v1497_v25 = vadd.f32 %v4633_v54, %v1478_v36  ;;  %v5985_v36 = vmov 7  }
 0x682   : > { %v1539_v34 = vadd.f32 %v4711_v10, %v1497_v25  ;;  %v5986_v25 = vmov 6  }
 0x684   : > { %v1566_v29 = vadd.f32 %v4622_v55, %v1539_v34  ;;  %v1142_v34 = vperm.slane %v1134_v30, 0 }
 0x686   : > { %v1593_v42 = vadd.f32 %v4727_v47, %v1566_v29  ;;  %v1152_v29 = vperm.slane %v1134_v30, 1 }
 0x688   : > { %v1633_v46 = vadd.f32 %v4675_v52, %v1593_v42  ;;  %v5988_v42 = vld [vmem:[#allocation20_spill] sm:$0xff] }
 0x68a   : > { %v1660_v62 = vadd.f32 %v4638_v51, %v1633_v46  ;;  %v1815_v51 = vperm.slane %v4804_v11, 1  ;;  %v1865_v11 = vld [vmem:[%s5827_s5] sm:$0xf]  ;;  %v5989_v46 = vmov 8  }
 0x68c   : > { %v1687_v8 = vadd.f32 %v4752_v26, %v1660_v62  ;;  %v1145_v62 = vmul.f32 %v1142_v34, %v5963_v45 }
 0x68e   : > { %v1715_v17 = vadd.f32 %v4612_v35, %v1687_v8  ;;  %v1816_v35 = vperm.slane %v4819_v39, 1  ;;  %v5978_v39 = vld [vmem:[#allocation13_spill] sm:$0xff]  ;;  %v1155_v8 = vmul.f32 %v1152_v29, %v4264_v23 }
 0x68f   : > { %v1894_v37 = vperm.slane %v5978_v39, 2 }
 0x690   : > { %v1742_v15 = vadd.f32 %v4766_v27, %v1715_v17  ;;  %v1165_v17 = vperm.slane %v1134_v30, 2  ;;  %v6001_v30 = vld [vmem:[#allocation16_spill] sm:$0xff] }
 0x692   : > { %v1769_v54 = vadd.f32 %v4789_v44, %v1742_v15  ;;  %v1817_v44 = vperm.slane %v4815_v14, 1  ;;  %v4907_v14 = vld [vmem:[%s5828_s6] sm:$0xff]  ;;  %v5990_v15 = vmov 10  }
 0x6bf   : > { %v4890_v12 = vpop.permute.xlu2 %1800 }
 0x6d6   : > { %v1797_v10 = vpop.permute.xlu0 %1796 }
 0x6d7   : > { %v4873_v55 = vadd.f32 %v1797_v10, %v1769_v54  ;;  %v5991_v54 = vld [vmem:[#allocation19_spill] sm:$0xff] }
 0x6d8   : > { %v4875_v19 = vpop.permute.xlu1 %1798 }
 0x6d9   : > { %v1803_v47 = vsel %vm1802_vm14, %v1797_v10, %v4875_v19  ;;  %v1158_v10 = vadd.f32 %v1155_v8, %v1145_v62 }
 0x6da   : > { %v4880_v52 = vadd.f32 %v1803_v47, %v4798_v13  ;;  %v5975_v13 = vmov 1   ;;  %v5992_v47 = vmov 9  }
 0x6de   : > { %v1813_v26 = vpop.permute.xlu0 %1812 }
 0x6df   : > { %v1818_v27 = vmul.f32 %v1815_v51, %v1813_v26  ;;  %v1819_v4 = vmul.f32 %v1816_v35, %v1813_v26  ;;  %v1820_v16 = vmul.f32 %v1817_v44, %v1813_v26  ;;  %v1168_v51 = vmul.f32 %v1165_v17, %v5964_v9 }
 0x6e1   : > { %1826 = vrot.lane.b32.xlu2 %v1819_v4, %s3694_s27  ;;  %1824 = vrot.lane.b32.xlu1 %v1818_v27, %s3694_s27  ;;  %v1171_v35 = vadd.f32 %v1168_v51, %v1158_v10  ;;  %v5993_v4 = vld [vmem:[#allocation35_spill] sm:$0xff]  ;;  %v6005_v10 = vld [vmem:[#allocation32_spill] sm:$0xff] }
 0x6e3   : > { %v1198_v26 = vadd.f32 %v4577_v3, %v1171_v35  ;;  %v6006_v35 = vld [vmem:[#allocation15_spill] sm:$0xff] }
 0x6e5   : > { %v1225_v45 = vadd.f32 %v4665_v20, %v1198_v26  ;;  %v6007_v26 = vld [vmem:[#allocation34_spill] sm:$0xff] }
 0x6e7   : > { %v1252_v23 = vadd.f32 %v4597_v5, %v1225_v45 }
 0x6e9   : > { %1839 = vperm.xlu2 %3414, %v4651_v24   ;;  %1828 = vrot.lane.b32.xlu1 %v1820_v16, %s3694_s27  ;;  %v5976_v24 = vld [vmem:[#allocation12_spill] sm:$0xff]  ;;  %v1296_v27 = vadd.f32 %v4641_v41, %v1252_v23  ;;  %v5996_v41 = vld [vmem:[#allocation22_spill] sm:$0xff] }
 0x6ea   : > { %v1893_v56 = vperm.slane %v5976_v24, 2  ;;  %v6008_v23 = vld [vmem:[#allocation36_spill] sm:$0xff] }
 0x6eb   : > { %v1323_v44 = vadd.f32 %v5993_v4, %v1296_v27  ;;  %v6009_v27 = vld [vmem:[#allocation17_spill] sm:$0xff] }
 0x6ec   : > { %v1765_v4 = vsel %vm1709_vm15, %v6009_v27, %v6008_v23 }
 0x6ed   : > { %v1350_v16 = vadd.f32 %v4655_v48, %v1323_v44  ;;  %v1562_v48 = vsel %vm1533_vm8, %v4715_v58, %v5996_v41  ;;  %v6003_v58 = vld [vmem:[#allocation33_spill] sm:$0xff] }
 0x6f1   : > { %3417 = vset.pattern.permute.xlu2 %v5975_v13 }
 0x73b   : > { %v4892_v0 = vpop.permute.xlu2 %1826 }
 0x743   : > { %v1840_v31 = vpop.permute.xlu2 %1839 }
 0x744   : > { %v1845_v60 = vmul.f32 %v1842_v1, %v1840_v31  ;;  %v1846_v22 = vmul.f32 %v1843_v32, %v1840_v31  ;;  %v1847_v33 = vmul.f32 %v1844_v21, %v1840_v31  ;;  %v5994_v1 = vld [vmem:[#allocation29_spill] sm:$0xff] }
 0x745   : > { %v1388_v32 = vadd.f32 %v5994_v1, %v1350_v16 }
 0x746   : > { %1855 = vrot.lane.b32.xlu2 %v1847_v33, %s3694_s27  ;;  %1851 = vrot.lane.b32.xlu0 %v1845_v60, %s3694_s27  ;;  %v5995_v60 = vld [vmem:[#allocation25_spill] sm:$0xff] }
 0x747   : > { %1853 = vrot.lane.b32.xlu1 %v1846_v22, %s3694_s27  ;;  %v1415_v21 = vadd.f32 %v4703_v63, %v1388_v32  ;;  %v1535_v5 = vsel %vm1533_vm8, %v4667_v57, %v5995_v60  ;;  %v5998_v63 = vld [vmem:[#allocation31_spill] sm:$0xff]  ;;  %v1804_v32 = vsel %vm1802_vm14, %v4875_v19, %v4890_v12  ;;  %s6010_s27 = smov 125  }
 0x749   : > { %v1442_v9 = vadd.f32 %v4663_v7, %v1415_v21 }
 0x74b   : > { %v1461_v3 = vadd.f32 %v4609_v43, %v1442_v9 }
 0x74d   : > { %v1480_v20 = vadd.f32 %v4593_v59, %v1461_v3  ;;  %v1629_v59 = vsel %vm1627_vm12, %v4631_v49, %v5999_v50  ;;  %v1738_v49 = vsel %vm1709_vm15, %v6007_v26, %v6006_v35  ;;  %v5008_v50 = vld [vmem:[#allocation2] sm:$0xff] }
 0x74e   : > { %1868 = vperm.xlu0 %3415, %v1865_v11   ;;  %1897 = vrot.lane.b32.xlu2 %v1893_v56, %s5977_s18  ;;  %v5997_v11 = vld [vmem:[#allocation26_spill] sm:$0xff] }
 0x74f   : > { %1910 = vperm.xlu1 %3416, %v4907_v14   ;;  %v1499_v31 = vadd.f32 %v4603_v28, %v1480_v20  ;;  %v1589_v7 = vsel %vm1533_vm8, %v5998_v63, %v5997_v11  ;;  %v6000_v28 = vld [vmem:[#allocation24_spill] sm:$0xff] }
 0x750   : > { %v1656_v57 = vsel %vm1627_vm12, %v6001_v30, %v6000_v28 }
 0x751   : > { %v1541_v22 = vadd.f32 %v1535_v5, %v1499_v31 }
 0x753   : > { %v1568_v33 = vadd.f32 %v1562_v48, %v1541_v22  ;;  %v1825_v43 = vpop.permute.xlu1 %1824 }
 0x754   : > { %v1830_v44 = vsel %vm1802_vm14, %v1825_v43, %v4892_v0  ;;  %v1835_v1 = vadd.f32 %v1825_v43, %v4873_v55 }
 0x755   : > { %v1595_v2 = vadd.f32 %v1589_v7, %v1568_v33  ;;  %v1836_v3 = vadd.f32 %v1830_v44, %v4880_v52  ;;  %v6016_v44 = vmov 12  }
 0x756   : > { %1899 = vrot.lane.b32.xlu0 %v1894_v37, %s5977_s18  ;;  %1920 = vperm.xlu2 %3417, %v4907_v14  }
 0x757   : > { %3419 = vset.pattern.permute.xlu1 %v5979_v6  ;;  %3418 = vset.pattern.permute.xlu0 %v5980_v61  ;;  %v1635_v34 = vadd.f32 %v1629_v59, %v1595_v2 }
 0x758   : > { %1946 = vperm.xlu1 %3419, %v4907_v14  }
 0x759   : > { %v1662_v29 = vadd.f32 %v1656_v57, %v1635_v34  ;;  %v6011_v34 = vmov 11  }
 0x75b   : > { %v1829_v17 = vpop.permute.xlu1 %1828 }
 0x75c   : > { %v1831_v60 = vsel %vm1802_vm14, %v4892_v0, %v1829_v17 }
 0x75e   : > { %1933 = vperm.xlu0 %3418, %v4907_v14   ;;  %3420 = vset.pattern.permute.xlu2 %v5981_v53 }
 0x75f   : > { %1959 = vperm.xlu2 %3420, %v4907_v14  }
 0x760   : > { %3421 = vset.pattern.permute.xlu1 %v5982_v18 }
 0x761   : > { %1972 = vperm.xlu1 %3421, %v4907_v14  }
 0x766   : > { %3423 = vset.pattern.permute.xlu0 %v5985_v36 }
 0x767   : > { %1998 = vperm.xlu0 %3423, %v4907_v14   ;;  %3422 = vset.pattern.permute.xlu2 %v5986_v25 }
 0x768   : > { %1985 = vperm.xlu2 %3422, %v4907_v14  }
 0x769   : > { %2010 = vrot.lane.b32.xlu1 %v5988_v42, %s5987_s30  ;;  %v6002_v42 = vld [vmem:[#allocation30_spill] sm:$0xff] }
 0x76a   : > { %3424 = vset.pattern.permute.xlu1 %v5989_v46  ;;  %v1683_v62 = vsel %vm1627_vm12, %v6003_v58, %v6002_v42  ;;  %v6013_v42 = vmov 15   ;;  %v6014_v58 = vmov 16  }
 0x76b   : > { %v1689_v8 = vadd.f32 %v1683_v62, %v1662_v29  ;;  %v6012_v29 = vmov 13  }
 0x76f   : > { %3426 = vset.pattern.permute.xlu0 %v5990_v15 }
 0x770   : > { %2012 = vrot.lane.b32.xlu2 %v5991_v54, %s5987_s30  ;;  %v6004_v54 = vld [vmem:[#allocation27_spill] sm:$0xff]  ;;  %s3141_s30 = sshll.u32 %s4442_s28, 4  ;;  %s3142_s30 = int_to_ptr.vmem [resolvable:$true] %s3141_s30 }
 0x771   : > { %2022 = vperm.xlu1 %3424, %v4907_v14   ;;  %3425 = vset.pattern.permute.xlu2 %v5992_v47  ;;  %v1711_v51 = vsel %vm1709_vm15, %v6005_v10, %v6004_v54 }
 0x772   : > { %v1717_v45 = vadd.f32 %v1711_v51, %v1689_v8  ;;  %v6015_v8 = vmov 18  }
 0x774   : > { %v1744_v16 = vadd.f32 %v1738_v49, %v1717_v45 }
 0x776   : > { %v1771_v9 = vadd.f32 %v1765_v4, %v1744_v16 }
 0x778   : > { %v1810_v41 = vadd.f32 %v1804_v32, %v1771_v9 }
 0x779   : > { %3450 = vset.pattern.permute.xlu1 %v5945_v38 }
 0x77a   : > { %v1837_v33 = vadd.f32 %v1831_v60, %v1810_v41  ;;  %v6020_v60 = vmov 19  }
 0x7a0   : > { %v1856_v48 = vpop.permute.xlu2 %1855 }
 0x7a8   : > { %v5027_v62 = vpop.permute.xlu2 %1897 }
 0x7b0   : > { %v5031_v17 = vpop.permute.xlu2 %1920 }
 0x7b8   : > { %v1852_v21 = vpop.permute.xlu0 %1851 }
 0x7b9   : > { %v1862_v20 = vadd.f32 %v1852_v21, %v1835_v1  ;;  %v1854_v31 = vpop.permute.xlu1 %1853  ;;  %v5033_v54 = vpop.permute.xlu2 %1959 }
 0x7ba   : > { %v1857_v5 = vsel %vm1802_vm14, %v1852_v21, %v1854_v31  ;;  %v1858_v55 = vsel %vm1802_vm14, %v1854_v31, %v1856_v48  ;;  %v6017_v21 = vmov 14   ;;  %v6018_v31 = vmov 17  }
 0x7bb   : > { %v1863_v22 = vadd.f32 %v1857_v5, %v1836_v3  ;;  %v1864_v11 = vadd.f32 %v1858_v55, %v1837_v33  ;;  %v6021_v5 = vmov 21   ;;  %v6022_v48 = vmov 23  }
 0x7c0   : > { %v1869_v63 = vpop.permute.xlu0 %1868 }
 0x7c1   : > { %v4994_v19 = vadd.f32 %v1869_v63, %v1862_v20  ;;  %v4996_v12 = vadd.f32 %v1869_v63, %v1863_v22  ;;  %v4998_v52 = vadd.f32 %v1869_v63, %v1864_v11  ;;  %v5000_v7 = vpop.permute.xlu1 %1910 }
 0x7c2   : > { %v5035_v10 = vpop.permute.xlu2 %1985 }
 0x7c8   : > { %v5075_v41 = vpop.permute.xlu0 %1899 }
 0x7ca   : > { %v5002_v2 = vpop.permute.xlu1 %1946  ;;  %v5037_v51 = vpop.permute.xlu2 %2012 }
 0x7d0   : > { %v5078_v22 = vpop.permute.xlu0 %1933 }
 0x7d3   : > { %v5004_v0 = vpop.permute.xlu1 %1972 }
 0x7d9   : > { %v5080_v55 = vpop.permute.xlu0 %1998 }
 0x7db   : > { %v5006_v43 = vpop.permute.xlu1 %2010 }
 0x7dc   : > { %v5012_v59 = vmul.f32 %v5008_v50, %v5006_v43 }
 0x7de   : > { %v2025_v28 = vperm.slane %v5012_v59, 0  ;;  %v2052_v26 = vperm.slane %v5012_v59, 1  ;;  %v2106_v27 = vperm.slane %v5012_v59, 3  ;;  %v2160_v1 = vperm.slane %v5012_v59, 5 }
 0x7df   : > { %v2214_v3 = vperm.slane %v5012_v59, 7 }
 0x7e3   : > { %v5015_v30 = vpop.permute.xlu1 %2022 }
 0x7e4   : > { %v2028_v57 = vmul.f32 %v2025_v28, %v5015_v30  ;;  %v2133_v28 = vperm.slane %v5012_v59, 4 }
 0x7e6   : > { %2034 = vrot.lane.b32.xlu2 %v2028_v57, %s6010_s27 }
 0x7ee   : > { %2049 = vperm.xlu2 %3425, %v4907_v14  }
 0x7f6   : > { %3427 = vset.pattern.permute.xlu2 %v6011_v34 }
 0x7f7   : > { %2103 = vperm.xlu2 %3427, %v4907_v14  }
 0x7ff   : > { %3429 = vset.pattern.permute.xlu2 %v6012_v29 }
 0x800   : > { %2157 = vperm.xlu2 %3429, %v4907_v14  }
 0x808   : > { %3431 = vset.pattern.permute.xlu2 %v6013_v42 }
 0x809   : > { %2211 = vperm.xlu2 %3431, %v4907_v14  }
 0x811   : > { %3432 = vset.pattern.permute.xlu2 %v6014_v58 }
 0x812   : > { %2252 = vperm.xlu2 %3432, %v4907_v14  }
 0x81a   : > { %3434 = vset.pattern.permute.xlu2 %v6015_v8 }
 0x840   : > { %v5039_v35 = vpop.permute.xlu2 %2034 }
 0x848   : > { %v5042_v49 = vpop.permute.xlu2 %2049 }
 0x849   : > { %v2055_v45 = vmul.f32 %v2052_v26, %v5042_v49 }
 0x84b   : > { %2061 = vrot.lane.b32.xlu0 %v2055_v45, %s6010_s27 }
 0x851   : > { %v5047_v23 = vpop.permute.xlu2 %2103 }
 0x852   : > { %v2109_v4 = vmul.f32 %v2106_v27, %v5047_v23  ;;  %v2187_v27 = vperm.slane %v5012_v59, 6 }
 0x853   : > { %2076 = vperm.xlu0 %3426, %v4907_v14  }
 0x85a   : > { %v5054_v16 = vpop.permute.xlu2 %2157 }
 0x85b   : > { %2115 = vrot.lane.b32.xlu0 %v2109_v4, %s6010_s27  ;;  %v2163_v32 = vmul.f32 %v2160_v1, %v5054_v16 }
 0x85c   : > { %3428 = vset.pattern.permute.xlu0 %v6016_v44  ;;  %v6031_v44 = vmov 24  }
 0x863   : > { %2130 = vperm.xlu0 %3428, %v4907_v14   ;;  %v5061_v9 = vpop.permute.xlu2 %2211 }
 0x864   : > { %v2217_v20 = vmul.f32 %v2214_v3, %v5061_v9 }
 0x86b   : > { %2169 = vrot.lane.b32.xlu0 %v2163_v32, %s6010_s27 }
 0x86c   : > { %3430 = vset.pattern.permute.xlu0 %v6017_v21 }
 0x873   : > { %2184 = vperm.xlu0 %3430, %v4907_v14  }
 0x87b   : > { %2223 = vrot.lane.b32.xlu0 %v2217_v20, %s6010_s27 }
 0x87c   : > { %3433 = vset.pattern.permute.xlu0 %v6018_v31 }
 0x883   : > { %2240 = vrot.lane.b32.xlu0 %v1893_v56, %s6019_s11  ;;  %v2079_v56 = vperm.slane %v5012_v59, 2 }
 0x88b   : > { %2279 = vperm.xlu0 %3433, %v4907_v14  }
 0x893   : > { %3435 = vset.pattern.permute.xlu0 %v6020_v60 }
 0x894   : > { %2333 = vperm.xlu0 %3435, %v4907_v14  }
 0x89c   : > { %3437 = vset.pattern.permute.xlu0 %v6021_v5 }
 0x89d   : > { %2387 = vperm.xlu0 %3437, %v4907_v14  }
 0x8a5   : > { %3439 = vset.pattern.permute.xlu0 %v6022_v48 }
 0x8bd   : > { %v5082_v24 = vpop.permute.xlu0 %2061 }
 0x8c5   : > { %v5085_v33 = vpop.permute.xlu0 %2076 }
 0x8c6   : > { %v2082_v11 = vmul.f32 %v2079_v56, %v5085_v33 }
 0x8c8   : > { %2088 = vrot.lane.b32.xlu1 %v2082_v11, %s6010_s27  ;;  %v5122_v11 = vpop.permute.xlu2 %2252 }
 0x8cd   : > { %v5089_v63 = vpop.permute.xlu0 %2115 }
 0x8d5   : > { %v5092_v57 = vpop.permute.xlu0 %2130 }
 0x8d6   : > { %v2136_v26 = vmul.f32 %v2133_v28, %v5092_v57 }
 0x8d8   : > { %2142 = vrot.lane.b32.xlu1 %v2136_v26, %s6010_s27 }
 0x8dd   : > { %v5096_v45 = vpop.permute.xlu0 %2169 }
 0x8e5   : > { %v5099_v4 = vpop.permute.xlu0 %2184 }
 0x8e6   : > { %v2190_v1 = vmul.f32 %v2187_v27, %v5099_v4 }
 0x8e8   : > { %2196 = vrot.lane.b32.xlu1 %v2190_v1, %s6010_s27 }
 0x8ed   : > { %v5110_v20 = vpop.permute.xlu0 %2223 }
 0x8f0   : > { %2242 = vrot.lane.b32.xlu1 %v1894_v37, %s6019_s11 }
 0x8f5   : > { %v5114_v48 = vpop.permute.xlu0 %2240 }
 0x8fd   : > { %v5126_v28 = vpop.permute.xlu0 %2279 }
 0x906   : > { %v5139_v1 = vpop.permute.xlu0 %2333 }
 0x93a   : > { %v5106_v32 = vpop.permute.xlu1 %2088 }
 0x94a   : > { %v5108_v3 = vpop.permute.xlu1 %2142 }
 0x95a   : > { %v5112_v5 = vpop.permute.xlu1 %2196 }
 0x962   : > { %v5116_v59 = vpop.permute.xlu1 %2242 }
 0x963   : > { %v5120_v56 = vmul.f32 %v5008_v50, %v5116_v59 }
 0x965   : > { %v2257_v39 = vperm.slane %v5120_v56, 0  ;;  %v2284_v37 = vperm.slane %v5120_v56, 1  ;;  %v2311_v60 = vperm.slane %v5120_v56, 2 }
 0x967   : > { %v2260_v26 = vmul.f32 %v2257_v39, %v5122_v11  ;;  %v2287_v27 = vmul.f32 %v2284_v37, %v5126_v28  ;;  %v2338_v39 = vperm.slane %v5120_v56, 3 }
 0x969   : > { %2295 = vrot.lane.b32.xlu1 %v2287_v27, %s6023_s26  ;;  %2268 = vrot.lane.b32.xlu2 %v2260_v26, %s6023_s26  ;;  %v2341_v37 = vmul.f32 %v2338_v39, %v5139_v1  ;;  %v6024_v26 = vmov 20   ;;  %v5146_v27 = vpop.permute.xlu0 %2387 }
 0x971   : > { %1881 = vrot.lane.b32.xlu1 %v4998_v52, %s3668_s29  ;;  %1879 = vrot.lane.b32.xlu2 %v4996_v12, %s3668_s29  ;;  %v2392_v52 = vperm.slane %v5120_v56, 5 }
 0x973   : > { %v2395_v12 = vmul.f32 %v2392_v52, %v5146_v27 }
 0x979   : > { %1877 = vrot.lane.b32.xlu1 %v4994_v19, %s3668_s29  ;;  %2306 = vperm.xlu2 %3434, %v4907_v14   ;;  %s6037_s29 = smov 77  }
 0x981   : > { %2349 = vrot.lane.b32.xlu1 %v2341_v37, %s6023_s26  ;;  %3436 = vset.pattern.permute.xlu2 %v6024_v26 }
 0x989   : > { %2403 = vrot.lane.b32.xlu1 %v2395_v12, %s6023_s26  ;;  %v6026_v12 = vmov 22  }
 0x9c3   : > { %v5150_v19 = vpop.permute.xlu2 %2268 }
 0x9cb   : > { %v1880_v40 = vpop.permute.xlu2 %1879 }
 0x9d3   : > { %v5153_v8 = vpop.permute.xlu2 %2306 }
 0x9d4   : > { %v2314_v39 = vmul.f32 %v2311_v60, %v5153_v8 }
 0x9d6   : > { %2322 = vrot.lane.b32.xlu2 %v2314_v39, %s6023_s26 }
 0x9db   : > { %v5157_v37 = vpop.permute.xlu1 %2295 }
 0x9de   : > { %2360 = vperm.xlu2 %3436, %v4907_v14  }
 0x9e3   : > { %v1882_v26 = vpop.permute.xlu1 %1881 }
 0x9e4   : > { %v1884_v52 = vsel %vm6025_vm7, %v1880_v40, %v1882_v26 }
 0x9e5   : > { %1888 = vst [vmem:[#allocation2 + $0x30] sm:$0xf] %v1884_v52 }
 0x9e6   : > { %3438 = vset.pattern.permute.xlu2 %v6026_v12 }
 0x9eb   : > { %v1878_v58 = vpop.permute.xlu1 %1877 }
 0x9ec   : > { %v5162_v21 = vld [vmem:[#allocation2 + $0x30] sm:$0xff]  ;;  %v1883_v60 = vsel %vm6027_vm9, %v1878_v58, %v1880_v40  ;;  %v2014_v40 = vsel %vm6028_vm10, %v5006_v43, %v5037_v51 }
 0x9ed   : > { %v5167_v39 = vmul.f32 %v5037_v51, %v5162_v21  ;;  %3099 = vst [vmem:[%s4442_s28 + $0x38] sm:$0xff] %v5162_v21  ;;  %v3105_v29 = vrot.slane %v5162_v21, 4 }
 0x9ee   : > { %1887 = vst [vmem:[#allocation2 + $0x28] sm:$0xf] %v1883_v60 }
 0x9ef   : > { %v2027_v26 = vperm.slane %v5167_v39, 0  ;;  %3109 = vst [vmem:[%s4442_s28 + $0x48] sm:$0xf0] %v3105_v29 }
 0x9f0   : > { %3111 = vst [vmem:[%s4442_s28 + $0x58] sm:$0xf] %v3105_v29 }
 0x9f1   : > { %v2030_v52 = vmul.f32 %v2027_v26, %v5015_v30 }
 0x9f3   : > { %2038 = vrot.lane.b32.xlu1 %v2030_v52, %s6010_s27  ;;  %v2081_v52 = vperm.slane %v5167_v39, 2 }
 0x9f5   : > { %v5180_v58 = vld [vmem:[#allocation2 + $0x28] sm:$0xff]  ;;  %v2084_v42 = vmul.f32 %v2081_v52, %v5085_v33  ;;  %v2189_v52 = vperm.slane %v5167_v39, 6 }
 0x9f6   : > { %v5183_v12 = vmul.f32 %v2014_v40, %v5180_v58  ;;  %3098 = vst [vmem:[%s4442_s28 + $0x30] sm:$0xff] %v5180_v58  ;;  %v3104_v60 = vrot.slane %v5180_v58, 4  ;;  %v5193_v26 = vmul.f32 %v5114_v48, %v5180_v58 }
 0x9f8   : > { %v2053_v31 = vperm.slane %v5183_v12, 1  ;;  %v2026_v29 = vperm.slane %v5183_v12, 0  ;;  %3108 = vst [vmem:[%s4442_s28 + $0x40] sm:$0xf0] %v3104_v60  ;;  %v2255_v40 = vperm.slane %v5193_v26, 0 }
 0x9f9   : > { %3110 = vst [vmem:[%s4442_s28 + $0x50] sm:$0xf] %v3104_v60 }
 0x9fa   : > { %v2056_v43 = vmul.f32 %v2053_v31, %v5042_v49  ;;  %v2029_v51 = vmul.f32 %v2026_v29, %v5015_v30  ;;  %v2258_v34 = vmul.f32 %v2255_v40, %v5122_v11  ;;  %v2107_v31 = vperm.slane %v5183_v12, 3 }
 0x9fb   : > { %v2309_v30 = vperm.slane %v5193_v26, 2  ;;  %v2192_v40 = vmul.f32 %v2189_v52, %v5099_v4  ;;  %v2363_v52 = vperm.slane %v5193_v26, 4 }
 0x9fc   : > { %2063 = vrot.lane.b32.xlu1 %v2056_v43, %s6010_s27  ;;  %2036 = vrot.lane.b32.xlu0 %v2029_v51, %s6010_s27  ;;  %v2110_v60 = vmul.f32 %v2107_v31, %v5047_v23  ;;  %v2135_v43 = vperm.slane %v5167_v39, 4  ;;  %v2215_v31 = vperm.slane %v5183_v12, 7 }
 0x9fd   : > { %v2312_v29 = vmul.f32 %v2309_v30, %v5153_v8  ;;  %v2244_v30 = vsel %vm6029_vm13, %v5114_v48, %v5116_v59  ;;  %v2365_v48 = vperm.slane %v5120_v56, 4 }
 0x9fe   : > { %v2138_v51 = vmul.f32 %v2135_v43, %v5092_v57 }
 0xa04   : > { %2092 = vrot.lane.b32.xlu1 %v2084_v42, %s6010_s27  ;;  %2264 = vrot.lane.b32.xlu0 %v2258_v34, %s6023_s26  ;;  %v2161_v34 = vperm.slane %v5183_v12, 5 }
 0xa06   : > { %v2164_v42 = vmul.f32 %v2161_v34, %v5054_v16 }
 0xa0c   : > { %2117 = vrot.lane.b32.xlu1 %v2110_v60, %s6010_s27  ;;  %2318 = vrot.lane.b32.xlu0 %v2312_v29, %s6023_s26  ;;  %v5226_v60 = vmul.f32 %v2244_v30, %v5162_v21  ;;  %v2218_v29 = vmul.f32 %v2215_v31, %v5061_v9 }
 0xa0e   : > { %v2256_v43 = vperm.slane %v5226_v60, 0 }
 0xa10   : > { %v2259_v34 = vmul.f32 %v2256_v43, %v5122_v11  ;;  %v2310_v11 = vperm.slane %v5226_v60, 2 }
 0xa12   : > { %v2313_v43 = vmul.f32 %v2310_v11, %v5153_v8 }
 0xa14   : > { %2146 = vrot.lane.b32.xlu1 %v2138_v51, %s6010_s27 }
 0xa1c   : > { %2171 = vrot.lane.b32.xlu1 %v2164_v42, %s6010_s27  ;;  %v2282_v42 = vperm.slane %v5193_v26, 1 }
 0xa1e   : > { %v2285_v31 = vmul.f32 %v2282_v42, %v5126_v28  ;;  %v2336_v42 = vperm.slane %v5193_v26, 3 }
 0xa20   : > { %v2339_v8 = vmul.f32 %v2336_v42, %v5139_v1 }
 0xa24   : > { %2200 = vrot.lane.b32.xlu1 %v2192_v40, %s6010_s27 }
 0xa2c   : > { %2225 = vrot.lane.b32.xlu1 %v2218_v29, %s6010_s27  ;;  %v1907_v29 = vmul.f32 %v5075_v41, %v5162_v21 }
 0xa2e   : > { %v1938_v11 = vperm.slane %v1907_v29, 2  ;;  %v1951_v15 = vperm.slane %v1907_v29, 3  ;;  %v1964_v53 = vperm.slane %v1907_v29, 4  ;;  %v1977_v13 = vperm.slane %v1907_v29, 5 }
 0xa30   : > { %v5231_v51 = vpop.permute.xlu2 %2322  ;;  %v1941_v47 = vmul.f32 %v1938_v11, %v5078_v22  ;;  %v1967_v11 = vmul.f32 %v1964_v53, %v5033_v54  ;;  %v2003_v53 = vperm.slane %v1907_v29, 7 }
 0xa34   : > { %2266 = vrot.lane.b32.xlu1 %v2259_v34, %s6023_s26  ;;  %v1915_v34 = vperm.slane %v1907_v29, 0 }
 0xa38   : > { %v2361_v59 = vpop.permute.xlu2 %2360 }
 0xa39   : > { %v2366_v40 = vmul.f32 %v2363_v52, %v2361_v59  ;;  %v2368_v30 = vmul.f32 %v2365_v48, %v2361_v59  ;;  %v1925_v52 = vperm.slane %v1907_v29, 1  ;;  %v1918_v48 = vmul.f32 %v1915_v34, %v5000_v7 }
 0xa3b   : > { %2376 = vrot.lane.b32.xlu2 %v2368_v30, %s6023_s26  ;;  %2372 = vrot.lane.b32.xlu0 %v2366_v40, %s6023_s26  ;;  %v1928_v40 = vmul.f32 %v1925_v52, %v5031_v17  ;;  %v1901_v30 = vsel %vm6030_vm0, %v5027_v62, %v5075_v41  ;;  %v2364_v52 = vperm.slane %v5226_v60, 4 }
 0xa3c   : > { %2291 = vrot.lane.b32.xlu1 %v2285_v31, %s6023_s26  ;;  %v1906_v31 = vmul.f32 %v1901_v30, %v5180_v58  ;;  %v1954_v30 = vmul.f32 %v1951_v15, %v5002_v2 }
 0xa3d   : > { %v2367_v41 = vmul.f32 %v2364_v52, %v2361_v59  ;;  %v1990_v52 = vperm.slane %v1907_v29, 6 }
 0xa3e   : > { %v1914_v34 = vperm.slane %v1906_v31, 0  ;;  %v1924_v46 = vperm.slane %v1906_v31, 1  ;;  %v1950_v15 = vperm.slane %v1906_v31, 3 }
 0xa40   : > { %v1917_v42 = vmul.f32 %v1914_v34, %v5000_v7  ;;  %v1927_v6 = vmul.f32 %v1924_v46, %v5031_v17  ;;  %v1980_v46 = vmul.f32 %v1977_v13, %v5004_v0  ;;  %v2006_v13 = vmul.f32 %v2003_v53, %v5080_v55 }
 0xa43   : > { %2414 = vperm.xlu2 %3438, %v4907_v14  }
 0xa44   : > { %2320 = vrot.lane.b32.xlu1 %v2313_v43, %s6023_s26  ;;  %v1931_v43 = vadd.f32 %v1928_v40, %v1918_v48  ;;  %v1937_v40 = vperm.slane %v1906_v31, 2 }
 0xa46   : > { %v1944_v25 = vadd.f32 %v1941_v47, %v1931_v43  ;;  %v1930_v47 = vadd.f32 %v1927_v6, %v1917_v42  ;;  %v1940_v59 = vmul.f32 %v1937_v40, %v5078_v22  ;;  %v1993_v6 = vmul.f32 %v1990_v52, %v5035_v10 }
 0xa47   : > { %v2002_v52 = vperm.slane %v1906_v31, 7 }
 0xa48   : > { %v1957_v48 = vadd.f32 %v1954_v30, %v1944_v25  ;;  %v1943_v36 = vadd.f32 %v1940_v59, %v1930_v47  ;;  %v1963_v30 = vperm.slane %v1906_v31, 4 }
 0xa4a   : > { %v1970_v43 = vadd.f32 %v1967_v11, %v1957_v48  ;;  %v1966_v40 = vmul.f32 %v1963_v30, %v5033_v54 }
 0xa4b   : > { %3440 = vset.pattern.permute.xlu2 %v6031_v44  ;;  %v5263_v44 = vpop.permute.xlu1 %2349 }
 0xa4c   : > { %2345 = vrot.lane.b32.xlu1 %v2339_v8, %s6023_s26  ;;  %v2390_v8 = vperm.slane %v5193_v26, 5  ;;  %v1983_v25 = vadd.f32 %v1980_v46, %v1970_v43  ;;  %v1989_v43 = vperm.slane %v1906_v31, 6 }
 0xa4e   : > { %v2393_v34 = vmul.f32 %v2390_v8, %v5146_v27  ;;  %v1996_v48 = vadd.f32 %v1993_v6, %v1983_v25  ;;  %v1976_v8 = vperm.slane %v1906_v31, 5  ;;  %v1992_v61 = vmul.f32 %v1989_v43, %v5035_v10 }
 0xa50   : > { %v2009_v47 = vadd.f32 %v2006_v13, %v1996_v48  ;;  %v1979_v59 = vmul.f32 %v1976_v8, %v5004_v0  ;;  %v2417_v13 = vperm.slane %v5193_v26, 6 }
 0xa53   : > { %v5273_v18 = vpop.permute.xlu1 %2403 }
 0xa54   : > { %2374 = vrot.lane.b32.xlu1 %v2367_v41, %s6023_s26  ;;  %v1953_v41 = vmul.f32 %v1950_v15, %v5002_v2 }
 0xa56   : > { %v1956_v42 = vadd.f32 %v1953_v41, %v1943_v36  ;;  %v2005_v36 = vmul.f32 %v2002_v52, %v5080_v55 }
 0xa58   : > { %v1969_v11 = vadd.f32 %v1966_v40, %v1956_v42 }
 0xa5a   : > { %v1982_v46 = vadd.f32 %v1979_v59, %v1969_v11  ;;  %v2418_v11 = vperm.slane %v5226_v60, 6 }
 0xa5c   : > { %2399 = vrot.lane.b32.xlu1 %v2393_v34, %s6023_s26  ;;  %v1995_v29 = vadd.f32 %v1992_v61, %v1982_v46 }
 0xa5e   : > { %v2008_v30 = vadd.f32 %v2005_v36, %v1995_v29  ;;  %v2054_v29 = vperm.slane %v5167_v39, 1 }
 0xa65   : > { %v2039_v34 = vpop.permute.xlu1 %2038 }
 0xa66   : > { %v5279_v15 = vadd.f32 %v2039_v34, %v2009_v47  ;;  %v2419_v47 = vperm.slane %v5120_v56, 6 }
 0xa6e   : > { %v5283_v25 = vpop.permute.xlu1 %2063  ;;  %v5285_v41 = vpop.permute.xlu0 %2036 }
 0xa6f   : > { %v2041_v6 = vsel %vm584_vm1, %v5285_v41, %v2039_v34 }
 0xa70   : > { %v5289_v53 = vadd.f32 %v2041_v6, %v2008_v30  ;;  %v2057_v30 = vmul.f32 %v2054_v29, %v5042_v49  ;;  %v2080_v6 = vperm.slane %v5183_v12, 2 }
 0xa76   : > { %v5291_v42 = vpop.permute.xlu1 %2092 }
 0xa7e   : > { %v5293_v48 = vpop.permute.xlu1 %2117 }
 0xa86   : > { %v5295_v40 = vpop.permute.xlu1 %2146 }
 0xa8e   : > { %v5297_v31 = vpop.permute.xlu1 %2171 }
 0xa95   : > { %v2377_v61 = vpop.permute.xlu2 %2376 }
 0xa96   : > { %v5299_v8 = vpop.permute.xlu1 %2200 }
 0xa9d   : > { %v2415_v59 = vpop.permute.xlu2 %2414 }
 0xa9e   : > { %v5304_v43 = vpop.permute.xlu1 %2225  ;;  %v2420_v34 = vmul.f32 %v2417_v13, %v2415_v59  ;;  %v2421_v46 = vmul.f32 %v2418_v11, %v2415_v59  ;;  %v2422_v52 = vmul.f32 %v2419_v47, %v2415_v59  ;;  %v2083_v11 = vmul.f32 %v2080_v6, %v5085_v33 }
 0xa9f   : > { %v6032_v47 = vmov 25   ;;  %v2108_v59 = vperm.slane %v5167_v39, 3  ;;  %v2162_v33 = vperm.slane %v5167_v39, 5 }
 0xaa0   : > { %2430 = vrot.lane.b32.xlu2 %v2422_v52, %s6023_s26  ;;  %2428 = vrot.lane.b32.xlu1 %v2421_v46, %s6023_s26  ;;  %v2134_v46 = vperm.slane %v5183_v12, 4 }
 0xaa1   : > { %2426 = vrot.lane.b32.xlu0 %v2420_v34, %s6023_s26  ;;  %v2111_v49 = vmul.f32 %v2108_v59, %v5047_v23  ;;  %v2165_v6 = vmul.f32 %v2162_v33, %v5054_v16  ;;  %v2188_v23 = vperm.slane %v5183_v12, 6  ;;  %v2283_v16 = vperm.slane %v5226_v60, 1 }
 0xaa2   : > { %v2137_v29 = vmul.f32 %v2134_v46, %v5092_v57  ;;  %v2216_v57 = vperm.slane %v5167_v39, 7  ;;  %v2337_v12 = vperm.slane %v5226_v60, 3 }
 0xaa4   : > { %v2219_v59 = vmul.f32 %v2216_v57, %v5061_v9 }
 0xaa6   : > { %v5310_v36 = vpop.permute.xlu1 %2266 }
 0xaa8   : > { %2065 = vrot.lane.b32.xlu2 %v2057_v30, %s6010_s27 }
 0xaa9   : > { %2441 = vperm.xlu0 %3439, %v4907_v14  }
 0xaae   : > { %v5316_v13 = vpop.permute.xlu1 %2291 }
 0xab0   : > { %2090 = vrot.lane.b32.xlu2 %v2083_v11, %s6010_s27 }
 0xab1   : > { %3441 = vset.pattern.permute.xlu0 %v6032_v47  ;;  %v2191_v47 = vmul.f32 %v2188_v23, %v5099_v4 }
 0xab6   : > { %v5322_v34 = vpop.permute.xlu1 %2320 }
 0xab8   : > { %2119 = vrot.lane.b32.xlu2 %v2111_v49, %s6010_s27  ;;  %v2286_v49 = vmul.f32 %v2283_v16, %v5126_v28  ;;  %v2391_v28 = vperm.slane %v5226_v60, 5 }
 0xabe   : > { %v5327_v52 = vpop.permute.xlu1 %2345 }
 0xac0   : > { %2144 = vrot.lane.b32.xlu2 %v2137_v29, %s6010_s27  ;;  %v2340_v29 = vmul.f32 %v2337_v12, %v5139_v1 }
 0xac6   : > { %v5332_v30 = vpop.permute.xlu1 %2374 }
 0xac7   : > { %v5337_v11 = vsel %vm948_vm11, %v5332_v30, %v2377_v61  ;;  %v1905_v61 = vmul.f32 %v5008_v50, %v5027_v62  ;;  %v2394_v62 = vmul.f32 %v2391_v28, %v5146_v27 }
 0xac8   : > { %2173 = vrot.lane.b32.xlu2 %v2165_v6, %s6010_s27 }
 0xac9   : > { %v1923_v4 = vperm.slane %v1905_v61, 1  ;;  %v1913_v46 = vperm.slane %v1905_v61, 0  ;;  %v1936_v39 = vperm.slane %v1905_v61, 2  ;;  %v1949_v23 = vperm.slane %v1905_v61, 3 }
 0xaca   : > { %v1962_v57 = vperm.slane %v1905_v61, 4 }
 0xacb   : > { %v1926_v9 = vmul.f32 %v1923_v4, %v5031_v17  ;;  %v1916_v33 = vmul.f32 %v1913_v46, %v5000_v7  ;;  %v1939_v6 = vmul.f32 %v1936_v39, %v5078_v22  ;;  %v1952_v1 = vmul.f32 %v1949_v23, %v5002_v2  ;;  %v5362_v4 = vpop.permute.xlu0 %2264 }
 0xacc   : > { %v1965_v16 = vmul.f32 %v1962_v57, %v5033_v54  ;;  %v1975_v17 = vperm.slane %v1905_v61, 5  ;;  %v1988_v7 = vperm.slane %v1905_v61, 6  ;;  %v2001_v39 = vperm.slane %v1905_v61, 7 }
 0xacd   : > { %v2040_v54 = vsel %vm584_vm1, %v5039_v35, %v5285_v41 }
 0xace   : > { %v1978_v22 = vmul.f32 %v1975_v17, %v5004_v0  ;;  %v1991_v27 = vmul.f32 %v1988_v7, %v5035_v10  ;;  %v2121_v17 = vsel %vm584_vm1, %v5089_v63, %v5293_v48  ;;  %v2444_v7 = vperm.slane %v5193_v26, 7 }
 0xacf   : > { %v2446_v26 = vperm.slane %v5120_v56, 7 }
 0xad0   : > { %2198 = vrot.lane.b32.xlu2 %v2191_v47, %s6010_s27  ;;  %v1929_v47 = vadd.f32 %v1926_v9, %v1916_v33  ;;  %v2004_v9 = vmul.f32 %v2001_v39, %v5080_v55  ;;  %v2067_v55 = vsel %vm584_vm1, %v5082_v24, %v5283_v25 }
 0xad3   : > { %v5372_v28 = vpop.permute.xlu0 %2318 }
 0xad8   : > { %2227 = vrot.lane.b32.xlu2 %v2219_v59, %s6010_s27  ;;  %v1942_v59 = vadd.f32 %v1939_v6, %v1929_v47 }
 0xadb   : > { %v5381_v57 = vpop.permute.xlu0 %2372 }
 0xae0   : > { %2293 = vrot.lane.b32.xlu2 %v2286_v49, %s6023_s26  ;;  %v1955_v49 = vadd.f32 %v1952_v1, %v1942_v59 }
 0xae2   : > { %v1968_v12 = vadd.f32 %v1965_v16, %v1955_v49 }
 0xae8   : > { %2347 = vrot.lane.b32.xlu2 %v2340_v29, %s6023_s26  ;;  %v1981_v29 = vadd.f32 %v1978_v22, %v1968_v12  ;;  %v2445_v22 = vperm.slane %v5226_v60, 7 }
 0xaea   : > { %v1994_v33 = vadd.f32 %v1991_v27, %v1981_v29 }
 0xaec   : > { %v2007_v23 = vadd.f32 %v2004_v9, %v1994_v33 }
 0xaee   : > { %v2045_v47 = vadd.f32 %v2040_v54, %v2007_v23 }
 0xaf0   : > { %2401 = vrot.lane.b32.xlu2 %v2394_v62, %s6023_s26  ;;  %v2072_v62 = vadd.f32 %v2067_v55, %v2045_v47 }
 0xafa   : > { %v5365_v46 = vpop.permute.xlu2 %2430 }
 0xb02   : > { %v2066_v2 = vpop.permute.xlu2 %2065 }
 0xb03   : > { %v2068_v6 = vsel %vm584_vm1, %v5283_v25, %v2066_v2  ;;  %v2074_v0 = vadd.f32 %v2066_v2, %v5279_v15 }
 0xb04   : > { %v2073_v10 = vadd.f32 %v2068_v6, %v5289_v53 }
 0xb05   : > { %v2101_v1 = vadd.f32 %v5291_v42, %v2074_v0  ;;  %v2175_v0 = vsel %vm584_vm1, %v5096_v45, %v5297_v31 }
 0xb0a   : > { %v2091_v61 = vpop.permute.xlu2 %2090 }
 0xb0b   : > { %v2094_v35 = vsel %vm584_vm1, %v5106_v32, %v2091_v61  ;;  %v2095_v41 = vsel %vm584_vm1, %v2091_v61, %v5291_v42 }
 0xb0c   : > { %v2099_v59 = vadd.f32 %v2094_v35, %v2072_v62  ;;  %v2100_v15 = vadd.f32 %v2095_v41, %v2073_v10  ;;  %v6033_v62 = vmov 26  }
 0xb0e   : > { %v2126_v12 = vadd.f32 %v2121_v17, %v2099_v59  ;;  %v2400_v17 = vpop.permute.xlu1 %2399 }
 0xb12   : > { %v2120_v53 = vpop.permute.xlu2 %2119 }
 0xb13   : > { %v2122_v16 = vsel %vm584_vm1, %v5293_v48, %v2120_v53  ;;  %v2128_v49 = vadd.f32 %v2120_v53, %v2101_v1  ;;  %v5390_v24 = vpop.permute.xlu0 %2426  ;;  %v2270_v53 = vsel %vm948_vm11, %v5362_v4, %v5310_v36 }
 0xb14   : > { %v2127_v25 = vadd.f32 %v2122_v16, %v2100_v15  ;;  %v2271_v15 = vsel %vm948_vm11, %v5310_v36, %v5150_v19  ;;  %v2324_v36 = vsel %vm948_vm11, %v5372_v28, %v5322_v34 }
 0xb15   : > { %v2155_v63 = vadd.f32 %v5295_v40, %v2128_v49 }
 0xb1a   : > { %v2145_v32 = vpop.permute.xlu2 %2144 }
 0xb1b   : > { %v2148_v42 = vsel %vm584_vm1, %v5108_v3, %v2145_v32  ;;  %v2149_v27 = vsel %vm584_vm1, %v2145_v32, %v5295_v40  ;;  %v2442_v29 = vpop.permute.xlu0 %2441 }
 0xb1c   : > { %v2153_v39 = vadd.f32 %v2148_v42, %v2126_v12  ;;  %v2154_v9 = vadd.f32 %v2149_v27, %v2127_v25  ;;  %v2447_v33 = vmul.f32 %v2444_v7, %v2442_v29  ;;  %v2448_v2 = vmul.f32 %v2445_v22, %v2442_v29 }
 0xb1d   : > { %v2449_v54 = vmul.f32 %v2446_v26, %v2442_v29  ;;  %v2429_v26 = vpop.permute.xlu1 %2428 }
 0xb1e   : > { %2455 = vrot.lane.b32.xlu2 %v2448_v2, %s6023_s26  ;;  %2453 = vrot.lane.b32.xlu1 %v2447_v33, %s6023_s26  ;;  %v2180_v10 = vadd.f32 %v2175_v0, %v2153_v39  ;;  %v2378_v2 = vsel %vm948_vm11, %v5381_v57, %v5332_v30  ;;  %v6035_v0 = vld [vmem:[#allocation39_spill] sm:$0xff] }
 0xb22   : > { %v2174_v60 = vpop.permute.xlu2 %2173 }
 0xb23   : > { %v2176_v3 = vsel %vm584_vm1, %v5297_v31, %v2174_v60  ;;  %v2182_v48 = vadd.f32 %v2174_v60, %v2155_v63 }
 0xb24   : > { %v2181_v6 = vadd.f32 %v2176_v3, %v2154_v9 }
 0xb25   : > { %v2209_v45 = vadd.f32 %v5299_v8, %v2182_v48  ;;  %v2432_v48 = vsel %vm948_vm11, %v5390_v24, %v2429_v26 }
 0xb26   : > { %2471 = vperm.xlu2 %3440, %v4907_v14   ;;  %2457 = vrot.lane.b32.xlu1 %v2449_v54, %s6023_s26  ;;  %v2229_v14 = vsel %vm584_vm1, %v5110_v20, %v5304_v43 }
 0xb2a   : > { %v2199_v23 = vpop.permute.xlu2 %2198 }
 0xb2b   : > { %v2202_v56 = vsel %vm584_vm1, %v5112_v5, %v2199_v23  ;;  %v2203_v40 = vsel %vm584_vm1, %v2199_v23, %v5299_v8  ;;  %v5466_v23 = vmul.f32 %v5162_v21, %v6035_v0 }
 0xb2c   : > { %v2207_v47 = vadd.f32 %v2202_v56, %v2180_v10  ;;  %v2208_v55 = vadd.f32 %v2203_v40, %v2181_v6  ;;  %v6034_v6 = vld [vmem:[#allocation38_spill] sm:$0xff] }
 0xb2d   : > { %v2475_v56 = vperm.slane %v5466_v23, 0 }
 0xb2e   : > { %v2234_v61 = vadd.f32 %v2229_v14, %v2207_v47  ;;  %3442 = vset.pattern.permute.xlu2 %v6033_v62 }
 0xb30   : > { %v2275_v35 = vadd.f32 %v5362_v4, %v2234_v61  ;;  %v2325_v4 = vsel %vm948_vm11, %v5322_v34, %v5231_v51 }
 0xb32   : > { %v2302_v31 = vadd.f32 %v5316_v13, %v2275_v35  ;;  %v2228_v41 = vpop.permute.xlu2 %2227 }
 0xb33   : > { %v2230_v5 = vsel %vm584_vm1, %v5304_v43, %v2228_v41  ;;  %v2236_v59 = vadd.f32 %v2228_v41, %v2209_v45 }
 0xb34   : > { %v2329_v20 = vadd.f32 %v5372_v28, %v2302_v31  ;;  %v2235_v1 = vadd.f32 %v2230_v5, %v2208_v55 }
 0xb35   : > { %v2277_v16 = vadd.f32 %v2271_v15, %v2236_v59 }
 0xb36   : > { %v2276_v8 = vadd.f32 %v2270_v53, %v2235_v1  ;;  %v2356_v49 = vadd.f32 %v5327_v52, %v2329_v20  ;;  %v2502_v53 = vperm.slane %v5466_v23, 1 }
 0xb38   : > { %v2383_v25 = vadd.f32 %v5381_v57, %v2356_v49 }
 0xb3a   : > { %v2294_v43 = vpop.permute.xlu2 %2293  ;;  %v2410_v32 = vadd.f32 %v2400_v17, %v2383_v25 }
 0xb3b   : > { %v2297_v12 = vsel %vm948_vm11, %v5316_v13, %v2294_v43  ;;  %v2298_v19 = vsel %vm948_vm11, %v2294_v43, %v5157_v37  ;;  %v3696_v43 = vmov 27  }
 0xb3c   : > { %v2303_v7 = vadd.f32 %v2297_v12, %v2276_v8  ;;  %v2304_v22 = vadd.f32 %v2298_v19, %v2277_v16  ;;  %v2437_v42 = vadd.f32 %v5390_v24, %v2410_v32 }
 0xb3e   : > { %v2330_v27 = vadd.f32 %v2324_v36, %v2303_v7  ;;  %v2331_v29 = vadd.f32 %v2325_v4, %v2304_v22  ;;  %v2529_v7 = vperm.slane %v5466_v23, 2 }
 0xb42   : > { %v2348_v39 = vpop.permute.xlu2 %2347 }
 0xb43   : > { %v2351_v13 = vsel %vm948_vm11, %v5327_v52, %v2348_v39  ;;  %v2352_v37 = vsel %vm948_vm11, %v2348_v39, %v5263_v44  ;;  %v2433_v44 = vsel %vm948_vm11, %v2429_v26, %v5365_v46 }
 0xb44   : > { %v2357_v9 = vadd.f32 %v2351_v13, %v2330_v27  ;;  %v2358_v33 = vadd.f32 %v2352_v37, %v2331_v29 }
 0xb46   : > { %v2384_v28 = vadd.f32 %v2378_v2, %v2357_v9  ;;  %v2385_v63 = vadd.f32 %v5337_v11, %v2358_v33  ;;  %v5462_v11 = vmul.f32 %v5008_v50, %v6034_v6  ;;  %v5481_v50 = vld [vmem:[%s5828_s6] sm:$0xff] }
 0xb48   : > { %v2476_v24 = vperm.slane %v5462_v11, 0  ;;  %v2503_v25 = vperm.slane %v5462_v11, 1  ;;  %v2530_v22 = vperm.slane %v5462_v11, 2  ;;  %v2557_v6 = vperm.slane %v5462_v11, 3 }
 0xb4a   : > { %v2402_v51 = vpop.permute.xlu2 %2401 }
 0xb4b   : > { %v2405_v34 = vsel %vm948_vm11, %v2400_v17, %v2402_v51  ;;  %v2406_v60 = vsel %vm948_vm11, %v2402_v51, %v5273_v18  ;;  %v6036_v18 = vld [vmem:[#allocation37_spill] sm:$0xff] }
 0xb4c   : > { %v2411_v52 = vadd.f32 %v2405_v34, %v2384_v28  ;;  %v2412_v3 = vadd.f32 %v2406_v60, %v2385_v63  ;;  %v5470_v10 = vmul.f32 %v5180_v58, %v6036_v18  ;;  %v3697_v63 = vmov 28  }
 0xb4d   : > { %v3698_v18 = vmov 29  }
 0xb4e   : > { %v2438_v54 = vadd.f32 %v2432_v48, %v2411_v52  ;;  %v2439_v30 = vadd.f32 %v2433_v44, %v2412_v3  ;;  %v2474_v46 = vperm.slane %v5470_v10, 0  ;;  %v2501_v1 = vperm.slane %v5470_v10, 1 }
 0xb4f   : > { %v2528_v19 = vperm.slane %v5470_v10, 2  ;;  %v2555_v44 = vperm.slane %v5470_v10, 3  ;;  %v2556_v48 = vperm.slane %v5466_v23, 3 }
 0xb78   : > { %v2456_v57 = vpop.permute.xlu2 %2455 }
 0xb80   : > { %v2472_v40 = vpop.permute.xlu2 %2471 }
 0xb81   : > { %v2477_v47 = vmul.f32 %v2474_v46, %v2472_v40  ;;  %v2478_v55 = vmul.f32 %v2475_v56, %v2472_v40  ;;  %v2479_v14 = vmul.f32 %v2476_v24, %v2472_v40  ;;  %v2582_v24 = vperm.slane %v5470_v10, 4 }
 0xb82   : > { %v2583_v40 = vperm.slane %v5466_v23, 4 }
 0xb83   : > { %2487 = vrot.lane.b32.xlu2 %v2479_v14, %s6037_s29  ;;  %2483 = vrot.lane.b32.xlu0 %v2477_v47, %s6037_s29  ;;  %v2584_v47 = vperm.slane %v5462_v11, 4 }
 0xb84   : > { %2485 = vrot.lane.b32.xlu1 %v2478_v55, %s6037_s29 }
 0xb8b   : > { %2498 = vperm.xlu0 %3441, %v5481_v50  }
 0xb90   : > { %v2454_v21 = vpop.permute.xlu1 %2453 }
 0xb91   : > { %v2459_v58 = vsel %vm948_vm11, %v2454_v21, %v2456_v57  ;;  %v2464_v61 = vadd.f32 %v2454_v21, %v2437_v42 }
 0xb92   : > { %v2465_v62 = vadd.f32 %v2459_v58, %v2438_v54 }
 0xb93   : > { %3443 = vset.pattern.permute.xlu0 %v3696_v43 }
 0xb98   : > { %v2458_v35 = vpop.permute.xlu1 %2457 }
 0xb99   : > { %v2460_v45 = vsel %vm948_vm11, %v2456_v57, %v2458_v35 }
 0xb9a   : > { %v2466_v31 = vadd.f32 %v2460_v45, %v2439_v30 }
 0xbdd   : > { %v2488_v32 = vpop.permute.xlu2 %2487 }
 0xbf5   : > { %v2484_v41 = vpop.permute.xlu0 %2483 }
 0xbf6   : > { %v2494_v5 = vadd.f32 %v2484_v41, %v2464_v61  ;;  %v2486_v59 = vpop.permute.xlu1 %2485 }
 0xbf7   : > { %v2489_v15 = vsel %vm1068_vm3, %v2484_v41, %v2486_v59  ;;  %v2490_v37 = vsel %vm1068_vm3, %v2486_v59, %v2488_v32 }
 0xbf8   : > { %v2495_v20 = vadd.f32 %v2489_v15, %v2465_v62  ;;  %v2496_v9 = vadd.f32 %v2490_v37, %v2466_v31  ;;  %v3699_v15 = vmov 30  }
 0xbfd   : > { %v2499_v16 = vpop.permute.xlu0 %2498 }
 0xbfe   : > { %v2504_v8 = vmul.f32 %v2501_v1, %v2499_v16  ;;  %v2505_v49 = vmul.f32 %v2502_v53, %v2499_v16  ;;  %v2506_v17 = vmul.f32 %v2503_v25, %v2499_v16  ;;  %v2609_v25 = vperm.slane %v5470_v10, 5 }
 0xc00   : > { %2512 = vrot.lane.b32.xlu2 %v2505_v49, %s6037_s29  ;;  %2510 = vrot.lane.b32.xlu1 %v2504_v8, %s6037_s29 }
 0xc08   : > { %2525 = vperm.xlu2 %3442, %v5481_v50   ;;  %2514 = vrot.lane.b32.xlu1 %v2506_v17, %s6037_s29  ;;  %v2610_v17 = vperm.slane %v5466_v23, 5 }
 0xc10   : > { %3444 = vset.pattern.permute.xlu2 %v3697_v63 }
 0xc5a   : > { %v2513_v12 = vpop.permute.xlu2 %2512 }
 0xc62   : > { %v2526_v42 = vpop.permute.xlu2 %2525 }
 0xc63   : > { %v2531_v36 = vmul.f32 %v2528_v19, %v2526_v42  ;;  %v2532_v4 = vmul.f32 %v2529_v7, %v2526_v42  ;;  %v2533_v27 = vmul.f32 %v2530_v22, %v2526_v42  ;;  %v2611_v19 = vperm.slane %v5462_v11, 5 }
 0xc64   : > { %v3700_v22 = vmov 31  }
 0xc65   : > { %2541 = vrot.lane.b32.xlu2 %v2533_v27, %s6037_s29  ;;  %2537 = vrot.lane.b32.xlu0 %v2531_v36, %s6037_s29  ;;  %v2637_v27 = vperm.slane %v5466_v23, 6 }
 0xc66   : > { %2539 = vrot.lane.b32.xlu1 %v2532_v4, %s6037_s29  ;;  %v2636_v4 = vperm.slane %v5470_v10, 6 }
 0xc6d   : > { %2552 = vperm.xlu0 %3443, %v5481_v50  }
 0xc72   : > { %v2511_v29 = vpop.permute.xlu1 %2510 }
 0xc73   : > { %v2516_v39 = vsel %vm1068_vm3, %v2511_v29, %v2513_v12  ;;  %v2521_v26 = vadd.f32 %v2511_v29, %v2494_v5  ;;  %v2638_v29 = vperm.slane %v5462_v11, 6 }
 0xc74   : > { %v2522_v13 = vadd.f32 %v2516_v39, %v2495_v20 }
 0xc75   : > { %3445 = vset.pattern.permute.xlu0 %v3698_v18  ;;  %v2664_v18 = vperm.slane %v5466_v23, 7  ;;  %v6040_v23 = vmov 7  }
 0xc7a   : > { %v2515_v33 = vpop.permute.xlu1 %2514 }
 0xc7b   : > { %v2517_v2 = vsel %vm1068_vm3, %v2513_v12, %v2515_v33 }
 0xc7c   : > { %v2523_v28 = vadd.f32 %v2517_v2, %v2496_v9 }
 0xcbf   : > { %v2542_v46 = vpop.permute.xlu2 %2541 }
 0xcd7   : > { %v2538_v51 = vpop.permute.xlu0 %2537 }
 0xcd8   : > { %v2548_v34 = vadd.f32 %v2538_v51, %v2521_v26  ;;  %v2540_v60 = vpop.permute.xlu1 %2539 }
 0xcd9   : > { %v2543_v52 = vsel %vm1068_vm3, %v2538_v51, %v2540_v60  ;;  %v2544_v45 = vsel %vm1068_vm3, %v2540_v60, %v2542_v46 }
 0xcda   : > { %v2549_v3 = vadd.f32 %v2543_v52, %v2522_v13  ;;  %v2550_v31 = vadd.f32 %v2544_v45, %v2523_v28  ;;  %v5544_v52 = vld [vmem:[#allocation6] sm:$0xff] }
 0xcdf   : > { %v2553_v54 = vpop.permute.xlu0 %2552 }
 0xce0   : > { %v2558_v30 = vmul.f32 %v2555_v44, %v2553_v54  ;;  %v2559_v57 = vmul.f32 %v2556_v48, %v2553_v54  ;;  %v2560_v0 = vmul.f32 %v2557_v6, %v2553_v54  ;;  %v6038_v6 = vmov 2  }
 0xce2   : > { %2566 = vrot.lane.b32.xlu2 %v2559_v57, %s6037_s29  ;;  %2564 = vrot.lane.b32.xlu1 %v2558_v30, %s6037_s29  ;;  %v5548_v57 = vld [vmem:[#allocation6 + $0x8] sm:$0xff] }
 0xcea   : > { %2579 = vperm.xlu2 %3444, %v5481_v50   ;;  %2568 = vrot.lane.b32.xlu1 %v2560_v0, %s6037_s29  ;;  %v2663_v0 = vperm.slane %v5470_v10, 7 }
 0xcf2   : > { %3446 = vset.pattern.permute.xlu2 %v3699_v15 }
 0xd3c   : > { %v2567_v56 = vpop.permute.xlu2 %2566 }
 0xd44   : > { %v2580_v55 = vpop.permute.xlu2 %2579 }
 0xd45   : > { %v2585_v14 = vmul.f32 %v2582_v24, %v2580_v55  ;;  %v2586_v21 = vmul.f32 %v2583_v40, %v2580_v55  ;;  %v2587_v58 = vmul.f32 %v2584_v47, %v2580_v55  ;;  %v6039_v40 = vmov 5   ;;  %v2686_v55 = vld [vmem:[%s5829_s7] sm:$0xff] }
 0xd46   : > { %v2665_v47 = vperm.slane %v5462_v11, 7  ;;  %v6042_v11 = vmov 3  }
 0xd47   : > { %2595 = vrot.lane.b32.xlu2 %v2587_v58, %s6037_s29  ;;  %2591 = vrot.lane.b32.xlu0 %v2585_v14, %s6037_s29  ;;  %v6041_v14 = vmov 1   ;;  %v6044_v58 = vmov 6  }
 0xd48   : > { %2593 = vrot.lane.b32.xlu1 %v2586_v21, %s6037_s29  ;;  %v6043_v21 = vmov 4  }
 0xd4f   : > { %2606 = vperm.xlu0 %3445, %v5481_v50  }
 0xd54   : > { %v2565_v61 = vpop.permute.xlu1 %2564 }
 0xd55   : > { %v2570_v62 = vsel %vm1068_vm3, %v2565_v61, %v2567_v56  ;;  %v2575_v20 = vadd.f32 %v2565_v61, %v2548_v34  ;;  %v6045_v61 = vmov 8  }
 0xd56   : > { %v2576_v35 = vadd.f32 %v2570_v62, %v2549_v3 }
 0xd57   : > { %3447 = vset.pattern.permute.xlu0 %v3700_v22  ;;  %v6051_v22 = vmov 17  }
 0xd5c   : > { %v2569_v41 = vpop.permute.xlu1 %2568 }
 0xd5d   : > { %v2571_v5 = vsel %vm1068_vm3, %v2567_v56, %v2569_v41 }
 0xd5e   : > { %v2577_v59 = vadd.f32 %v2571_v5, %v2550_v31 }
 0xda1   : > { %v2596_v42 = vpop.permute.xlu2 %2595 }
 0xdb9   : > { %v2592_v1 = vpop.permute.xlu0 %2591 }
 0xdba   : > { %v2602_v53 = vadd.f32 %v2592_v1, %v2575_v20  ;;  %v2594_v16 = vpop.permute.xlu1 %2593 }
 0xdbb   : > { %v2597_v8 = vsel %vm1068_vm3, %v2592_v1, %v2594_v16  ;;  %v2598_v63 = vsel %vm1068_vm3, %v2594_v16, %v2596_v42  ;;  %v6052_v42 = vmov 13  }
 0xdbc   : > { %v2603_v49 = vadd.f32 %v2597_v8, %v2576_v35  ;;  %v2604_v26 = vadd.f32 %v2598_v63, %v2577_v59 }
 0xdc1   : > { %v2607_v43 = vpop.permute.xlu0 %2606 }
 0xdc2   : > { %v2612_v32 = vmul.f32 %v2609_v25, %v2607_v43  ;;  %v2613_v12 = vmul.f32 %v2610_v17, %v2607_v43  ;;  %v2614_v7 = vmul.f32 %v2611_v19, %v2607_v43  ;;  %v6046_v17 = vmov 10  }
 0xdc3   : > { %v6047_v43 = vmov 9   ;;  %v6050_v19 = vmov 15  }
 0xdc4   : > { %2620 = vrot.lane.b32.xlu2 %v2613_v12, %s6037_s29  ;;  %2618 = vrot.lane.b32.xlu1 %v2612_v32, %s6037_s29  ;;  %v6048_v32 = vmov 12   ;;  %v6049_v12 = vmov 11  }
 0xdcc   : > { %2633 = vperm.xlu2 %3446, %v5481_v50   ;;  %2622 = vrot.lane.b32.xlu1 %v2614_v7, %s6037_s29 }
 0xdd4   : > { %3448 = vset.pattern.permute.xlu2 %v5945_v38 }
 0xe1e   : > { %v2621_v36 = vpop.permute.xlu2 %2620 }
 0xe26   : > { %v2634_v39 = vpop.permute.xlu2 %2633 }
 0xe27   : > { %v2639_v13 = vmul.f32 %v2636_v4, %v2634_v39  ;;  %v2640_v37 = vmul.f32 %v2637_v27, %v2634_v39  ;;  %v2641_v9 = vmul.f32 %v2638_v29, %v2634_v39  ;;  %v6053_v4 = vmov 14   ;;  %v3076_v39 = vld [vmem:[%s5831_s9] sm:$0xff] }
 0xe29   : > { %2649 = vrot.lane.b32.xlu2 %v2641_v9, %s6037_s29  ;;  %2645 = vrot.lane.b32.xlu0 %v2639_v13, %s6037_s29  ;;  %v6054_v9 = vmov 16  }
 0xe2a   : > { %2647 = vrot.lane.b32.xlu1 %v2640_v37, %s6037_s29 }
 0xe31   : > { %2660 = vperm.xlu0 %3447, %v5481_v50  }
 0xe36   : > { %v2619_v33 = vpop.permute.xlu1 %2618 }
 0xe37   : > { %v2624_v2 = vsel %vm1068_vm3, %v2619_v33, %v2621_v36  ;;  %v2629_v3 = vadd.f32 %v2619_v33, %v2602_v53 }
 0xe38   : > { %v2630_v28 = vadd.f32 %v2624_v2, %v2603_v49 }
 0xe39   : > { %3449 = vset.pattern.permute.xlu0 %v5945_v38 }
 0xe3a   : > { %2720 = vperm.xlu0 %3449, %v5544_v52  }
 0xe3e   : > { %v2623_v51 = vpop.permute.xlu1 %2622 }
 0xe3f   : > { %v2625_v34 = vsel %vm1068_vm3, %v2621_v36, %v2623_v51 }
 0xe40   : > { %v5542_v60 = vadd.f32 %v2625_v34, %v2604_v26  ;;  %v6056_v34 = vmov 19  }
 0xe42   : > { %3454 = vset.pattern.permute.xlu0 %v6038_v6 }
 0xe43   : > { %2757 = vperm.xlu0 %3454, %v5548_v57  }
 0xe4b   : > { %3459 = vset.pattern.permute.xlu0 %v6039_v40 }
 0xe4c   : > { %2807 = vperm.xlu0 %3459, %v5544_v52  }
 0xe54   : > { %3464 = vset.pattern.permute.xlu0 %v6040_v23 }
 0xe83   : > { %v2650_v62 = vpop.permute.xlu2 %2649 }
 0xe9b   : > { %v2646_v50 = vpop.permute.xlu0 %2645 }
 0xe9c   : > { %v2656_v44 = vadd.f32 %v2646_v50, %v2629_v3  ;;  %v2648_v48 = vpop.permute.xlu1 %2647 }
 0xe9d   : > { %v2651_v54 = vsel %vm1068_vm3, %v2646_v50, %v2648_v48  ;;  %v2652_v1 = vsel %vm1068_vm3, %v2648_v48, %v2650_v62  ;;  %v3077_v50 = vld [vmem:[%s5831_s9 + $0x8] sm:$0xff] }
 0xe9e   : > { %v2657_v30 = vadd.f32 %v2651_v54, %v2630_v28  ;;  %v2658_v53 = vadd.f32 %v2652_v1, %v5542_v60  ;;  %v6055_v28 = vmov 18  }
 0xea3   : > { %v2661_v46 = vpop.permute.xlu0 %2660 }
 0xea4   : > { %v2666_v56 = vmul.f32 %v2663_v0, %v2661_v46  ;;  %v2667_v24 = vmul.f32 %v2664_v18, %v2661_v46  ;;  %v2668_v10 = vmul.f32 %v2665_v47, %v2661_v46 }
 0xea6   : > { %2674 = vrot.lane.b32.xlu2 %v2667_v24, %s6037_s29  ;;  %2672 = vrot.lane.b32.xlu1 %v2666_v56, %s6037_s29 }
 0xeac   : > { %v2721_v63 = vpop.permute.xlu0 %2720 }
 0xeae   : > { %2676 = vrot.lane.b32.xlu1 %v2668_v10, %s6037_s29  ;;  %2689 = vperm.xlu2 %3448, %v2686_v55   ;;  %s3242_s29 = smul.u32 96, %s3778_s17  ;;  %s3129_s17 = scalar_lea.sflag [#allocation5], %s380_s12 }
 0xeb0   : > { %s3140_s18 = scalar_lea.hbm %s5832_s10, %s3242_s29 }
 0xeb5   : > { %v5661_v60 = vpop.permute.xlu0 %2757 }
 0xeb6   : > { %2725 = vperm.xlu1 %3450, %v5548_v57   ;;  %3451 = vset.pattern.permute.xlu2 %v6041_v14 }
 0xeb7   : > { %2735 = vperm.xlu2 %3451, %v5544_v52  }
 0xebe   : > { %3452 = vset.pattern.permute.xlu1 %v6041_v14  ;;  %v2808_v48 = vpop.permute.xlu0 %2807 }
 0xebf   : > { %2739 = vperm.xlu1 %3452, %v5548_v57   ;;  %3453 = vset.pattern.permute.xlu2 %v6038_v6 }
 0xec0   : > { %2753 = vperm.xlu2 %3453, %v5544_v52  }
 0xec7   : > { %3455 = vset.pattern.permute.xlu1 %v6042_v11 }
 0xec8   : > { %2771 = vperm.xlu1 %3455, %v5544_v52   ;;  %3456 = vset.pattern.permute.xlu2 %v6042_v11 }
 0xec9   : > { %2775 = vperm.xlu2 %3456, %v5548_v57  }
 0xed0   : > { %3457 = vset.pattern.permute.xlu1 %v6043_v21 }
 0xed1   : > { %2789 = vperm.xlu1 %3457, %v5544_v52   ;;  %3458 = vset.pattern.permute.xlu2 %v6043_v21 }
 0xed2   : > { %2793 = vperm.xlu2 %3458, %v5548_v57  }
 0xed9   : > { %3460 = vset.pattern.permute.xlu1 %v6039_v40  ;;  %v5688_v40 = vld [vmem:[%s4442_s28 + $0x38] sm:$0xff] }
 0xeda   : > { %2811 = vperm.xlu1 %3460, %v5548_v57   ;;  %3461 = vset.pattern.permute.xlu2 %v6044_v58  ;;  %v2869_v47 = vperm.slane %v5688_v40, 0  ;;  %v2887_v55 = vperm.slane %v5688_v40, 1 }
 0xedb   : > { %2825 = vperm.xlu2 %3461, %v5544_v52  }
 0xee2   : > { %3462 = vset.pattern.permute.xlu1 %v6044_v58 }
 0xee3   : > { %2829 = vperm.xlu1 %3462, %v5548_v57   ;;  %3463 = vset.pattern.permute.xlu2 %v6040_v23 }
 0xee4   : > { %2843 = vperm.xlu2 %3463, %v5544_v52  }
 0xeeb   : > { %3465 = vset.pattern.permute.xlu1 %v6045_v61 }
 0xeec   : > { %3466 = vset.pattern.permute.xlu2 %v6045_v61 }
 0xf00   : > { %v2675_v35 = vpop.permute.xlu2 %2674 }
 0xf08   : > { %v2690_v31 = vpop.permute.xlu2 %2689 }
 0xf11   : > { %v5615_v7 = vpop.permute.xlu2 %2735 }
 0xf18   : > { %v2673_v45 = vpop.permute.xlu1 %2672 }
 0xf19   : > { %v2678_v41 = vsel %vm1068_vm3, %v2673_v45, %v2675_v35  ;;  %v2683_v5 = vadd.f32 %v2673_v45, %v2656_v44 }
 0xf1a   : > { %v2684_v59 = vadd.f32 %v2678_v41, %v2657_v30  ;;  %v5623_v36 = vpop.permute.xlu2 %2753 }
 0xf1b   : > { %v2692_v15 = vadd.f32 %v2690_v31, %v2683_v5 }
 0xf1c   : > { %v2693_v20 = vadd.f32 %v2690_v31, %v2684_v59 }
 0xf1d   : > { %2698 = vrot.lane.b32.xlu0 %v2692_v15, %s3657_s21  ;;  %v5707_v15 = vld [vmem:[%s4442_s28 + $0x30] sm:$0xff] }
 0xf1e   : > { %2700 = vrot.lane.b32.xlu1 %v2693_v20, %s3657_s21  ;;  %v2868_v20 = vperm.slane %v5707_v15, 0 }
 0xf20   : > { %v2677_v16 = vpop.permute.xlu1 %2676 }
 0xf21   : > { %v2679_v8 = vsel %vm1068_vm3, %v2675_v35, %v2677_v16  ;;  %v2923_v16 = vperm.slane %v5688_v40, 3 }
 0xf22   : > { %v2685_v49 = vadd.f32 %v2679_v8, %v2658_v53 }
 0xf23   : > { %v5632_v29 = vpop.permute.xlu2 %2775 }
 0xf24   : > { %v2694_v25 = vadd.f32 %v2690_v31, %v2685_v49 }
 0xf25   : > { %2847 = vperm.xlu0 %3464, %v5548_v57  }
 0xf26   : > { %2861 = vperm.xlu1 %3465, %v5544_v52   ;;  %2702 = vrot.lane.b32.xlu2 %v2694_v25, %s3657_s21  ;;  %s3143_s21 = sshll.u32 %s3140_s18, 4  ;;  %s3144_s21 = int_to_ptr.hbm [resolvable:$true] %s3143_s21 }
 0xf27   : > { %s3573_s27 = sshra.s32 %s3144_s21, 4  ;;  %s3574_s27 = int_to_ptr.hbm [resolvable:$true] %s3573_s27 }
 0xf28   : > { %v5629_v27 = vpop.permute.xlu1 %2725  ;;  %s3575_s11 = scalar_lea.hbm %s3574_s27, 96  ;;  %p3580_p3 = scmp.lt.s32.totalorder %s3574_s27, %s5832_s10 }
 0xf29   : > { %p3576_p0 = scmp.ne.s32.totalorder %s3574_s27, %s3575_s11  ;;  %p3581_p4 = scmp.lt.s32.totalorder %s3579_s20, %s3575_s11 }
 0xf2b   : > { %p3577_p1 = pnand %p3576_p0, %p3795_p5  ;;  %p3582_p7 = por %p3581_p4, %p3580_p3 }
 0xf2c   : > { %v5643_v37 = vpop.permute.xlu2 %2793 }
 0xf2d   : > { %3469 = vset.pattern.permute.xlu0 %v6046_v17  ;;  %p3578_p2 = pneg %p3577_p1 }
 0xf2e   : > { %3467 = vset.pattern.permute.xlu1 %v6047_v43  ;;  %2865 = vperm.xlu2 %3466, %v5548_v57  }
 0xf2f   : > { %2897 = vperm.xlu0 %3469, %v5544_v52   ;;  %2879 = vperm.xlu1 %3467, %v5544_v52   ;;  %p3583_p8 = pnand %p3582_p7, %p3578_p2 }
 0xf31   : > { %v5641_v13 = vpop.permute.xlu1 %2739 }
 0xf35   : > { %v5649_v2 = vpop.permute.xlu2 %2825 }
 0xf36   : > { %3468 = vset.pattern.permute.xlu2 %v6047_v43 }
 0xf37   : > { %3474 = vset.pattern.permute.xlu0 %v6048_v32  ;;  %3470 = vset.pattern.permute.xlu1 %v6046_v17 }
 0xf38   : > { %2883 = vperm.xlu2 %3468, %v5548_v57   ;;  %2937 = vperm.xlu0 %3474, %v5548_v57  }
 0xf39   : > { %2901 = vperm.xlu1 %3470, %v5548_v57  }
 0xf3a   : > { %v2772_v33 = vpop.permute.xlu1 %2771 }
 0xf3e   : > { %v5655_v51 = vpop.permute.xlu2 %2843 }
 0xf40   : > { %3471 = vset.pattern.permute.xlu2 %v6049_v12  ;;  %3479 = vset.pattern.permute.xlu0 %v6050_v19 }
 0xf41   : > { %3472 = vset.pattern.permute.xlu1 %v6049_v12  ;;  %2915 = vperm.xlu2 %3471, %v5544_v52  }
 0xf42   : > { %2987 = vperm.xlu0 %3479, %v5544_v52   ;;  %2919 = vperm.xlu1 %3472, %v5548_v57  }
 0xf43   : > { %v2790_v26 = vpop.permute.xlu1 %2789 }
 0xf49   : > { %3473 = vset.pattern.permute.xlu2 %v6048_v32 }
 0xf4a   : > { %3484 = vset.pattern.permute.xlu0 %v6051_v22  ;;  %3475 = vset.pattern.permute.xlu1 %v6052_v42 }
 0xf4b   : > { %2933 = vperm.xlu2 %3473, %v5544_v52   ;;  %3027 = vperm.xlu0 %3484, %v5548_v57  }
 0xf4c   : > { %2951 = vperm.xlu1 %3475, %v5544_v52   ;;  %v5663_v3 = vpop.permute.xlu1 %2811 }
 0xf53   : > { %3476 = vset.pattern.permute.xlu2 %v6052_v42  ;;  %3489 = vset.pattern.permute.xlu0 %v5945_v38 }
 0xf54   : > { %3477 = vset.pattern.permute.xlu1 %v6053_v4  ;;  %2955 = vperm.xlu2 %3476, %v5548_v57  }
 0xf55   : > { %2969 = vperm.xlu1 %3477, %v5544_v52   ;;  %3080 = vperm.xlu0 %3489, %v3076_v39   ;;  %v5671_v54 = vpop.permute.xlu1 %2829  ;;  %v2886_v39 = vperm.slane %v5707_v15, 1 }
 0xf5c   : > { %3478 = vset.pattern.permute.xlu2 %v6053_v4 }
 0xf5d   : > { %3480 = vset.pattern.permute.xlu1 %v6050_v19  ;;  %2973 = vperm.xlu2 %3478, %v5548_v57  }
 0xf5e   : > { %2991 = vperm.xlu1 %3480, %v5548_v57  }
 0xf65   : > { %3481 = vset.pattern.permute.xlu2 %v6054_v9 }
 0xf66   : > { %3482 = vset.pattern.permute.xlu1 %v6054_v9  ;;  %3005 = vperm.xlu2 %3481, %v5544_v52  }
 0xf67   : > { %3009 = vperm.xlu1 %3482, %v5548_v57  }
 0xf6e   : > { %3483 = vset.pattern.permute.xlu2 %v6051_v22 }
 0xf6f   : > { %3485 = vset.pattern.permute.xlu1 %v6055_v28  ;;  %3023 = vperm.xlu2 %3483, %v5544_v52  }
 0xf70   : > { %3041 = vperm.xlu1 %3485, %v5544_v52  }
 0xf77   : > { %3486 = vset.pattern.permute.xlu2 %v6055_v28 }
 0xf78   : > { %3487 = vset.pattern.permute.xlu1 %v6056_v34  ;;  %3045 = vperm.xlu2 %3486, %v5548_v57  }
 0xf79   : > { %3059 = vperm.xlu1 %3487, %v5544_v52  }
 0xf80   : > { %3488 = vset.pattern.permute.xlu2 %v6056_v34  ;;  %v2703_v44 = vpop.permute.xlu2 %2702  ;;  %v2922_v34 = vperm.slane %v5707_v15, 3 }
 0xf81   : > { %3490 = vset.pattern.permute.xlu1 %v5945_v38  ;;  %3063 = vperm.xlu2 %3488, %v5548_v57  }
 0xf82   : > { %3085 = vperm.xlu1 %3490, %v3077_v50  }
 0xf88   : > { %v5673_v52 = vpop.permute.xlu2 %2865 }
 0xf8f   : > { %v2699_v30 = vpop.permute.xlu0 %2698 }
 0xf90   : > { %v2701_v6 = vpop.permute.xlu1 %2700 }
 0xf91   : > { %v5676_v0 = vsel %vm833_vm6, %v2699_v30, %v2701_v6  ;;  %v5679_v18 = vsel %vm833_vm6, %v2701_v6, %v2703_v44 }
 0xf92   : > { %v5681_v46 = vpop.permute.xlu2 %2883  ;;  %v2728_v38 = vperm.slane %v5676_v0, 0  ;;  %v2729_v57 = vperm.slane %v5679_v18, 0  ;;  %v2742_v56 = vperm.slane %v5676_v0, 1  ;;  %v2743_v24 = vperm.slane %v5679_v18, 1  ;;  %3096 = vst [vmem:[%s4442_s28 + $0x20] sm:$0xff] %v5676_v0 }
 0xf93   : > { %v2760_v10 = vperm.slane %v5676_v0, 2  ;;  %v2761_v23 = vperm.slane %v5679_v18, 2  ;;  %3097 = vst [vmem:[%s4442_s28 + $0x28] sm:$0xff] %v5679_v18  ;;  %v2778_v35 = vperm.slane %v5676_v0, 3  ;;  %v2779_v45 = vperm.slane %v5679_v18, 3 }
 0xf94   : > { %v2730_v14 = vmul.f32 %v2728_v38, %v2721_v63  ;;  %v2731_v11 = vmul.f32 %v2729_v57, %v2721_v63  ;;  %v2744_v21 = vmul.f32 %v2742_v56, %v5615_v7  ;;  %v2745_v58 = vmul.f32 %v2743_v24, %v5615_v7 }
 0xf95   : > { %v2762_v61 = vmul.f32 %v2760_v10, %v5623_v36  ;;  %v2763_v62 = vmul.f32 %v2761_v23, %v5623_v36  ;;  %v2796_v5 = vperm.slane %v5676_v0, 4  ;;  %v2797_v59 = vperm.slane %v5679_v18, 4 }
 0xf96   : > { %v2748_v31 = vadd.f32 %v2744_v21, %v2730_v14  ;;  %v2749_v41 = vadd.f32 %v2745_v58, %v2731_v11  ;;  %v2814_v1 = vperm.slane %v5676_v0, 5  ;;  %v2815_v53 = vperm.slane %v5679_v18, 5 }
 0xf97   : > { %v2780_v17 = vmul.f32 %v2778_v35, %v2772_v33  ;;  %v2781_v43 = vmul.f32 %v2779_v45, %v2772_v33  ;;  %v2798_v32 = vmul.f32 %v2796_v5, %v2790_v26  ;;  %v2799_v12 = vmul.f32 %v2797_v59, %v2790_v26  ;;  %v2848_v63 = vpop.permute.xlu0 %2847 }
 0xf98   : > { %v2862_v8 = vpop.permute.xlu1 %2861  ;;  %v2766_v49 = vadd.f32 %v2762_v61, %v2748_v31  ;;  %v2767_v25 = vadd.f32 %v2763_v62, %v2749_v41  ;;  %v2832_v19 = vperm.slane %v5676_v0, 6  ;;  %v2833_v7 = vperm.slane %v5679_v18, 6 }
 0xf99   : > { %v2850_v36 = vperm.slane %v5676_v0, 7  ;;  %v2851_v4 = vperm.slane %v5679_v18, 7  ;;  %v2816_v9 = vmul.f32 %v2814_v1, %v2808_v48  ;;  %v2817_v28 = vmul.f32 %v2815_v53, %v2808_v48 }
 0xf9a   : > { %v2784_v22 = vadd.f32 %v2780_v17, %v2766_v49  ;;  %v2785_v42 = vadd.f32 %v2781_v43, %v2767_v25  ;;  %v2732_v6 = vmul.f32 %v2728_v38, %v5629_v27  ;;  %v2733_v14 = vmul.f32 %v2729_v57, %v5629_v27 }
 0xf9b   : > { %v2916_v33 = vpop.permute.xlu2 %2915  ;;  %v2852_v44 = vmul.f32 %v2850_v36, %v5655_v51  ;;  %v2853_v30 = vmul.f32 %v2851_v4, %v5655_v51  ;;  %v2746_v48 = vmul.f32 %v2742_v56, %v5641_v13  ;;  %v2747_v11 = vmul.f32 %v2743_v24, %v5641_v13 }
 0xf9c   : > { %v2802_v50 = vadd.f32 %v2798_v32, %v2784_v22  ;;  %v2803_v26 = vadd.f32 %v2799_v12, %v2785_v42  ;;  %v2834_v61 = vmul.f32 %v2832_v19, %v5649_v2  ;;  %v2835_v62 = vmul.f32 %v2833_v7, %v5649_v2 }
 0xf9d   : > { %v2750_v31 = vadd.f32 %v2746_v48, %v2732_v6  ;;  %v2751_v41 = vadd.f32 %v2747_v11, %v2733_v14  ;;  %v2764_v49 = vmul.f32 %v2760_v10, %v5661_v60  ;;  %v2765_v51 = vmul.f32 %v2761_v23, %v5661_v60 }
 0xf9e   : > { %v2820_v21 = vadd.f32 %v2816_v9, %v2802_v50  ;;  %v2821_v58 = vadd.f32 %v2817_v28, %v2803_v26  ;;  %v2904_v27 = vperm.slane %v5707_v15, 2  ;;  %v2905_v57 = vperm.slane %v5688_v40, 2 }
 0xf9f   : > { %v2768_v56 = vadd.f32 %v2764_v49, %v2750_v31  ;;  %v2769_v13 = vadd.f32 %v2765_v51, %v2751_v41  ;;  %v2782_v24 = vmul.f32 %v2778_v35, %v5632_v29  ;;  %v2783_v17 = vmul.f32 %v2779_v45, %v5632_v29 }
 0xfa0   : > { %v2838_v25 = vadd.f32 %v2834_v61, %v2820_v21  ;;  %v2839_v38 = vadd.f32 %v2835_v62, %v2821_v58  ;;  %v2870_v10 = vmul.f32 %v2868_v20, %v2862_v8  ;;  %v2871_v60 = vmul.f32 %v2869_v47, %v2862_v8 }
 0xfa1   : > { %v2880_v43 = vpop.permute.xlu1 %2879  ;;  %v2786_v23 = vadd.f32 %v2782_v24, %v2768_v56  ;;  %v2787_v12 = vadd.f32 %v2783_v17, %v2769_v13  ;;  %v2800_v22 = vmul.f32 %v2796_v5, %v5643_v37  ;;  %v2801_v42 = vmul.f32 %v2797_v59, %v5643_v37 }
 0xfa2   : > { %v2856_v2 = vadd.f32 %v2852_v44, %v2838_v25  ;;  %v2857_v32 = vadd.f32 %v2853_v30, %v2839_v38  ;;  %v2940_v35 = vperm.slane %v5707_v15, 4  ;;  %v2941_v29 = vperm.slane %v5688_v40, 4  ;;  %v2898_v30 = vpop.permute.xlu0 %2897 }
 0xfa3   : > { %v2804_v45 = vadd.f32 %v2800_v22, %v2786_v23  ;;  %v2805_v50 = vadd.f32 %v2801_v42, %v2787_v12  ;;  %v2818_v26 = vmul.f32 %v2814_v1, %v5663_v3  ;;  %v2819_v44 = vmul.f32 %v2815_v53, %v5663_v3 }
 0xfa4   : > { %v2874_v9 = vadd.f32 %v2870_v10, %v2856_v2  ;;  %v2875_v28 = vadd.f32 %v2871_v60, %v2857_v32  ;;  %v2872_v5 = vmul.f32 %v2868_v20, %v5673_v52  ;;  %v2873_v37 = vmul.f32 %v2869_v47, %v5673_v52 }
 0xfa5   : > { %v2934_v8 = vpop.permute.xlu2 %2933  ;;  %v2888_v59 = vmul.f32 %v2886_v39, %v2880_v43  ;;  %v2889_v6 = vmul.f32 %v2887_v55, %v2880_v43  ;;  %v2822_v14 = vadd.f32 %v2818_v26, %v2804_v45  ;;  %v2823_v1 = vadd.f32 %v2819_v44, %v2805_v50 }
 0xfa6   : > { %v2836_v3 = vmul.f32 %v2832_v19, %v5671_v54  ;;  %v2837_v53 = vmul.f32 %v2833_v7, %v5671_v54  ;;  %v2906_v48 = vmul.f32 %v2904_v27, %v2898_v30  ;;  %v2907_v11 = vmul.f32 %v2905_v57, %v2898_v30 }
 0xfa7   : > { %v2892_v21 = vadd.f32 %v2888_v59, %v2874_v9  ;;  %v2893_v20 = vadd.f32 %v2889_v6, %v2875_v28  ;;  %v2854_v52 = vmul.f32 %v2850_v36, %v2848_v63  ;;  %v2855_v47 = vmul.f32 %v2851_v4, %v2848_v63 }
 0xfa8   : > { %v2840_v58 = vadd.f32 %v2836_v3, %v2822_v14  ;;  %v2841_v61 = vadd.f32 %v2837_v53, %v2823_v1  ;;  %v2924_v62 = vmul.f32 %v2922_v34, %v2916_v33  ;;  %v2925_v19 = vmul.f32 %v2923_v16, %v2916_v33 }
 0xfa9   : > { %v2910_v31 = vadd.f32 %v2906_v48, %v2892_v21  ;;  %v2911_v54 = vadd.f32 %v2907_v11, %v2893_v20  ;;  %v2890_v7 = vmul.f32 %v2886_v39, %v5681_v46  ;;  %v2891_v0 = vmul.f32 %v2887_v55, %v5681_v46 }
 0xfaa   : > { %v2858_v36 = vadd.f32 %v2854_v52, %v2840_v58  ;;  %v2859_v41 = vadd.f32 %v2855_v47, %v2841_v61  ;;  %v2942_v49 = vmul.f32 %v2940_v35, %v2934_v8  ;;  %v2943_v51 = vmul.f32 %v2941_v29, %v2934_v8  ;;  %v2938_v10 = vpop.permute.xlu0 %2937  ;;  %v3497_v61 = vld [vmem:[#allocation1] sm:$0xff]  ;;  %v3498_v47 = vld [vmem:[#allocation1 + $0x9] sm:$0xff] }
 0xfab   : > { %v2902_v18 = vpop.permute.xlu1 %2901  ;;  %v2928_v4 = vadd.f32 %v2924_v62, %v2910_v31  ;;  %v2929_v63 = vadd.f32 %v2925_v19, %v2911_v54  ;;  %v2958_v23 = vperm.slane %v5707_v15, 5  ;;  %v2945_v12 = vmul.f32 %v2941_v29, %v2938_v10 }
 0xfac   : > { %v2876_v25 = vadd.f32 %v2872_v5, %v2858_v36  ;;  %v2877_v38 = vadd.f32 %v2873_v37, %v2859_v41  ;;  %v2908_v33 = vmul.f32 %v2904_v27, %v2902_v18  ;;  %v2909_v56 = vmul.f32 %v2905_v57, %v2902_v18 }
 0xfad   : > { %v2946_v13 = vadd.f32 %v2942_v49, %v2928_v4  ;;  %v2947_v24 = vadd.f32 %v2943_v51, %v2929_v63  ;;  %v2959_v27 = vperm.slane %v5688_v40, 5  ;;  %v2944_v57 = vmul.f32 %v2940_v35, %v2938_v10 }
 0xfae   : > { %v2956_v17 = vpop.permute.xlu2 %2955  ;;  %v2894_v43 = vadd.f32 %v2890_v7, %v2876_v25  ;;  %v2895_v39 = vadd.f32 %v2891_v0, %v2877_v38  ;;  %v2976_v28 = vperm.slane %v5707_v15, 6  ;;  %v2977_v45 = vperm.slane %v5688_v40, 6 }
 0xfaf   : > { %v2962_v50 = vmul.f32 %v2958_v23, %v2956_v17  ;;  %v2963_v26 = vmul.f32 %v2959_v27, %v2956_v17  ;;  %v2994_v11 = vperm.slane %v5707_v15, 7  ;;  %v2995_v21 = vperm.slane %v5688_v40, 7 }
 0xfb0   : > { %v2912_v2 = vadd.f32 %v2908_v33, %v2894_v43  ;;  %v2913_v32 = vadd.f32 %v2909_v56, %v2895_v39  ;;  %v3012_v52 = vperm.slane %v3497_v61, 0  ;;  %v3013_v62 = vperm.slane %v3498_v47, 0 }
 0xfb1   : > { %v3030_v36 = vperm.slane %v3497_v61, 1  ;;  %v3031_v41 = vperm.slane %v3498_v47, 1 }
 0xfb4   : > { %v2920_v46 = vpop.permute.xlu1 %2919  ;;  %v2988_v53 = vpop.permute.xlu0 %2987 }
 0xfb5   : > { %v2926_v55 = vmul.f32 %v2922_v34, %v2920_v46  ;;  %v2927_v60 = vmul.f32 %v2923_v16, %v2920_v46  ;;  %v2996_v31 = vmul.f32 %v2994_v11, %v2988_v53  ;;  %v2997_v54 = vmul.f32 %v2995_v21, %v2988_v53 }
 0xfb7   : > { %v2930_v22 = vadd.f32 %v2926_v55, %v2912_v2  ;;  %v2931_v42 = vadd.f32 %v2927_v60, %v2913_v32  ;;  %v2974_v9 = vpop.permute.xlu2 %2973  ;;  %v3048_v55 = vperm.slane %v3497_v61, 2  ;;  %v3049_v60 = vperm.slane %v3498_v47, 2 }
 0xfb8   : > { %v2980_v16 = vmul.f32 %v2976_v28, %v2974_v9  ;;  %v2981_v5 = vmul.f32 %v2977_v45, %v2974_v9 }
 0xfb9   : > { %v2948_v44 = vadd.f32 %v2944_v57, %v2930_v22  ;;  %v2949_v34 = vadd.f32 %v2945_v12, %v2931_v42  ;;  %v3066_v22 = vperm.slane %v3497_v61, 3  ;;  %v3067_v42 = vperm.slane %v3498_v47, 3 }
 0xfbb   : > { %v2966_v30 = vadd.f32 %v2962_v50, %v2948_v44  ;;  %v2967_v8 = vadd.f32 %v2963_v26, %v2949_v34 }
 0xfbd   : > { %v2984_v37 = vadd.f32 %v2980_v16, %v2966_v30  ;;  %v2985_v59 = vadd.f32 %v2981_v5, %v2967_v8  ;;  %v3028_v2 = vpop.permute.xlu0 %3027 }
 0xfbe   : > { %v2952_v6 = vpop.permute.xlu1 %2951 }
 0xfbf   : > { %v2960_v35 = vmul.f32 %v2958_v23, %v2952_v6  ;;  %v2961_v29 = vmul.f32 %v2959_v27, %v2952_v6  ;;  %v3034_v23 = vmul.f32 %v3030_v36, %v3028_v2  ;;  %v3035_v27 = vmul.f32 %v3031_v41, %v3028_v2 }
 0xfc0   : > { %v3006_v14 = vpop.permute.xlu2 %3005 }
 0xfc1   : > { %v2964_v1 = vadd.f32 %v2960_v35, %v2946_v13  ;;  %v2965_v3 = vadd.f32 %v2961_v29, %v2947_v24  ;;  %v3014_v18 = vmul.f32 %v3012_v52, %v3006_v14  ;;  %v3015_v4 = vmul.f32 %v3013_v62, %v3006_v14 }
 0xfc7   : > { %v2970_v48 = vpop.permute.xlu1 %2969  ;;  %v3081_v53 = vpop.permute.xlu0 %3080 }
 0xfc8   : > { %v2978_v20 = vmul.f32 %v2976_v28, %v2970_v48  ;;  %v2979_v58 = vmul.f32 %v2977_v45, %v2970_v48 }
 0xfc9   : > { %v3024_v19 = vpop.permute.xlu2 %3023 }
 0xfca   : > { %v2982_v7 = vadd.f32 %v2978_v20, %v2964_v1  ;;  %v2983_v0 = vadd.f32 %v2979_v58, %v2965_v3  ;;  %v3032_v40 = vmul.f32 %v3030_v36, %v3024_v19  ;;  %v3033_v25 = vmul.f32 %v3031_v41, %v3024_v19 }
 0xfcc   : > { %v3000_v63 = vadd.f32 %v2996_v31, %v2982_v7  ;;  %v3001_v49 = vadd.f32 %v2997_v54, %v2983_v0 }
 0xfce   : > { %v3018_v15 = vadd.f32 %v3014_v18, %v3000_v63  ;;  %v3019_v51 = vadd.f32 %v3015_v4, %v3001_v49 }
 0xfd0   : > { %v3036_v38 = vadd.f32 %v3032_v40, %v3018_v15  ;;  %v3037_v33 = vadd.f32 %v3033_v25, %v3019_v51  ;;  %v2992_v56 = vpop.permute.xlu1 %2991 }
 0xfd1   : > { %v2998_v13 = vmul.f32 %v2994_v11, %v2992_v56  ;;  %v2999_v24 = vmul.f32 %v2995_v21, %v2992_v56 }
 0xfd2   : > { %v3046_v39 = vpop.permute.xlu2 %3045 }
 0xfd3   : > { %v3002_v17 = vadd.f32 %v2998_v13, %v2984_v37  ;;  %v3003_v43 = vadd.f32 %v2999_v24, %v2985_v59  ;;  %v3052_v28 = vmul.f32 %v3048_v55, %v3046_v39  ;;  %v3053_v45 = vmul.f32 %v3049_v60, %v3046_v39 }
 0xfd9   : > { %v3010_v32 = vpop.permute.xlu1 %3009 }
 0xfda   : > { %v3016_v10 = vmul.f32 %v3012_v52, %v3010_v32  ;;  %v3017_v46 = vmul.f32 %v3013_v62, %v3010_v32 }
 0xfdb   : > { %v3064_v9 = vpop.permute.xlu2 %3063 }
 0xfdc   : > { %v3020_v57 = vadd.f32 %v3016_v10, %v3002_v17  ;;  %v3021_v12 = vadd.f32 %v3017_v46, %v3003_v43  ;;  %v3070_v44 = vmul.f32 %v3066_v22, %v3064_v9  ;;  %v3071_v34 = vmul.f32 %v3067_v42, %v3064_v9 }
 0xfde   : > { %v3038_v50 = vadd.f32 %v3034_v23, %v3020_v57  ;;  %v3039_v26 = vadd.f32 %v3035_v27, %v3021_v12 }
 0xfe0   : > { %v3056_v30 = vadd.f32 %v3052_v28, %v3038_v50  ;;  %v3057_v8 = vadd.f32 %v3053_v45, %v3039_v26 }
 0xfe2   : > { %v3042_v16 = vpop.permute.xlu1 %3041  ;;  %v3074_v5 = vadd.f32 %v3070_v44, %v3056_v30  ;;  %v3075_v37 = vadd.f32 %v3071_v34, %v3057_v8 }
 0xfe3   : > { %v3050_v59 = vmul.f32 %v3048_v55, %v3042_v16  ;;  %v3051_v6 = vmul.f32 %v3049_v60, %v3042_v16 }
 0xfe5   : > { %v3054_v35 = vadd.f32 %v3050_v59, %v3036_v38  ;;  %v3055_v29 = vadd.f32 %v3051_v6, %v3037_v33 }
 0xfeb   : > { %v3060_v14 = vpop.permute.xlu1 %3059 }
 0xfec   : > { %v3068_v1 = vmul.f32 %v3066_v22, %v3060_v14  ;;  %v3069_v3 = vmul.f32 %v3067_v42, %v3060_v14 }
 0xfee   : > { %v3072_v48 = vadd.f32 %v3068_v1, %v3054_v35  ;;  %v3073_v11 = vadd.f32 %v3069_v3, %v3055_v29 }
 0xff0   : > { %v3088_v21 = vadd.f32 %v3081_v53, %v3072_v48  ;;  %v3089_v20 = vadd.f32 %v3081_v53, %v3073_v11 }
 0xff2   : > { %3092 = vst [vmem:[%s4442_s28] sm:$0xff] %v3088_v21 }
 0xff3   : > { %3093 = vst [vmem:[%s4442_s28 + $0x8] sm:$0xff] %v3089_v20 }
 0xff4   : > { %v3086_v58 = vpop.permute.xlu1 %3085 }
 0xff5   : > { %v3090_v61 = vadd.f32 %v3086_v58, %v3074_v5  ;;  %v3091_v52 = vadd.f32 %v3086_v58, %v3075_v37 }
 0xff7   : > { %3094 = vst [vmem:[%s4442_s28 + $0x10] sm:$0xff] %v3090_v61 }
 0xff8   : > { %3095 = vst [vmem:[%s4442_s28 + $0x18] sm:$0xff] %v3091_v52 }
 0xff9   : > { %3586 = shalt.err (!%p3583_p8)
}
 0xffa   : > { %s3701_s28 = smov 256   ;;  %s6057_s12 = smov 16  }
 0xffb   : > { %3251 = dma.vmem_to_hbm [thread:$0]  (%p3795_p5), %s3142_s30, 1536, %s3144_s21, %s3129_s17, %s3701_s28, %s3701_s28, %s6057_s12  }
 0xffc PF: > { %p3268_p9 = scmp.ge.s32.totalorder %s3629_s16, 2  ;;  %s3158_s26 = sand.u32 1, %s3617_s13  }
 0xffd   : > { %s3159_s29 = scalar_lea.sflag [#allocation5], %s3158_s26 }
 0xffe   : > { %p3261_p10 = pnand %p3268_p9, %p3799_p6 }
0x1000   : > { %p3262_p11 = pneg %p3261_p10 }
0x1002   : > { %3612 = dma.done.wait (%p3262_p11), %s3159_s29, 1536  }
0x1003   : > { %3614 = vsyncadd (%p3262_p11), %s3159_s29, 4294965760  ;;  %p22_p12 = scmp.ge.s32.totalorder %s3782_s19, 4   ;;  %s6058_s13 = smov %s3621_s14 }
0x1004   : > { %s6059_s14 = smov %s3625_s15  ;;  %s6060_s15 = smov %s3793_s22 }
0x1005   : > { %s6061_s16 = smov %s3782_s19  ;;  %24 = sbr.rel (!%p22_p12) target bundleno = 5 (0x5), region = 125 }
0x100a   :  { %3165 = vsyncpa [#allocation4], 1 }
0x100b   :  { %3167 = vsyncpa [#allocation4 + $0x1], 1 }
0x100c   :  { %3168 = vsyncpa [#allocation7], 1 }
0x100d   :  { %3169 = vsyncpa [#allocation5], 1 }
0x100e   :  { %3171 = vsyncpa [#allocation5 + $0x1], 1 }

</bundles_post_ra>
